<compile_context>
chip_gen: v5e
topology: v5e:2x2
jax: 0.10.0
libtpu: 0.0.40
codegen_flags: <defaults>
</compile_context>

<pallas_src>
import functools

import numpy as np
import jax
import jax.numpy as jnp
from jax.experimental import pallas as pl
from jax.experimental.pallas import tpu as pltpu


# ---------------------------------------------------------------------------
# Fused segmentation-head kernel
#   conv1(3x3)+BN+ReLU -> conv2(3x3)+BN+ReLU -> conv3(1x1) -> bilinear upsample
# One grid step per batch element; all intermediates stay in VMEM/vregs.
# ---------------------------------------------------------------------------
def _fused_head_kernel(feat_ref, w1_ref, t1_ref, w2_ref, t2_ref, w3t_ref,
                       b3_ref, mask_ref, ah_ref, awt_ref, out_ref,
                       *, hf, wf, num_classes):
    he, we = hf + 2, wf + 2                 # extended grid (= conv2's padded input)
    hidden = feat_ref.shape[-1]
    c1 = w1_ref.shape[-1]
    c2 = w2_ref.shape[-1]

    # [hf+4, wf+4, hidden] zero-padded NHWC features for this batch element.
    x0 = feat_ref[0]

    # ---- conv1 (3x3, pad=1) + folded BN + ReLU ------------------------------
    # Computed on the (hf+2, wf+2) extended grid so that, after masking the
    # 1-pixel ring to zero, y1 doubles as conv2's zero-padded input.
    acc1 = jnp.zeros((he * we, c1), jnp.float32)
    for kh in range(3):
        for kw in range(3):
            patch = x0[kh:kh + he, kw:kw + we, :].reshape(he * we, hidden)
            acc1 = acc1 + jnp.dot(patch, w1_ref[kh * 3 + kw],
                                  preferred_element_type=jnp.float32)
    y1 = jnp.maximum(acc1 + t1_ref[...], 0.0) * mask_ref[...]   # zero the border ring
    y1 = y1.reshape(he, we, c1)

    # ---- conv2 (3x3, pad=1) + folded BN + ReLU ------------------------------
    acc2 = jnp.zeros((hf * wf, c2), jnp.float32)
    for kh in range(3):
        for kw in range(3):
            patch = y1[kh:kh + hf, kw:kw + wf, :].reshape(hf * wf, c1)
            acc2 = acc2 + jnp.dot(patch, w2_ref[kh * 3 + kw],
                                  preferred_element_type=jnp.float32)
    y2 = jnp.maximum(acc2 + t2_ref[...], 0.0).reshape(hf, wf, c2)

    # ---- conv3 (1x1, num_classes outputs) fused with bilinear upsample ------
    # Per class: channel reduction on the VPU, then A_h @ logits @ A_w^T on the
    # MXU, written straight into the NCHW output block.
    for c in range(num_classes):
        wc = w3t_ref[c]                                          # [c2]
        logit = jnp.sum(y2 * wc[None, None, :], axis=-1) + b3_ref[c]   # [hf, wf]
        tmp = jnp.dot(logit, awt_ref[...],
                      preferred_element_type=jnp.float32)        # [hf, W]
        out_ref[0, c, :, :] = jnp.dot(ah_ref[...], tmp,
                                      preferred_element_type=jnp.float32)


def _fused_seg_head(feat_pad, w1_tap, t1, w2_tap, t2, w3t, b3, mask, ah, awt,
                    *, num_classes):
    B, hp4, wp4, hidden = feat_pad.shape
    hf, wf = hp4 - 4, wp4 - 4
    he, we = hf + 2, wf + 2
    H, W = ah.shape[0], awt.shape[1]
    c1, c2 = w1_tap.shape[-1], w2_tap.shape[-1]

    kernel = functools.partial(_fused_head_kernel, hf=hf, wf=wf,
                               num_classes=num_classes)
    return pl.pallas_call(
        kernel,
        out_shape=jax.ShapeDtypeStruct((B, num_classes, H, W), jnp.float32),
        grid=(B,),
        in_specs=[
            pl.BlockSpec((1, hp4, wp4, hidden), lambda b: (b, 0, 0, 0)),
            pl.BlockSpec((9, hidden, c1), lambda b: (0, 0, 0)),
            pl.BlockSpec((1, c1), lambda b: (0, 0)),
            pl.BlockSpec((9, c1, c2), lambda b: (0, 0, 0)),
            pl.BlockSpec((1, c2), lambda b: (0, 0)),
            pl.BlockSpec((num_classes, c2), lambda b: (0, 0)),
            pl.BlockSpec(memory_space=pltpu.MemorySpace.SMEM),   # conv3 bias
            pl.BlockSpec((he * we, 1), lambda b: (0, 0)),        # interior mask
            pl.BlockSpec((H, hf), lambda b: (0, 0)),             # A_h
            pl.BlockSpec((wf, W), lambda b: (0, 0)),             # A_w^T
        ],
        out_specs=pl.BlockSpec((1, num_classes, H, W), lambda b: (b, 0, 0, 0)),
        compiler_params=pltpu.CompilerParams(
            dimension_semantics=("parallel",)),
    )(feat_pad, w1_tap, t1, w2_tap, t2, w3t, b3, mask, ah, awt)


# ---------------------------------------------------------------------------
# Host-side constants: bilinear interpolation matrices & border mask
# ---------------------------------------------------------------------------
@functools.lru_cache(maxsize=None)
def _bilinear_matrix(out_size, in_size):
    """Dense matrix reproducing F.interpolate bilinear, align_corners=False."""
    scale = in_size / out_size
    A = np.zeros((out_size, in_size), dtype=np.float32)
    for i in range(out_size):
        src = max((i + 0.5) * scale - 0.5, 0.0)
        i0 = min(int(np.floor(src)), in_size - 1)
        i1 = min(i0 + 1, in_size - 1)
        frac = src - i0
        A[i, i0] += 1.0 - frac
        A[i, i1] += frac
    return A


@functools.lru_cache(maxsize=None)
def _interior_mask(hf, wf):
    """1.0 on the interior of the (hf+2, wf+2) extended grid, 0.0 on the ring."""
    he, we = hf + 2, wf + 2
    m = np.zeros((he, we), np.float32)
    m[1:hf + 1, 1:wf + 1] = 1.0
    return m.reshape(he * we, 1)


# ---------------------------------------------------------------------------
# Parameter construction (PyTorch layouts, BN scale folded into the weights)
# ---------------------------------------------------------------------------
def init_params(key, img_channels=3, hidden=128, num_classes=2):
    ks = jax.random.split(key, 16)
    normal = lambda k, shape, s=0.05: s * jax.random.normal(k, shape, jnp.float32)

    # Stand-in CLS projection (see TODO in forward).
    proj_w = normal(ks[0], (img_channels, hidden))
    proj_b = normal(ks[1], (hidden,))

    # Segmentation head (PyTorch conv weight layout [Cout, Cin, kh, kw]).
    w1 = normal(ks[2], (256, hidden, 3, 3)); b1 = normal(ks[3], (256,))
    g1 = 1.0 + 0.1 * jax.random.normal(ks[4], (256,), jnp.float32)
    be1 = normal(ks[5], (256,)); m1 = normal(ks[6], (256,))
    v1 = jax.random.uniform(ks[7], (256,), jnp.float32, 0.5, 1.5)

    w2 = normal(ks[8], (128, 256, 3, 3)); b2 = normal(ks[9], (128,))
    g2 = 1.0 + 0.1 * jax.random.normal(ks[10], (128,), jnp.float32)
    be2 = normal(ks[11], (128,)); m2 = normal(ks[12], (128,))
    v2 = jax.random.uniform(ks[13], (128,), jnp.float32, 0.5, 1.5)

    w3 = normal(ks[14], (num_classes, 128, 1, 1)); b3 = normal(ks[15], (num_classes,))

    eps = 1e-5

    def fold_conv_bn(w, b, gamma, beta, mean, var):
        """Fold eval-mode BN into the conv: y = x@(W*scale) + shift."""
        cout, cin, kh, kw = w.shape
        scale = gamma / jnp.sqrt(var + eps)                       # [cout]
        w_fold = w * scale[:, None, None, None]
        # (kh, kw, cin, cout) -> [9, cin, cout]; tap index = kh*3 + kw.
        w_tap = jnp.transpose(w_fold, (2, 3, 1, 0)).reshape(kh * kw, cin, cout)
        shift = beta + (b - mean) * scale
        return w_tap, shift[None, :]

    w1_tap, t1 = fold_conv_bn(w1, b1, g1, be1, m1, v1)
    w2_tap, t2 = fold_conv_bn(w2, b2, g2, be2, m2, v2)
    w3t = w3.reshape(num_classes, 128)                            # [nc, 128]

    return dict(
        proj_w=proj_w, proj_b=proj_b,
        w1_tap=w1_tap, t1=t1,
        w2_tap=w2_tap, t2=t2,
        w3t=w3t, b3=b3,
        hidden=hidden, num_classes=num_classes,
    )


# ---------------------------------------------------------------------------
# Forward pass (mirrors RenaissanceLayoutLMv3Model.forward)
# ---------------------------------------------------------------------------
def renaissance_layoutlmv3_forward(x, params):
    """x: [B, C, H, W] float32 -> logits [B, num_classes, H, W] float32."""
    B, C, H, W = x.shape
    patch_size = 16
    hf, wf = H // patch_size, W // patch_size
    assert hf >= 1 and wf >= 1
    hidden = params["hidden"]
    num_classes = params["num_classes"]

    # TODO(synk): the pretrained LayoutLMv3 transformer backbone (HF
    # from_pretrained + PIL/processor preprocessing) cannot be reconstructed
    # from __init__ alone; it is replaced by a deterministic linear stand-in
    # that maps the mean-pooled image to a per-example CLS embedding.
    pooled = jnp.mean(x, axis=(2, 3))                           # [B, C]   (plain XLA)
    cls = pooled @ params["proj_w"] + params["proj_b"]          # [B, hidden]

    # features = cls.view(B, hidden, 1, 1).expand(-1, -1, hf, wf), stored NHWC
    # and zero-padded by 2 so the fused kernel can run conv1 on an extended
    # grid (its masked output doubles as conv2's zero-padded input).
    feat = jnp.broadcast_to(cls[:, None, None, :], (B, hf, wf, hidden))
    feat_pad = jnp.pad(feat, ((0, 0), (2, 2), (2, 2), (0, 0)))

    ah = jnp.asarray(_bilinear_matrix(H, hf))                   # [H, hf]
    awt = jnp.asarray(_bilinear_matrix(W, wf).T)                # [wf, W]
    mask = jnp.asarray(_interior_mask(hf, wf))                  # [(hf+2)*(wf+2), 1]

    return _fused_seg_head(
        feat_pad, params["w1_tap"], params["t1"],
        params["w2_tap"], params["t2"], params["w3t"], params["b3"],
        mask, ah, awt, num_classes=num_classes)


if __name__ == "__main__":
    key = jax.random.PRNGKey(0)
    k_params, k_x = jax.random.split(key)

    B, C, H, W = 2, 3, 64, 64      # 64 // patch_size(16) = 4x4 feature grid
    x = jax.random.uniform(k_x, (B, C, H, W), jnp.float32)

    params = init_params(k_params, img_channels=C, hidden=128, num_classes=2)

    out = renaissance_layoutlmv3_forward(x, params)
    out = jax.block_until_ready(out)

    assert out.shape == (B, 2, H, W), out.shape
    assert out.dtype == jnp.float32
    assert bool(jnp.all(jnp.isfinite(out)))
    print("KERNEL_OK")
</pallas_src>

<mosaic_0001>
module attributes {stable_mosaic.version = 11 : i64} {
  func.func @_fused_head_kernel(%arg0: i32, %arg1: memref<1x8x8x128xf32, #tpu.memory_space<vmem>>, %arg2: memref<9x128x256xf32, #tpu.memory_space<vmem>>, %arg3: memref<1x256xf32, #tpu.memory_space<vmem>>, %arg4: memref<9x256x128xf32, #tpu.memory_space<vmem>>, %arg5: memref<1x128xf32, #tpu.memory_space<vmem>>, %arg6: memref<2x128xf32, #tpu.memory_space<vmem>>, %arg7: memref<2xf32, #tpu.memory_space<smem>>, %arg8: memref<36x1xf32, #tpu.memory_space<vmem>>, %arg9: memref<64x4xf32, #tpu.memory_space<vmem>>, %arg10: memref<4x64xf32, #tpu.memory_space<vmem>>, %arg11: memref<1x2x64x64xf32, #tpu.memory_space<vmem>>) attributes {dimension_semantics = [#tpu.dimension_semantics<parallel>], iteration_bounds = array<i64: 2>, scalar_prefetch = 0 : i64, scratch_operands = 0 : i64, tpu.core_type = #tpu.core_type<tc>, window_params = [{transform_indices = @transform_0, window_bounds = array<i64: 1, 8, 8, 128>}, {pipeline_mode = #tpu.pipeline_mode<synchronous>, transform_indices = @transform_1, window_bounds = array<i64: 9, 128, 256>}, {pipeline_mode = #tpu.pipeline_mode<synchronous>, transform_indices = @transform_2, window_bounds = array<i64: 1, 256>}, {pipeline_mode = #tpu.pipeline_mode<synchronous>, transform_indices = @transform_3, window_bounds = array<i64: 9, 256, 128>}, {pipeline_mode = #tpu.pipeline_mode<synchronous>, transform_indices = @transform_4, window_bounds = array<i64: 1, 128>}, {pipeline_mode = #tpu.pipeline_mode<synchronous>, transform_indices = @transform_5, window_bounds = array<i64: 2, 128>}, {transform_indices = @transform_6, window_bounds = array<i64: 2>}, {pipeline_mode = #tpu.pipeline_mode<synchronous>, transform_indices = @transform_7, window_bounds = array<i64: 36, 1>}, {pipeline_mode = #tpu.pipeline_mode<synchronous>, transform_indices = @transform_8, window_bounds = array<i64: 64, 4>}, {pipeline_mode = #tpu.pipeline_mode<synchronous>, transform_indices = @transform_9, window_bounds = array<i64: 4, 64>}, {transform_indices = @transform_10, window_bounds = array<i64: 1, 2, 64, 64>}]} {
    %c0 = arith.constant 0 : index
    %c0_0 = arith.constant 0 : index
    %c0_1 = arith.constant 0 : index
    %c0_2 = arith.constant 0 : index
    %0 = vector.load %arg1[%c0, %c0_0, %c0_1, %c0_2] : memref<1x8x8x128xf32, #tpu.memory_space<vmem>>, vector<1x8x8x128xf32>
    %1 = vector.shape_cast %0 : vector<1x8x8x128xf32> to vector<8x8x128xf32>
    %cst = arith.constant 0.000000e+00 : f32
    %2 = vector.broadcast %cst : f32 to vector<36x256xf32>
    %3 = vector.extract_strided_slice %1 {offsets = [0, 0, 0], sizes = [6, 6, 128], strides = [1, 1, 1]} : vector<8x8x128xf32> to vector<6x6x128xf32>
    %4 = vector.shape_cast %3 : vector<6x6x128xf32> to vector<36x128xf32>
    %c0_3 = arith.constant 0 : index
    %c0_4 = arith.constant 0 : index
    %c0_5 = arith.constant 0 : index
    %5 = vector.load %arg2[%c0_3, %c0_4, %c0_5] : memref<9x128x256xf32, #tpu.memory_space<vmem>>, vector<1x128x256xf32>
    %6 = vector.shape_cast %5 : vector<1x128x256xf32> to vector<128x256xf32>
    %cst_6 = arith.constant dense<0.000000e+00> : vector<36x256xf32>
    %7 = tpu.matmul %4, %6, %cst_6 {dimension_numbers = #tpu.dot_dimension_numbers<[1], [0], [0], [1], [0, 0, 1, 1], [], []>} : vector<36x128xf32>, vector<128x256xf32>, vector<36x256xf32> -> vector<36x256xf32>
    %8 = arith.addf %2, %7 : vector<36x256xf32>
    %9 = vector.extract_strided_slice %1 {offsets = [0, 1, 0], sizes = [6, 6, 128], strides = [1, 1, 1]} : vector<8x8x128xf32> to vector<6x6x128xf32>
    %10 = vector.shape_cast %9 : vector<6x6x128xf32> to vector<36x128xf32>
    %c1 = arith.constant 1 : index
    %c0_7 = arith.constant 0 : index
    %c0_8 = arith.constant 0 : index
    %11 = vector.load %arg2[%c1, %c0_7, %c0_8] : memref<9x128x256xf32, #tpu.memory_space<vmem>>, vector<1x128x256xf32>
    %12 = vector.shape_cast %11 : vector<1x128x256xf32> to vector<128x256xf32>
    %cst_9 = arith.constant dense<0.000000e+00> : vector<36x256xf32>
    %13 = tpu.matmul %10, %12, %cst_9 {dimension_numbers = #tpu.dot_dimension_numbers<[1], [0], [0], [1], [0, 0, 1, 1], [], []>} : vector<36x128xf32>, vector<128x256xf32>, vector<36x256xf32> -> vector<36x256xf32>
    %14 = arith.addf %8, %13 : vector<36x256xf32>
    %15 = vector.extract_strided_slice %1 {offsets = [0, 2, 0], sizes = [6, 6, 128], strides = [1, 1, 1]} : vector<8x8x128xf32> to vector<6x6x128xf32>
    %16 = vector.shape_cast %15 : vector<6x6x128xf32> to vector<36x128xf32>
    %c2 = arith.constant 2 : index
    %c0_10 = arith.constant 0 : index
    %c0_11 = arith.constant 0 : index
    %17 = vector.load %arg2[%c2, %c0_10, %c0_11] : memref<9x128x256xf32, #tpu.memory_space<vmem>>, vector<1x128x256xf32>
    %18 = vector.shape_cast %17 : vector<1x128x256xf32> to vector<128x256xf32>
    %cst_12 = arith.constant dense<0.000000e+00> : vector<36x256xf32>
    %19 = tpu.matmul %16, %18, %cst_12 {dimension_numbers = #tpu.dot_dimension_numbers<[1], [0], [0], [1], [0, 0, 1, 1], [], []>} : vector<36x128xf32>, vector<128x256xf32>, vector<36x256xf32> -> vector<36x256xf32>
    %20 = arith.addf %14, %19 : vector<36x256xf32>
    %21 = vector.extract_strided_slice %1 {offsets = [1, 0, 0], sizes = [6, 6, 128], strides = [1, 1, 1]} : vector<8x8x128xf32> to vector<6x6x128xf32>
    %22 = vector.shape_cast %21 : vector<6x6x128xf32> to vector<36x128xf32>
    %c3 = arith.constant 3 : index
    %c0_13 = arith.constant 0 : index
    %c0_14 = arith.constant 0 : index
    %23 = vector.load %arg2[%c3, %c0_13, %c0_14] : memref<9x128x256xf32, #tpu.memory_space<vmem>>, vector<1x128x256xf32>
    %24 = vector.shape_cast %23 : vector<1x128x256xf32> to vector<128x256xf32>
    %cst_15 = arith.constant dense<0.000000e+00> : vector<36x256xf32>
    %25 = tpu.matmul %22, %24, %cst_15 {dimension_numbers = #tpu.dot_dimension_numbers<[1], [0], [0], [1], [0, 0, 1, 1], [], []>} : vector<36x128xf32>, vector<128x256xf32>, vector<36x256xf32> -> vector<36x256xf32>
    %26 = arith.addf %20, %25 : vector<36x256xf32>
    %27 = vector.extract_strided_slice %1 {offsets = [1, 1, 0], sizes = [6, 6, 128], strides = [1, 1, 1]} : vector<8x8x128xf32> to vector<6x6x128xf32>
    %28 = vector.shape_cast %27 : vector<6x6x128xf32> to vector<36x128xf32>
    %c4 = arith.constant 4 : index
    %c0_16 = arith.constant 0 : index
    %c0_17 = arith.constant 0 : index
    %29 = vector.load %arg2[%c4, %c0_16, %c0_17] : memref<9x128x256xf32, #tpu.memory_space<vmem>>, vector<1x128x256xf32>
    %30 = vector.shape_cast %29 : vector<1x128x256xf32> to vector<128x256xf32>
    %cst_18 = arith.constant dense<0.000000e+00> : vector<36x256xf32>
    %31 = tpu.matmul %28, %30, %cst_18 {dimension_numbers = #tpu.dot_dimension_numbers<[1], [0], [0], [1], [0, 0, 1, 1], [], []>} : vector<36x128xf32>, vector<128x256xf32>, vector<36x256xf32> -> vector<36x256xf32>
    %32 = arith.addf %26, %31 : vector<36x256xf32>
    %33 = vector.extract_strided_slice %1 {offsets = [1, 2, 0], sizes = [6, 6, 128], strides = [1, 1, 1]} : vector<8x8x128xf32> to vector<6x6x128xf32>
    %34 = vector.shape_cast %33 : vector<6x6x128xf32> to vector<36x128xf32>
    %c5 = arith.constant 5 : index
    %c0_19 = arith.constant 0 : index
    %c0_20 = arith.constant 0 : index
    %35 = vector.load %arg2[%c5, %c0_19, %c0_20] : memref<9x128x256xf32, #tpu.memory_space<vmem>>, vector<1x128x256xf32>
    %36 = vector.shape_cast %35 : vector<1x128x256xf32> to vector<128x256xf32>
    %cst_21 = arith.constant dense<0.000000e+00> : vector<36x256xf32>
    %37 = tpu.matmul %34, %36, %cst_21 {dimension_numbers = #tpu.dot_dimension_numbers<[1], [0], [0], [1], [0, 0, 1, 1], [], []>} : vector<36x128xf32>, vector<128x256xf32>, vector<36x256xf32> -> vector<36x256xf32>
    %38 = arith.addf %32, %37 : vector<36x256xf32>
    %39 = vector.extract_strided_slice %1 {offsets = [2, 0, 0], sizes = [6, 6, 128], strides = [1, 1, 1]} : vector<8x8x128xf32> to vector<6x6x128xf32>
    %40 = vector.shape_cast %39 : vector<6x6x128xf32> to vector<36x128xf32>
    %c6 = arith.constant 6 : index
    %c0_22 = arith.constant 0 : index
    %c0_23 = arith.constant 0 : index
    %41 = vector.load %arg2[%c6, %c0_22, %c0_23] : memref<9x128x256xf32, #tpu.memory_space<vmem>>, vector<1x128x256xf32>
    %42 = vector.shape_cast %41 : vector<1x128x256xf32> to vector<128x256xf32>
    %cst_24 = arith.constant dense<0.000000e+00> : vector<36x256xf32>
    %43 = tpu.matmul %40, %42, %cst_24 {dimension_numbers = #tpu.dot_dimension_numbers<[1], [0], [0], [1], [0, 0, 1, 1], [], []>} : vector<36x128xf32>, vector<128x256xf32>, vector<36x256xf32> -> vector<36x256xf32>
    %44 = arith.addf %38, %43 : vector<36x256xf32>
    %45 = vector.extract_strided_slice %1 {offsets = [2, 1, 0], sizes = [6, 6, 128], strides = [1, 1, 1]} : vector<8x8x128xf32> to vector<6x6x128xf32>
    %46 = vector.shape_cast %45 : vector<6x6x128xf32> to vector<36x128xf32>
    %c7 = arith.constant 7 : index
    %c0_25 = arith.constant 0 : index
    %c0_26 = arith.constant 0 : index
    %47 = vector.load %arg2[%c7, %c0_25, %c0_26] : memref<9x128x256xf32, #tpu.memory_space<vmem>>, vector<1x128x256xf32>
    %48 = vector.shape_cast %47 : vector<1x128x256xf32> to vector<128x256xf32>
    %cst_27 = arith.constant dense<0.000000e+00> : vector<36x256xf32>
    %49 = tpu.matmul %46, %48, %cst_27 {dimension_numbers = #tpu.dot_dimension_numbers<[1], [0], [0], [1], [0, 0, 1, 1], [], []>} : vector<36x128xf32>, vector<128x256xf32>, vector<36x256xf32> -> vector<36x256xf32>
    %50 = arith.addf %44, %49 : vector<36x256xf32>
    %51 = vector.extract_strided_slice %1 {offsets = [2, 2, 0], sizes = [6, 6, 128], strides = [1, 1, 1]} : vector<8x8x128xf32> to vector<6x6x128xf32>
    %52 = vector.shape_cast %51 : vector<6x6x128xf32> to vector<36x128xf32>
    %c8 = arith.constant 8 : index
    %c0_28 = arith.constant 0 : index
    %c0_29 = arith.constant 0 : index
    %53 = vector.load %arg2[%c8, %c0_28, %c0_29] : memref<9x128x256xf32, #tpu.memory_space<vmem>>, vector<1x128x256xf32>
    %54 = vector.shape_cast %53 : vector<1x128x256xf32> to vector<128x256xf32>
    %cst_30 = arith.constant dense<0.000000e+00> : vector<36x256xf32>
    %55 = tpu.matmul %52, %54, %cst_30 {dimension_numbers = #tpu.dot_dimension_numbers<[1], [0], [0], [1], [0, 0, 1, 1], [], []>} : vector<36x128xf32>, vector<128x256xf32>, vector<36x256xf32> -> vector<36x256xf32>
    %56 = arith.addf %50, %55 : vector<36x256xf32>
    %c0_31 = arith.constant 0 : index
    %c0_32 = arith.constant 0 : index
    %57 = vector.load %arg3[%c0_31, %c0_32] : memref<1x256xf32, #tpu.memory_space<vmem>>, vector<1x256xf32>
    %58 = vector.broadcast %57 : vector<1x256xf32> to vector<36x256xf32>
    %59 = arith.addf %56, %58 : vector<36x256xf32>
    %cst_33 = arith.constant 0.000000e+00 : f32
    %60 = vector.broadcast %cst_33 : f32 to vector<36x256xf32>
    %61 = arith.maximumf %59, %60 : vector<36x256xf32>
    %c0_34 = arith.constant 0 : index
    %c0_35 = arith.constant 0 : index
    %62 = vector.load %arg8[%c0_34, %c0_35] : memref<36x1xf32, #tpu.memory_space<vmem>>, vector<36x1xf32>
    %63 = vector.broadcast %62 : vector<36x1xf32> to vector<36x256xf32>
    %64 = arith.mulf %61, %63 : vector<36x256xf32>
    %65 = vector.shape_cast %64 : vector<36x256xf32> to vector<6x6x256xf32>
    %cst_36 = arith.constant 0.000000e+00 : f32
    %66 = vector.broadcast %cst_36 : f32 to vector<16x128xf32>
    %67 = vector.extract_strided_slice %65 {offsets = [0, 0, 0], sizes = [4, 4, 256], strides = [1, 1, 1]} : vector<6x6x256xf32> to vector<4x4x256xf32>
    %68 = vector.shape_cast %67 : vector<4x4x256xf32> to vector<16x256xf32>
    %c0_37 = arith.constant 0 : index
    %c0_38 = arith.constant 0 : index
    %c0_39 = arith.constant 0 : index
    %69 = vector.load %arg4[%c0_37, %c0_38, %c0_39] : memref<9x256x128xf32, #tpu.memory_space<vmem>>, vector<1x256x128xf32>
    %70 = vector.shape_cast %69 : vector<1x256x128xf32> to vector<256x128xf32>
    %cst_40 = arith.constant dense<0.000000e+00> : vector<16x128xf32>
    %71 = tpu.matmul %68, %70, %cst_40 {dimension_numbers = #tpu.dot_dimension_numbers<[1], [0], [0], [1], [0, 0, 1, 1], [], []>} : vector<16x256xf32>, vector<256x128xf32>, vector<16x128xf32> -> vector<16x128xf32>
    %72 = arith.addf %66, %71 : vector<16x128xf32>
    %73 = vector.extract_strided_slice %65 {offsets = [0, 1, 0], sizes = [4, 4, 256], strides = [1, 1, 1]} : vector<6x6x256xf32> to vector<4x4x256xf32>
    %74 = vector.shape_cast %73 : vector<4x4x256xf32> to vector<16x256xf32>
    %c1_41 = arith.constant 1 : index
    %c0_42 = arith.constant 0 : index
    %c0_43 = arith.constant 0 : index
    %75 = vector.load %arg4[%c1_41, %c0_42, %c0_43] : memref<9x256x128xf32, #tpu.memory_space<vmem>>, vector<1x256x128xf32>
    %76 = vector.shape_cast %75 : vector<1x256x128xf32> to vector<256x128xf32>
    %cst_44 = arith.constant dense<0.000000e+00> : vector<16x128xf32>
    %77 = tpu.matmul %74, %76, %cst_44 {dimension_numbers = #tpu.dot_dimension_numbers<[1], [0], [0], [1], [0, 0, 1, 1], [], []>} : vector<16x256xf32>, vector<256x128xf32>, vector<16x128xf32> -> vector<16x128xf32>
    %78 = arith.addf %72, %77 : vector<16x128xf32>
    %79 = vector.extract_strided_slice %65 {offsets = [0, 2, 0], sizes = [4, 4, 256], strides = [1, 1, 1]} : vector<6x6x256xf32> to vector<4x4x256xf32>
    %80 = vector.shape_cast %79 : vector<4x4x256xf32> to vector<16x256xf32>
    %c2_45 = arith.constant 2 : index
    %c0_46 = arith.constant 0 : index
    %c0_47 = arith.constant 0 : index
    %81 = vector.load %arg4[%c2_45, %c0_46, %c0_47] : memref<9x256x128xf32, #tpu.memory_space<vmem>>, vector<1x256x128xf32>
    %82 = vector.shape_cast %81 : vector<1x256x128xf32> to vector<256x128xf32>
    %cst_48 = arith.constant dense<0.000000e+00> : vector<16x128xf32>
    %83 = tpu.matmul %80, %82, %cst_48 {dimension_numbers = #tpu.dot_dimension_numbers<[1], [0], [0], [1], [0, 0, 1, 1], [], []>} : vector<16x256xf32>, vector<256x128xf32>, vector<16x128xf32> -> vector<16x128xf32>
    %84 = arith.addf %78, %83 : vector<16x128xf32>
    %85 = vector.extract_strided_slice %65 {offsets = [1, 0, 0], sizes = [4, 4, 256], strides = [1, 1, 1]} : vector<6x6x256xf32> to vector<4x4x256xf32>
    %86 = vector.shape_cast %85 : vector<4x4x256xf32> to vector<16x256xf32>
    %c3_49 = arith.constant 3 : index
    %c0_50 = arith.constant 0 : index
    %c0_51 = arith.constant 0 : index
    %87 = vector.load %arg4[%c3_49, %c0_50, %c0_51] : memref<9x256x128xf32, #tpu.memory_space<vmem>>, vector<1x256x128xf32>
    %88 = vector.shape_cast %87 : vector<1x256x128xf32> to vector<256x128xf32>
    %cst_52 = arith.constant dense<0.000000e+00> : vector<16x128xf32>
    %89 = tpu.matmul %86, %88, %cst_52 {dimension_numbers = #tpu.dot_dimension_numbers<[1], [0], [0], [1], [0, 0, 1, 1], [], []>} : vector<16x256xf32>, vector<256x128xf32>, vector<16x128xf32> -> vector<16x128xf32>
    %90 = arith.addf %84, %89 : vector<16x128xf32>
    %91 = vector.extract_strided_slice %65 {offsets = [1, 1, 0], sizes = [4, 4, 256], strides = [1, 1, 1]} : vector<6x6x256xf32> to vector<4x4x256xf32>
    %92 = vector.shape_cast %91 : vector<4x4x256xf32> to vector<16x256xf32>
    %c4_53 = arith.constant 4 : index
    %c0_54 = arith.constant 0 : index
    %c0_55 = arith.constant 0 : index
    %93 = vector.load %arg4[%c4_53, %c0_54, %c0_55] : memref<9x256x128xf32, #tpu.memory_space<vmem>>, vector<1x256x128xf32>
    %94 = vector.shape_cast %93 : vector<1x256x128xf32> to vector<256x128xf32>
    %cst_56 = arith.constant dense<0.000000e+00> : vector<16x128xf32>
    %95 = tpu.matmul %92, %94, %cst_56 {dimension_numbers = #tpu.dot_dimension_numbers<[1], [0], [0], [1], [0, 0, 1, 1], [], []>} : vector<16x256xf32>, vector<256x128xf32>, vector<16x128xf32> -> vector<16x128xf32>
    %96 = arith.addf %90, %95 : vector<16x128xf32>
    %97 = vector.extract_strided_slice %65 {offsets = [1, 2, 0], sizes = [4, 4, 256], strides = [1, 1, 1]} : vector<6x6x256xf32> to vector<4x4x256xf32>
    %98 = vector.shape_cast %97 : vector<4x4x256xf32> to vector<16x256xf32>
    %c5_57 = arith.constant 5 : index
    %c0_58 = arith.constant 0 : index
    %c0_59 = arith.constant 0 : index
    %99 = vector.load %arg4[%c5_57, %c0_58, %c0_59] : memref<9x256x128xf32, #tpu.memory_space<vmem>>, vector<1x256x128xf32>
    %100 = vector.shape_cast %99 : vector<1x256x128xf32> to vector<256x128xf32>
    %cst_60 = arith.constant dense<0.000000e+00> : vector<16x128xf32>
    %101 = tpu.matmul %98, %100, %cst_60 {dimension_numbers = #tpu.dot_dimension_numbers<[1], [0], [0], [1], [0, 0, 1, 1], [], []>} : vector<16x256xf32>, vector<256x128xf32>, vector<16x128xf32> -> vector<16x128xf32>
    %102 = arith.addf %96, %101 : vector<16x128xf32>
    %103 = vector.extract_strided_slice %65 {offsets = [2, 0, 0], sizes = [4, 4, 256], strides = [1, 1, 1]} : vector<6x6x256xf32> to vector<4x4x256xf32>
    %104 = vector.shape_cast %103 : vector<4x4x256xf32> to vector<16x256xf32>
    %c6_61 = arith.constant 6 : index
    %c0_62 = arith.constant 0 : index
    %c0_63 = arith.constant 0 : index
    %105 = vector.load %arg4[%c6_61, %c0_62, %c0_63] : memref<9x256x128xf32, #tpu.memory_space<vmem>>, vector<1x256x128xf32>
    %106 = vector.shape_cast %105 : vector<1x256x128xf32> to vector<256x128xf32>
    %cst_64 = arith.constant dense<0.000000e+00> : vector<16x128xf32>
    %107 = tpu.matmul %104, %106, %cst_64 {dimension_numbers = #tpu.dot_dimension_numbers<[1], [0], [0], [1], [0, 0, 1, 1], [], []>} : vector<16x256xf32>, vector<256x128xf32>, vector<16x128xf32> -> vector<16x128xf32>
    %108 = arith.addf %102, %107 : vector<16x128xf32>
    %109 = vector.extract_strided_slice %65 {offsets = [2, 1, 0], sizes = [4, 4, 256], strides = [1, 1, 1]} : vector<6x6x256xf32> to vector<4x4x256xf32>
    %110 = vector.shape_cast %109 : vector<4x4x256xf32> to vector<16x256xf32>
    %c7_65 = arith.constant 7 : index
    %c0_66 = arith.constant 0 : index
    %c0_67 = arith.constant 0 : index
    %111 = vector.load %arg4[%c7_65, %c0_66, %c0_67] : memref<9x256x128xf32, #tpu.memory_space<vmem>>, vector<1x256x128xf32>
    %112 = vector.shape_cast %111 : vector<1x256x128xf32> to vector<256x128xf32>
    %cst_68 = arith.constant dense<0.000000e+00> : vector<16x128xf32>
    %113 = tpu.matmul %110, %112, %cst_68 {dimension_numbers = #tpu.dot_dimension_numbers<[1], [0], [0], [1], [0, 0, 1, 1], [], []>} : vector<16x256xf32>, vector<256x128xf32>, vector<16x128xf32> -> vector<16x128xf32>
    %114 = arith.addf %108, %113 : vector<16x128xf32>
    %115 = vector.extract_strided_slice %65 {offsets = [2, 2, 0], sizes = [4, 4, 256], strides = [1, 1, 1]} : vector<6x6x256xf32> to vector<4x4x256xf32>
    %116 = vector.shape_cast %115 : vector<4x4x256xf32> to vector<16x256xf32>
    %c8_69 = arith.constant 8 : index
    %c0_70 = arith.constant 0 : index
    %c0_71 = arith.constant 0 : index
    %117 = vector.load %arg4[%c8_69, %c0_70, %c0_71] : memref<9x256x128xf32, #tpu.memory_space<vmem>>, vector<1x256x128xf32>
    %118 = vector.shape_cast %117 : vector<1x256x128xf32> to vector<256x128xf32>
    %cst_72 = arith.constant dense<0.000000e+00> : vector<16x128xf32>
    %119 = tpu.matmul %116, %118, %cst_72 {dimension_numbers = #tpu.dot_dimension_numbers<[1], [0], [0], [1], [0, 0, 1, 1], [], []>} : vector<16x256xf32>, vector<256x128xf32>, vector<16x128xf32> -> vector<16x128xf32>
    %120 = arith.addf %114, %119 : vector<16x128xf32>
    %c0_73 = arith.constant 0 : index
    %c0_74 = arith.constant 0 : index
    %121 = vector.load %arg5[%c0_73, %c0_74] : memref<1x128xf32, #tpu.memory_space<vmem>>, vector<1x128xf32>
    %122 = vector.broadcast %121 : vector<1x128xf32> to vector<16x128xf32>
    %123 = arith.addf %120, %122 : vector<16x128xf32>
    %cst_75 = arith.constant 0.000000e+00 : f32
    %124 = vector.broadcast %cst_75 : f32 to vector<16x128xf32>
    %125 = arith.maximumf %123, %124 : vector<16x128xf32>
    %126 = vector.shape_cast %125 : vector<16x128xf32> to vector<4x4x128xf32>
    %c0_76 = arith.constant 0 : index
    %c0_77 = arith.constant 0 : index
    %127 = vector.load %arg6[%c0_76, %c0_77] : memref<2x128xf32, #tpu.memory_space<vmem>>, vector<1x128xf32>
    %128 = vector.shape_cast %127 : vector<1x128xf32> to vector<128xf32>
    %129 = vector.shape_cast %128 : vector<128xf32> to vector<1x1x128xf32>
    %130 = vector.broadcast %129 : vector<1x1x128xf32> to vector<4x4x128xf32>
    %131 = arith.mulf %126, %130 : vector<4x4x128xf32>
    %cst_78 = arith.constant dense<0.000000e+00> : vector<4x4xf32>
    %132 = vector.multi_reduction <add>, %131, %cst_78 [2] : vector<4x4x128xf32> to vector<4x4xf32>
    %c0_79 = arith.constant 0 : index
    %133 = memref.load %arg7[%c0_79] : memref<2xf32, #tpu.memory_space<smem>>
    %134 = vector.broadcast %133 : f32 to vector<4x4xf32>
    %135 = arith.addf %132, %134 : vector<4x4xf32>
    %c0_80 = arith.constant 0 : index
    %c0_81 = arith.constant 0 : index
    %136 = vector.load %arg10[%c0_80, %c0_81] : memref<4x64xf32, #tpu.memory_space<vmem>>, vector<4x64xf32>
    %cst_82 = arith.constant dense<0.000000e+00> : vector<4x64xf32>
    %137 = tpu.matmul %135, %136, %cst_82 {dimension_numbers = #tpu.dot_dimension_numbers<[1], [0], [0], [1], [0, 0, 1, 1], [], []>} : vector<4x4xf32>, vector<4x64xf32>, vector<4x64xf32> -> vector<4x64xf32>
    %c0_83 = arith.constant 0 : index
    %c0_84 = arith.constant 0 : index
    %138 = vector.load %arg9[%c0_83, %c0_84] : memref<64x4xf32, #tpu.memory_space<vmem>>, vector<64x4xf32>
    %cst_85 = arith.constant dense<0.000000e+00> : vector<64x64xf32>
    %139 = tpu.matmul %138, %137, %cst_85 {dimension_numbers = #tpu.dot_dimension_numbers<[1], [0], [0], [1], [0, 0, 1, 1], [], []>} : vector<64x4xf32>, vector<4x64xf32>, vector<64x64xf32> -> vector<64x64xf32>
    %c0_86 = arith.constant 0 : index
    %c0_87 = arith.constant 0 : index
    %c0_88 = arith.constant 0 : index
    %c0_89 = arith.constant 0 : index
    %140 = vector.load %arg11[%c0_86, %c0_87, %c0_88, %c0_89] : memref<1x2x64x64xf32, #tpu.memory_space<vmem>>, vector<1x1x64x64xf32>
    %141 = vector.shape_cast %140 : vector<1x1x64x64xf32> to vector<64x64xf32>
    %142 = vector.shape_cast %139 : vector<64x64xf32> to vector<1x1x64x64xf32>
    tpu.vector_store %arg11[%c0_86, %c0_87, %c0_88, %c0_89], %142 {strides = array<i32>} : memref<1x2x64x64xf32, #tpu.memory_space<vmem>>, vector<1x1x64x64xf32>,
    %c1_90 = arith.constant 1 : index
    %c0_91 = arith.constant 0 : index
    %143 = vector.load %arg6[%c1_90, %c0_91] : memref<2x128xf32, #tpu.memory_space<vmem>>, vector<1x128xf32>
    %144 = vector.shape_cast %143 : vector<1x128xf32> to vector<128xf32>
    %145 = vector.shape_cast %144 : vector<128xf32> to vector<1x1x128xf32>
    %146 = vector.broadcast %145 : vector<1x1x128xf32> to vector<4x4x128xf32>
    %147 = arith.mulf %126, %146 : vector<4x4x128xf32>
    %cst_92 = arith.constant dense<0.000000e+00> : vector<4x4xf32>
    %148 = vector.multi_reduction <add>, %147, %cst_92 [2] : vector<4x4x128xf32> to vector<4x4xf32>
    %c1_93 = arith.constant 1 : index
    %149 = memref.load %arg7[%c1_93] : memref<2xf32, #tpu.memory_space<smem>>
    %150 = vector.broadcast %149 : f32 to vector<4x4xf32>
    %151 = arith.addf %148, %150 : vector<4x4xf32>
    %c0_94 = arith.constant 0 : index
    %c0_95 = arith.constant 0 : index
    %152 = vector.load %arg10[%c0_94, %c0_95] : memref<4x64xf32, #tpu.memory_space<vmem>>, vector<4x64xf32>
    %cst_96 = arith.constant dense<0.000000e+00> : vector<4x64xf32>
    %153 = tpu.matmul %151, %152, %cst_96 {dimension_numbers = #tpu.dot_dimension_numbers<[1], [0], [0], [1], [0, 0, 1, 1], [], []>} : vector<4x4xf32>, vector<4x64xf32>, vector<4x64xf32> -> vector<4x64xf32>
    %c0_97 = arith.constant 0 : index
    %c0_98 = arith.constant 0 : index
    %154 = vector.load %arg9[%c0_97, %c0_98] : memref<64x4xf32, #tpu.memory_space<vmem>>, vector<64x4xf32>
    %cst_99 = arith.constant dense<0.000000e+00> : vector<64x64xf32>
    %155 = tpu.matmul %154, %153, %cst_99 {dimension_numbers = #tpu.dot_dimension_numbers<[1], [0], [0], [1], [0, 0, 1, 1], [], []>} : vector<64x4xf32>, vector<4x64xf32>, vector<64x64xf32> -> vector<64x64xf32>
    %c0_100 = arith.constant 0 : index
    %c1_101 = arith.constant 1 : index
    %c0_102 = arith.constant 0 : index
    %c0_103 = arith.constant 0 : index
    %156 = vector.load %arg11[%c0_100, %c1_101, %c0_102, %c0_103] : memref<1x2x64x64xf32, #tpu.memory_space<vmem>>, vector<1x1x64x64xf32>
    %157 = vector.shape_cast %156 : vector<1x1x64x64xf32> to vector<64x64xf32>
    %158 = vector.shape_cast %155 : vector<64x64xf32> to vector<1x1x64x64xf32>
    tpu.vector_store %arg11[%c0_100, %c1_101, %c0_102, %c0_103], %158 {strides = array<i32>} : memref<1x2x64x64xf32, #tpu.memory_space<vmem>>, vector<1x1x64x64xf32>,
    return
  }
  func.func @transform_0(%arg0: i32) -> (i32, i32, i32, i32) {
    %c0_i32 = arith.constant 0 : i32
    %c0_i32_0 = arith.constant 0 : i32
    %c0_i32_1 = arith.constant 0 : i32
    %c0_i32_2 = arith.constant 0 : i32
    return %arg0, %c0_i32, %c0_i32_0, %c0_i32_1 : i32, i32, i32, i32
  }
  func.func @transform_1(%arg0: i32) -> (i32, i32, i32) {
    %c0_i32 = arith.constant 0 : i32
    %c0_i32_0 = arith.constant 0 : i32
    %c0_i32_1 = arith.constant 0 : i32
    %c0_i32_2 = arith.constant 0 : i32
    return %c0_i32, %c0_i32_0, %c0_i32_1 : i32, i32, i32
  }
  func.func @transform_2(%arg0: i32) -> (i32, i32) {
    %c0_i32 = arith.constant 0 : i32
    %c0_i32_0 = arith.constant 0 : i32
    %c0_i32_1 = arith.constant 0 : i32
    return %c0_i32, %c0_i32_0 : i32, i32
  }
  func.func @transform_3(%arg0: i32) -> (i32, i32, i32) {
    %c0_i32 = arith.constant 0 : i32
    %c0_i32_0 = arith.constant 0 : i32
    %c0_i32_1 = arith.constant 0 : i32
    %c0_i32_2 = arith.constant 0 : i32
    return %c0_i32, %c0_i32_0, %c0_i32_1 : i32, i32, i32
  }
  func.func @transform_4(%arg0: i32) -> (i32, i32) {
    %c0_i32 = arith.constant 0 : i32
    %c0_i32_0 = arith.constant 0 : i32
    %c0_i32_1 = arith.constant 0 : i32
    return %c0_i32, %c0_i32_0 : i32, i32
  }
  func.func @transform_5(%arg0: i32) -> (i32, i32) {
    %c0_i32 = arith.constant 0 : i32
    %c0_i32_0 = arith.constant 0 : i32
    %c0_i32_1 = arith.constant 0 : i32
    return %c0_i32, %c0_i32_0 : i32, i32
  }
  func.func @transform_6(%arg0: i32) -> i32 {
    %c0_i32 = arith.constant 0 : i32
    %c0_i32_0 = arith.constant 0 : i32
    return %c0_i32 : i32
  }
  func.func @transform_7(%arg0: i32) -> (i32, i32) {
    %c0_i32 = arith.constant 0 : i32
    %c0_i32_0 = arith.constant 0 : i32
    %c0_i32_1 = arith.constant 0 : i32
    return %c0_i32, %c0_i32_0 : i32, i32
  }
  func.func @transform_8(%arg0: i32) -> (i32, i32) {
    %c0_i32 = arith.constant 0 : i32
    %c0_i32_0 = arith.constant 0 : i32
    %c0_i32_1 = arith.constant 0 : i32
    return %c0_i32, %c0_i32_0 : i32, i32
  }
  func.func @transform_9(%arg0: i32) -> (i32, i32) {
    %c0_i32 = arith.constant 0 : i32
    %c0_i32_0 = arith.constant 0 : i32
    %c0_i32_1 = arith.constant 0 : i32
    return %c0_i32, %c0_i32_0 : i32, i32
  }
  func.func @transform_10(%arg0: i32) -> (i32, i32, i32, i32) {
    %c0_i32 = arith.constant 0 : i32
    %c0_i32_0 = arith.constant 0 : i32
    %c0_i32_1 = arith.constant 0 : i32
    %c0_i32_2 = arith.constant 0 : i32
    return %arg0, %c0_i32, %c0_i32_0, %c0_i32_1 : i32, i32, i32, i32
  }
}

</mosaic_0001>

<bundles_post_ra>
// kernel: tpu_custom_call.1
= control target key start
LH: loop header
LB: loop body
LE: loop exit
PB: predicated region body
PF: predicated region fallthrough
CT: control target
= control target key end

     0   :  { %s5257_s0 = inlined_call_operand.hbm [shape: f32[2,8,8,128], index: 0, kind: input, shape index: {}]   ;;  %s5258_s1 = inlined_call_operand.hbm [shape: f32[9,128,256], index: 1, kind: input, shape index: {}]   ;;  %s5259_s2 = inlined_call_operand.hbm [shape: f32[1,256], index: 2, kind: input, shape index: {}]   ;;  %s5260_s3 = inlined_call_operand.hbm [shape: f32[9,256,128], index: 3, kind: input, shape index: {}]   ;;  %s5261_s4 = inlined_call_operand.hbm [shape: f32[1,128], index: 4, kind: input, shape index: {}]   ;;  %s5262_s5 = inlined_call_operand.hbm [shape: f32[2,128], index: 5, kind: input, shape index: {}]   ;;  %s5263_s6 = inlined_call_operand.hbm [shape: f32[2], index: 6, kind: input, shape index: {}]   ;;  %s5264_s7 = inlined_call_operand.vmem [shape: f32[36,1], index: 7, kind: input, shape index: {}]   ;;  %s5265_s8 = inlined_call_operand.vmem [shape: f32[64,4], index: 8, kind: input, shape index: {}]   ;;  %s5266_s9 = inlined_call_operand.hbm [shape: f32[4,64], index: 9, kind: input, shape index: {}]   ;;  %s5267_s10 = inlined_call_operand.hbm [shape: f32[2,2,64,64], index: 10, kind: output, shape index: {}]  }
   0x1   :  { %5272 = sst [smem:[#allocation29_spill]] %s5258_s1 }
   0x2   :  { %5273 = sst [smem:[#allocation30_spill]] %s5259_s2 }
   0x3   :  { %5274 = sst [smem:[#allocation31_spill]] %s5260_s3 }
   0x4   :  { %5275 = sst [smem:[#allocation32_spill]] %s5261_s4 }
   0x5   :  { %15 = vsyncpa [#allocation3], 0 }
   0x6   :  { %17 = vsyncpa [#allocation3 + $0x1], 0 }
   0x7   :  { %18 = vsyncpa [#allocation7], 0 }
   0x8   :  { %19 = vsyncpa [#allocation10], 0 }
   0x9   :  { %20 = vsyncpa [#allocation13], 0 }
   0xa   :  { %21 = vsyncpa [#allocation5], 0 }
   0xb   :  { %22 = vsyncpa [#allocation4], 0 }
   0xc   :  { %24 = vsyncpa [#allocation4 + $0x1], 0  ;;  %s4114_s13 = smov 0   ;;  %s4116_s14 = smov 0  }
   0xd   :  { %s4118_s15 = smov 0   ;;  %s4120_s16 = smov 0  }
   0xe LB: > { %s5276_s1 = sld [smem:[#allocation29_spill]]  ;;  %s4138_s20 = sadd.s32 4294967295, %s4043_s16   ;;  %s4043_s16 = sphi %s4120_s16, %s5304_s16   ;;  %s4039_s15 = sphi %s4118_s15, %s5303_s15   ;;  %s4035_s14 = sphi %s4116_s14, %s5302_s14   ;;  %s4031_s13 = sphi %s4114_s13, %s5301_s13  }
   0xf   : > { %p3519_p0 = scmp.ge.s32.totalorder %s4043_s16, 1  ;;  %p51_p1 = scmp.eq.s32.totalorder %s4138_s20, 0 }
  0x10   : > { %p276_p2 = scmp.lt.s32.totalorder %s4043_s16, 3  ;;  %s4045_s22 = smov [#allocation6]  }
  0x11   : > { %s289_s23 = sshll.u32 %s4045_s22, 4  ;;  %s5278_s3 = sld [smem:[#allocation31_spill]]  ;;  %s290_s23 = int_to_ptr.vmem [resolvable:$true] %s289_s23 }
  0x12   : > { %p4143_p3 = pnand %p3519_p0, %p276_p2  ;;  %s4046_s28 = smov [#allocation9]  }
  0x13   : > { %s315_s29 = sshll.u32 %s4046_s28, 4  ;;  %s4047_s30 = smov 256   ;;  %s316_s29 = int_to_ptr.vmem [resolvable:$true] %s315_s29 }
  0x14   : > { %s287_s19 = sshll.u32 %s5276_s1, 4  ;;  %p3634_p4 = pneg %p4143_p3  ;;  %s288_s19 = int_to_ptr.hbm [resolvable:$true] %s287_s19 }
  0x15   : > { %s4048_s11 = smov 16   ;;  %s5268_s12 = smov 128  }
  0x16   : > { %p4155_p6 = pnand %p3634_p4, %p51_p1  ;;  %s5269_s17 = smov 8  }
  0x17   : > { %s313_s26 = sshll.u32 %s5278_s3, 4  ;;  %s340_s24 = sshll.u32 %s5262_s5, 4  ;;  %s314_s26 = int_to_ptr.hbm [resolvable:$true] %s313_s26  ;;  %s341_s24 = int_to_ptr.hbm [resolvable:$true] %s340_s24 }
  0x18   : > { %3637 = dma.hbm_to_vmem [thread:$0]  (!%p4155_p6), %s288_s19, 36864, %s290_s23, [#allocation7], %s4047_s30, %s4047_s30, %s4048_s11  }
  0x19   : > { %3643 = dma.hbm_to_vmem [thread:$0]  (!%p4155_p6), %s314_s26, 36864, %s316_s29, [#allocation10], %s5268_s12, %s5268_s12, %s5269_s17  }
  0x1a   : > { %s4051_s25 = smov [#allocation12]   ;;  %s5280_s2 = sld [smem:[#allocation30_spill]] }
  0x1b   : > { %s342_s28 = sshll.u32 %s4051_s25, 4  ;;  %s4052_s30 = smov [#allocation8]   ;;  %s343_s28 = int_to_ptr.vmem [resolvable:$true] %s342_s28 }
  0x1c   : > { %3649 = dma.hbm_to_vmem [thread:$0]  (!%p4155_p6), %s341_s24, 32, %s343_s28, [#allocation13]  }
  0x1d   : > { %s304_s11 = sshll.u32 %s4052_s30, 4  ;;  %s5281_s4 = sld [smem:[#allocation32_spill]]  ;;  %s305_s11 = int_to_ptr.vmem [resolvable:$true] %s304_s11 }
  0x1e   : > { %s352_s1 = sshll.u32 %s5263_s6, 4  ;;  %s4053_s24 = smov [#allocation11]   ;;  %s353_s1 = int_to_ptr.hbm [resolvable:$true] %s352_s1 }
  0x1f   : > { %s330_s28 = sshll.u32 %s4053_s24, 4  ;;  %s4054_s19 = smov [#allocation14]   ;;  %s331_s28 = int_to_ptr.vmem [resolvable:$true] %s330_s28 }
  0x20   : > { %s302_s23 = sshll.u32 %s5280_s2, 4  ;;  %s4055_s26 = smov [#allocation15]   ;;  %s303_s23 = int_to_ptr.hbm [resolvable:$true] %s302_s23 }
  0x21   : > { %3640 = dma.hbm_to_vmem [thread:$0]  (!%p4155_p6), %s303_s23, 32, %s305_s11, [#allocation7]  }
  0x22   : > { %3652 = dma.hbm_to_smem (!%p4155_p6), %s353_s1, 16, %s4054_s19, [#allocation5]  }
  0x23   : > { %s328_s18 = sshll.u32 %s5281_s4, 4  ;;  %s368_s11 = sshll.u32 %s5266_s9, 4  ;;  %s329_s18 = int_to_ptr.hbm [resolvable:$true] %s328_s18  ;;  %s369_s11 = int_to_ptr.hbm [resolvable:$true] %s368_s11 }
  0x24   : > { %3646 = dma.hbm_to_vmem [thread:$0]  (!%p4155_p6), %s329_s18, 16, %s331_s28, [#allocation10]  }
  0x25   : > { %s370_s29 = sshll.u32 %s4055_s26, 4  ;;  %s3518_s18 = sadd.s32 4294967294, %s4043_s16   ;;  %s371_s29 = int_to_ptr.vmem [resolvable:$true] %s370_s29 }
  0x26   : > { %3655 = dma.hbm_to_vmem [thread:$0]  (!%p4155_p6), %s369_s11, 64, %s371_s29, [#allocation13]  }
  0x27   : > { %s4193_s22 = sadd.s32 1, %s4043_s16   ;;  %s37_s25 = sadd.s32 1, %s4039_s15 }
  0x28   : > { %s34_s1 = ssub.s32 %s4043_s16, %s4193_s22  ;;  %p44_p7 = scmp.ne.s32.totalorder %s4039_s15, %s4035_s14 }
  0x29   : > { %p35_p8 = scmp.eq.s32.totalorder %s34_s1, 0  ;;  %p45_p9 = scmp.eq.s32.totalorder %s4043_s16, 0 }
  0x2a   : > { %p50_p10 = scmp.ne.s32.totalorder %s4035_s14, %s4031_s13  ;;  %p263_p11 = scmp.eq.s32.totalorder %s4138_s20, 1 }
  0x2b   : > { %s4205_s24 = scalar_select %p35_p8, %s4039_s15, %s37_s25  }
  0x2c   : > { %p4209_p12 = por %p51_p1, %p50_p10  ;;  %p4213_p13 = por %p263_p11, %p44_p7 }
  0x2d   : > { %p269_p0 = scmp.eq.s32.totalorder %s3518_s18, 1  ;;  %p46_p2 = por %p45_p9, %p44_p7 }
  0x2e   : > { %s381_s19 = sand.u32 1, %s4039_s15   ;;  %p3671_p6 = scmp.lt.s32.totalorder %s4043_s16, 2 }
  0x2f   : > { %p4218_p4 = por %p269_p0, %p50_p10  ;;  %s3528_s30 = sshll.u32 %s381_s19, 6 }
  0x30   : > { %s3599_s11 = sshll.u32 %s4043_s16, 6  ;;  %s385_s12 = scalar_lea.vmem [#allocation2], %s3528_s30 }
  0x31   : > { %s390_s25 = scalar_lea.hbm %s5257_s0, %s3599_s11  ;;  %s393_s17 = sshll.u32 %s385_s12, 4  ;;  %s394_s17 = int_to_ptr.vmem [resolvable:$true] %s393_s17 }
  0x32   : > { %s391_s1 = sshll.u32 %s390_s25, 4  ;;  %p4227_p8 = pnand %p3671_p6, %p46_p2  ;;  %s392_s1 = int_to_ptr.hbm [resolvable:$true] %s391_s1 }
  0x33   : > { %s382_s2 = scalar_lea.sflag [#allocation3], %s381_s19  ;;  %s3927_s3 = sshra.s32 %s392_s1, 4  ;;  %s3928_s3 = int_to_ptr.hbm [resolvable:$true] %s3927_s3 }
  0x34   : > { %s3929_s4 = scalar_lea.hbm %s3928_s3, 64  ;;  %p3931_p9 = pneg %p4227_p8 }
  0x35   : > { %p3930_p7 = scmp.ne.s32.totalorder %s3928_s3, %s3929_s4  ;;  %s3934_s12 = scalar_lea.hbm %s5257_s0, 128 }
  0x36   : > { %p3935_p0 = scmp.lt.s32.totalorder %s3928_s3, %s5257_s0  ;;  %p3936_p2 = scmp.lt.s32.totalorder %s3934_s12, %s3929_s4 }
  0x37   : > { %p3932_p10 = pnand %p3931_p9, %p3930_p7 }
  0x38   : > { %p3937_p6 = por %p3936_p2, %p3935_p0 }
  0x39   : > { %p3933_p11 = pneg %p3932_p10 }
  0x3b   : > { %p3938_p5 = pnand %p3937_p6, %p3933_p11 }
  0x3d   : > { %3941 = shalt.err (!%p3938_p5)
}
  0x3e   : > { %s5286_s19 = smov 8   ;;  %s5287_s25 = smov 128  }
  0x3f   : > { %3659 = dma.hbm_to_vmem [thread:$0]  (!%p4227_p8), %s392_s1, 1024, %s394_s17, %s382_s2, %s5287_s25, %s5287_s25, %s5286_s19  }
  0x40   : > { %405 = sbr.rel (%p4143_p3) target bundleno = 1472 (0x5c0), region = 60 }
  0x45   : > { %s4247_s11 = sand.u32 1, %s4035_s14  }
  0x46   : > { %s3532_s3 = sshll.u32 %s4247_s11, 6  ;;  %s408_s4 = scalar_lea.sflag [#allocation3], %s4247_s11 }
  0x47   : > { %s4251_s26 = scalar_lea.vmem [#allocation2], %s3532_s3 }
  0x48   : > { %4002 = dma.done.wait (%p4209_p12), %s408_s4, 1024  }
  0x49   : > { %4004 = vsyncadd (%p4209_p12), %s408_s4, 4294966272 }
  0x4a   : > { %4006 = dma.done.wait (%p51_p1), [#allocation7], 36896  }
  0x4b   : > { %4008 = vsyncadd (%p51_p1), [#allocation7], 4294930400 }
  0x4c   : > { %4010 = dma.done.wait (%p51_p1), [#allocation10], 36880  }
  0x4d   : > { %4012 = vsyncadd (%p51_p1), [#allocation10], 4294930416 }
  0x4e   : > { %4014 = dma.done.wait (%p51_p1), [#allocation13], 32  }
  0x4f   : > { %4016 = vsyncadd (%p51_p1), [#allocation13], 4294967264 }
  0x50   : > { %4018 = dma.done.wait (%p51_p1), [#allocation5], 16  }
  0x51   : > { %4020 = vsyncadd (%p51_p1), [#allocation5], 4294967280 }
  0x52   : > { %4022 = dma.done.wait (%p51_p1), [#allocation13], 64  }
  0x53   : > { %4024 = vsyncadd (%p51_p1), [#allocation13], 4294967232 }
  0x54   : > { %452 = sfence }
  0x55   : > { %v647_v0 = vld [vmem:[#allocation6 + $0x1f0] sm:$0xff]  ;;  %v648_v1 = vld [vmem:[#allocation6 + $0x1f8] sm:$0xff]  ;;  %v645_v2 = vld [vmem:[#allocation6 + $0x1e0] sm:$0xff]  ;;  %vm549_vm0 = vcmask 1040384   ;;  %vm550_vm1 = vcmask 1042434   ;;  %vm552_vm2 = vcmask 1044484  }
  0x56   : > { %684 = vmatpush.msra.mxu0 %v647_v0  ;;  %716 = vmatpush.msra.mxu1 %v648_v1  ;;  %v646_v3 = vld [vmem:[#allocation6 + $0x1e8] sm:$0xff]  ;;  %v643_v4 = vld [vmem:[#allocation6 + $0x1d0] sm:$0xff]  ;;  %v644_v5 = vld [vmem:[#allocation6 + $0x1d8] sm:$0xff]  ;;  %vm554_vm3 = vcmask 1046534   ;;  %v5288_v38 = vmov 0  ;;  %vm2040_vm7 = vcmask 1041408  }
  0x57   : > { %v641_v6 = vld [vmem:[#allocation6 + $0x1c0] sm:$0xff]  ;;  %v642_v7 = vld [vmem:[#allocation6 + $0x1c8] sm:$0xff]  ;;  %v639_v8 = vld [vmem:[#allocation6 + $0x1b0] sm:$0xff]  ;;  %vm2042_vm8 = vcmask 1043458   ;;  %vm2045_vm9 = vcmask 1045508   ;;  %vm2048_vm10 = vcmask 1045504  }
  0x58   : > { %685 = vmatpush.msra.mxu0 %v645_v2  ;;  %717 = vmatpush.msra.mxu1 %v646_v3  ;;  %v640_v9 = vld [vmem:[#allocation6 + $0x1b8] sm:$0xff]  ;;  %v637_v10 = vld [vmem:[#allocation6 + $0x1a0] sm:$0xff]  ;;  %v638_v11 = vld [vmem:[#allocation6 + $0x1a8] sm:$0xff]  ;;  %vm3068_vm11 = vcmask 1043456   ;;  %s3081_s25 = sld [smem:[#allocation14]]  ;;  %vm3098_vm12 = vcmask 1041409  }
  0x59   : > { %v542_v12 = vld [vmem:[#allocation6 + $0xf8] sm:$0xff]  ;;  %v541_v13 = vld [vmem:[#allocation6 + $0xf0] sm:$0xff]  ;;  %v540_v14 = vld [vmem:[#allocation6 + $0xe8] sm:$0xff]  ;;  %s3574_s3 = sld [smem:[#allocation14 + $0x1]]  ;;  %vm3101_vm13 = vcmask 1043459   ;;  %vm3103_vm14 = vcmask 31744  }
  0x5a   : > { %686 = vmatpush.msra.mxu0 %v643_v4  ;;  %718 = vmatpush.msra.mxu1 %v644_v5  ;;  %v635_v15 = vld [vmem:[#allocation6 + $0x190] sm:$0xff]  ;;  %v636_v16 = vld [vmem:[#allocation6 + $0x198] sm:$0xff]  ;;  %v539_v17 = vld [vmem:[#allocation6 + $0xe0] sm:$0xff]  ;;  %s3540_s1 = sshll.u32 %s4247_s11, 7  ;;  %vm3205_vm15 = vcmask 523264   ;;  %s3600_s17 = sshll.u32 %s4138_s20, 7 }
  0x5b   : > { %815 = vmatpush.msra.mxu3 %v542_v12  ;;  %783 = vmatpush.msra.mxu2 %v541_v13  ;;  %v538_v18 = vld [vmem:[#allocation6 + $0xd8] sm:$0xff]  ;;  %v537_v19 = vld [vmem:[#allocation6 + $0xd0] sm:$0xff]  ;;  %v633_v20 = vld [vmem:[#allocation6 + $0x180] sm:$0xff]  ;;  %s5160_s18 = scalar_lea.vmem [#allocation16], %s3540_s1  ;;  %s3372_s12 = scalar_lea.hbm %s5267_s10, %s3600_s17 }
  0x5c   : > { %687 = vmatpush.msra.mxu0 %v641_v6  ;;  %719 = vmatpush.msra.mxu1 %v642_v7  ;;  %v634_v21 = vld [vmem:[#allocation6 + $0x188] sm:$0xff]  ;;  %v631_v22 = vld [vmem:[#allocation6 + $0x170] sm:$0xff]  ;;  %v535_v24 = vld [vmem:[#allocation6 + $0xc0] sm:$0xff]  ;;  %s3373_s30 = sshll.u32 %s5160_s18, 4  ;;  %s3375_s29 = sshll.u32 %s3372_s12, 4  ;;  %s3374_s30 = int_to_ptr.vmem [resolvable:$true] %s3373_s30  ;;  %s3376_s29 = int_to_ptr.hbm [resolvable:$true] %s3375_s29 }
  0x5d   : > { %816 = vmatpush.msra.mxu3 %v540_v14  ;;  %784 = vmatpush.msra.mxu2 %v539_v17  ;;  %v536_v23 = vld [vmem:[#allocation6 + $0xc8] sm:$0xff]  ;;  %v4278_v25 = vld [vmem:[%s4251_s26] sm:$0xff]  ;;  %v632_v26 = vld [vmem:[#allocation6 + $0x178] sm:$0xff]  ;;  %s3361_s19 = scalar_lea.sflag [#allocation4], %s4247_s11 }
  0x5e   : > { %688 = vmatpush.msra.mxu0 %v639_v8  ;;  %720 = vmatpush.msra.mxu1 %v640_v9  ;;  %v4281_v27 = vld [vmem:[%s4251_s26 + $0x8] sm:$0xff]  ;;  %v499_v28 = vrot.slane %v4278_v25, 2  ;;  %v500_v29 = vrot.slane %v4278_v25, 4  ;;  %vm551_vm4 = vmor %vm549_vm0, %vm550_vm1  ;;  %v3541_v30 = vrot.slane %v4278_v25, 9  ;;  %v534_v31 = vld [vmem:[#allocation6 + $0xb8] sm:$0xff]  ;;  %v3542_v41 = vrot.slane %v4278_v25, 13 }
  0x5f   : > { %817 = vmatpush.msra.mxu3 %v538_v18  ;;  %785 = vmatpush.msra.mxu2 %v537_v19  ;;  %v4289_v32 = vrot.slane %v4281_v27, 2  ;;  %vm553_vm5 = vmor %vm551_vm4, %vm552_vm2  ;;  %v3543_v33 = vrot.slane %v4281_v27, 9  ;;  %v533_v34 = vld [vmem:[#allocation6 + $0xb0] sm:$0xff]  ;;  %v4294_v35 = vrot.slane %v4281_v27, 4  ;;  %v629_v36 = vld [vmem:[#allocation6 + $0x160] sm:$0xff]  ;;  %v3544_v53 = vrot.slane %v4281_v27, 13 }
  0x60   : > { %689 = vmatpush.msra.mxu0 %v637_v10  ;;  %721 = vmatpush.msra.mxu1 %v638_v11  ;;  %v630_v37 = vld [vmem:[#allocation6 + $0x168] sm:$0xff]  ;;  %vm4297_vm6 = vmor %vm553_vm5, %vm554_vm3  ;;  %v558_v39 = vrot.slane %v499_v28, 7  ;;  %v561_v40 = vrot.slane %v500_v29, 7  ;;  %v627_v42 = vld [vmem:[#allocation6 + $0x150] sm:$0xff] }
  0x61   : > { %818 = vmatpush.msra.mxu3 %v536_v23  ;;  %786 = vmatpush.msra.mxu2 %v535_v24  ;;  %v5289_v38 = vsel %vm4297_vm6, 4294967295, %v5288_v38  ;;  %v568_v43 = vrot.slane %v4289_v32, 7  ;;  %v532_v44 = vld [vmem:[#allocation6 + $0xa8] sm:$0xff]  ;;  %v531_v45 = vld [vmem:[#allocation6 + $0xa0] sm:$0xff]  ;;  %v571_v46 = vrot.slane %v4294_v35, 7  ;;  %v628_v47 = vld [vmem:[#allocation6 + $0x158] sm:$0xff] }
  0x62   : > { %690 = vmatpush.msra.mxu0 %v635_v15  ;;  %722 = vmatpush.msra.mxu1 %v636_v16  ;;  %5290 = vst [vmem:[#allocation24_spill] sm:$0xff] %v5289_v38  ;;  %v559_v48 = vsel %vm4297_vm6, %v3541_v30, %v558_v39  ;;  %v560_v49 = vrot.slane %v558_v39, 2  ;;  %v563_v50 = vrot.slane %v561_v40, 2  ;;  %v530_v51 = vld [vmem:[#allocation6 + $0x98] sm:$0xff]  ;;  %v4311_v52 = vld [vmem:[%s4251_s26 + $0x10] sm:$0xff]  ;;  %v625_v59 = vld [vmem:[#allocation6 + $0x140] sm:$0xff] }
  0x63   : > { %819 = vmatpush.msra.mxu3 %v534_v31  ;;  %787 = vmatpush.msra.mxu2 %v533_v34  ;;  %v4316_v54 = vsel %vm4297_vm6, %v3543_v33, %v568_v43  ;;  %649 = vst [vmem:[#allocation1] ss:$4 sm:$0xff] %v559_v48  ;;  %v529_v55 = vld [vmem:[#allocation6 + $0x90] sm:$0xff]  ;;  %v4319_v56 = vrot.slane %v4311_v52, 2  ;;  %v4322_v57 = vrot.slane %v4311_v52, 4  ;;  %v570_v58 = vrot.slane %v568_v43, 2 }
  0x64   : > { %691 = vmatpush.msra.mxu0 %v633_v20  ;;  %723 = vmatpush.msra.mxu1 %v634_v21  ;;  %v626_v60 = vld [vmem:[#allocation6 + $0x148] sm:$0xff]  ;;  %v562_v61 = vsel %vm4297_vm6, %v560_v49, %v561_v40  ;;  %v565_v62 = vsel %vm4297_vm6, %v563_v50, %v3542_v41  ;;  %655 = vst [vmem:[#allocation1 + $0x3] ss:$4 sm:$0xff] %v4316_v54  ;;  %v573_v63 = vrot.slane %v571_v46, 2  ;;  %v3545_v0 = vrot.slane %v4311_v52, 9  ;;  %v527_v2 = vld [vmem:[#allocation6 + $0x80] sm:$0xff] }
  0x65   : > { %820 = vmatpush.msra.mxu3 %v532_v44  ;;  %788 = vmatpush.msra.mxu2 %v531_v45  ;;  %651 = vst [vmem:[#allocation1 + $0x1] ss:$4 sm:$0xff] %v562_v61  ;;  %v528_v1 = vld [vmem:[#allocation6 + $0x88] sm:$0xff]  ;;  %v4332_v3 = vsel %vm4297_vm6, %v570_v58, %v571_v46  ;;  %v578_v4 = vrot.slane %v4319_v56, 7  ;;  %v581_v5 = vrot.slane %v4322_v57, 7  ;;  %v623_v6 = vld [vmem:[#allocation6 + $0x130] sm:$0xff] }
  0x66   : > { %692 = vmatpush.msra.mxu0 %v631_v22  ;;  %724 = vmatpush.msra.mxu1 %v632_v26  ;;  %v624_v7 = vld [vmem:[#allocation6 + $0x138] sm:$0xff]  ;;  %653 = vst [vmem:[#allocation1 + $0x2] ss:$4 sm:$0xff] %v565_v62  ;;  %v4338_v8 = vsel %vm4297_vm6, %v573_v63, %v3544_v53  ;;  %v525_v12 = vld [vmem:[#allocation6 + $0x70] sm:$0xff]  ;;  %v3546_v13 = vrot.slane %v4311_v52, 13  ;;  %v621_v14 = vld [vmem:[#allocation6 + $0x120] sm:$0xff] }
  0x67   : > { %821 = vmatpush.msra.mxu3 %v530_v51  ;;  %789 = vmatpush.msra.mxu2 %v529_v55  ;;  %v526_v9 = vld [vmem:[#allocation6 + $0x78] sm:$0xff]  ;;  %v4342_v10 = vsel %vm4297_vm6, %v3545_v0, %v578_v4  ;;  %v580_v11 = vrot.slane %v578_v4, 2  ;;  %657 = vst [vmem:[#allocation1 + $0x20] ss:$4 sm:$0xff] %v4332_v3  ;;  %v622_v15 = vld [vmem:[#allocation6 + $0x128] sm:$0xff]  ;;  %v619_v16 = vld [vmem:[#allocation6 + $0x110] sm:$0xff] }
  0x68   : > { %693 = vmatpush.msra.mxu0 %v629_v36  ;;  %725 = vmatpush.msra.mxu1 %v630_v37  ;;  %659 = vst [vmem:[#allocation1 + $0x21] ss:$4 sm:$0xff] %v4338_v8  ;;  %v583_v17 = vrot.slane %v581_v5, 2  ;;  %v524_v19 = vld [vmem:[#allocation6 + $0x68] sm:$0xff]  ;;  %v523_v20 = vld [vmem:[#allocation6 + $0x60] sm:$0xff]  ;;  %v4353_v21 = vld [vmem:[%s4251_s26 + $0x18] sm:$0xff] }
  0x69   : > { %822 = vmatpush.msra.mxu3 %v528_v1  ;;  %790 = vmatpush.msra.mxu2 %v527_v2  ;;  %v4349_v18 = vsel %vm4297_vm6, %v580_v11, %v581_v5  ;;  %661 = vst [vmem:[#allocation1 + $0x22] ss:$4 sm:$0xff] %v4342_v10  ;;  %v620_v22 = vld [vmem:[#allocation6 + $0x118] sm:$0xff]  ;;  %v4357_v23 = vrot.slane %v4353_v21, 2  ;;  %v4360_v24 = vrot.slane %v4353_v21, 4  ;;  %v3547_v26 = vrot.slane %v4353_v21, 9 }
  0x6a   : > { %694 = vmatpush.msra.mxu0 %v627_v42  ;;  %726 = vmatpush.msra.mxu1 %v628_v47  ;;  %663 = vst [vmem:[#allocation1 + $0x23] ss:$4 sm:$0xff] %v4349_v18  ;;  %v522_v30 = vld [vmem:[#allocation6 + $0x58] sm:$0xff]  ;;  %v521_v31 = vld [vmem:[#allocation6 + $0x50] sm:$0xff]  ;;  %v4365_v33 = vsel %vm4297_vm6, %v583_v17, %v3546_v13  ;;  %v617_v34 = vld [vmem:[#allocation6 + $0x100] sm:$0xff]  ;;  %v3548_v40 = vrot.slane %v4353_v21, 13 }
  0x6b   : > { %823 = vmatpush.msra.mxu3 %v526_v9  ;;  %791 = vmatpush.msra.mxu2 %v525_v12  ;;  %v618_v36 = vld [vmem:[#allocation6 + $0x108] sm:$0xff]  ;;  %v588_v37 = vrot.slane %v4357_v23, 7  ;;  %v591_v39 = vrot.slane %v4360_v24, 7  ;;  %v908_v42 = vld [vmem:[#allocation6 + $0x2f0] sm:$0xff]  ;;  %v909_v43 = vld [vmem:[#allocation6 + $0x2f8] sm:$0xff] }
  0x6c   : > { %695 = vmatpush.msra.mxu0 %v625_v59  ;;  %727 = vmatpush.msra.mxu1 %v626_v60  ;;  %v906_v44 = vld [vmem:[#allocation6 + $0x2e0] sm:$0xff]  ;;  %v907_v45 = vld [vmem:[#allocation6 + $0x2e8] sm:$0xff]  ;;  %v904_v58 = vld [vmem:[#allocation6 + $0x2d0] sm:$0xff] }
  0x6d   : > { %824 = vmatpush.msra.mxu3 %v524_v19  ;;  %792 = vmatpush.msra.mxu2 %v523_v20  ;;  %v664_v41 = vld.sshfl [vmem:[#allocation1] sm:$0xff pattern:$0x73625140]  ;;  %v4372_v46 = vsel %vm4297_vm6, %v3547_v26, %v588_v37  ;;  %v590_v47 = vrot.slane %v588_v37, 2  ;;  %v593_v48 = vrot.slane %v591_v39, 2  ;;  %v4376_v49 = vld [vmem:[%s4251_s26 + $0x28] sm:$0xff] }
  0x6e   : > { %696 = vmatpush.msra.mxu0 %v623_v6  ;;  %728 = vmatpush.msra.mxu1 %v624_v7  ;;  %666 = vst [vmem:[#allocation1] ss:$4 sm:$0xff] %v4365_v33  ;;  %v520_v50 = vld [vmem:[#allocation6 + $0x48] sm:$0xff]  ;;  %v519_v51 = vld [vmem:[#allocation6 + $0x40] sm:$0xff]  ;;  %v4380_v53 = vrot.slane %v4376_v49, 2  ;;  %v4383_v55 = vrot.slane %v4376_v49, 4 }
  0x6f   : > { %825 = vmatpush.msra.mxu3 %v522_v30  ;;  %793 = vmatpush.msra.mxu2 %v521_v31  ;;  %667 = vst [vmem:[#allocation1 + $0x1] ss:$4 sm:$0xff] %v4372_v46  ;;  %v4387_v59 = vsel %vm4297_vm6, %v590_v47, %v591_v39  ;;  %v4391_v60 = vsel %vm4297_vm6, %v593_v48, %v3548_v40  ;;  %v905_v61 = vld [vmem:[#allocation6 + $0x2d8] sm:$0xff]  ;;  %v517_v63 = vld [vmem:[#allocation6 + $0x30] sm:$0xff]  ;;  %v516_v1 = vld [vmem:[#allocation6 + $0x28] sm:$0xff]  ;;  %v3552_v5 = vrot.slane %v4376_v49, 13 }
  0x70   : > { %697 = vmatpush.msra.mxu0 %v621_v14  ;;  %729 = vmatpush.msra.mxu1 %v622_v15  ;;  %v518_v62 = vld [vmem:[#allocation6 + $0x38] sm:$0xff]  ;;  %668 = vst [vmem:[#allocation1 + $0x2] ss:$4 sm:$0xff] %v4387_v59  ;;  %v608_v0 = vrot.slane %v4380_v53, 7  ;;  %v515_v2 = vld [vmem:[#allocation6 + $0x20] sm:$0xff]  ;;  %v611_v4 = vrot.slane %v4383_v55, 7 }
  0x71   : > { %826 = vmatpush.msra.mxu3 %v520_v50  ;;  %794 = vmatpush.msra.mxu2 %v519_v51  ;;  %669 = vst [vmem:[#allocation1 + $0x3] ss:$4 sm:$0xff] %v4391_v60  ;;  %v665_v6 = vld.sshfl [vmem:[#allocation1 + $0x20] sm:$0xff pattern:$0x73625140]  ;;  %v4399_v9 = vld [vmem:[%s4251_s26 + $0x20] sm:$0xff] }
  0x72   : > { %698 = vmatpush.msra.mxu0 %v619_v16  ;;  %730 = vmatpush.msra.mxu1 %v620_v22  ;;  %v610_v7 = vrot.slane %v608_v0, 2  ;;  %v3551_v11 = vrot.slane %v4376_v49, 9  ;;  %v902_v12 = vld [vmem:[#allocation6 + $0x2c0] sm:$0xff]  ;;  %v903_v13 = vld [vmem:[#allocation6 + $0x2c8] sm:$0xff]  ;;  %v613_v14 = vrot.slane %v611_v4, 2  ;;  %v4403_v15 = vrot.slane %v4399_v9, 2 }
  0x73   : > { %827 = vmatpush.msra.mxu3 %v518_v62  ;;  %795 = vmatpush.msra.mxu2 %v517_v63  ;;  %v4406_v16 = vrot.slane %v4399_v9, 4  ;;  %v3549_v17 = vrot.slane %v4399_v9, 9  ;;  %v900_v19 = vld [vmem:[#allocation6 + $0x2b0] sm:$0xff]  ;;  %v901_v22 = vld [vmem:[#allocation6 + $0x2b8] sm:$0xff]  ;;  %v3550_v31 = vrot.slane %v4399_v9, 13  ;;  %v898_v39 = vld [vmem:[#allocation6 + $0x2a0] sm:$0xff] }
  0x74   : > { %699 = vmatpush.msra.mxu0 %v617_v34  ;;  %731 = vmatpush.msra.mxu1 %v618_v36  ;;  %v4411_v20 = vsel %vm4297_vm6, %v3551_v11, %v608_v0  ;;  %v598_v26 = vrot.slane %v4403_v15, 7  ;;  %v514_v34 = vld [vmem:[#allocation6 + $0x18] sm:$0xff]  ;;  %v513_v36 = vld [vmem:[#allocation6 + $0x10] sm:$0xff]  ;;  %v4419_v37 = vsel %vm4297_vm6, %v610_v7, %v611_v4  ;;  %v899_v40 = vld [vmem:[#allocation6 + $0x2a8] sm:$0xff] }
  0x75   : > { %700 = vmatmul.f32.vlgmr.msra.gmra.mxu0 %v664_v41  ;;  %732 = vmatmul.f32.vlgmr.msra.gmra.mxu1 %v664_v41  ;;  %v601_v30 = vrot.slane %v4406_v16, 7  ;;  %673 = vst [vmem:[#allocation1 + $0x23] ss:$4 sm:$0xff] %v4411_v20  ;;  %v512_v41 = vld [vmem:[#allocation6 + $0x8] sm:$0xff]  ;;  %v511_v48 = vld [vmem:[#allocation6] sm:$0xff]  ;;  %v896_v50 = vld [vmem:[#allocation6 + $0x290] sm:$0xff] }
  0x76   : > { %945 = vmatpush.msrb.mxu0 %v908_v42  ;;  %977 = vmatpush.msrb.mxu1 %v909_v43  ;;  %v4423_v42 = vsel %vm4297_vm6, %v613_v14, %v3552_v5  ;;  %v4427_v43 = vsel %vm4297_vm6, %v3549_v17, %v598_v26  ;;  %v897_v51 = vld [vmem:[#allocation6 + $0x298] sm:$0xff]  ;;  %v894_v62 = vld [vmem:[#allocation6 + $0x280] sm:$0xff]  ;;  %v895_v63 = vld [vmem:[#allocation6 + $0x288] sm:$0xff] }
  0x77   : > { %828 = vmatpush.msra.mxu3 %v516_v1  ;;  %796 = vmatpush.msra.mxu2 %v515_v2  ;;  %670 = vst [vmem:[#allocation1 + $0x20] ss:$4 sm:$0xff] %v4427_v43  ;;  %v892_v0 = vld [vmem:[#allocation6 + $0x270] sm:$0xff]  ;;  %v893_v1 = vld [vmem:[#allocation6 + $0x278] sm:$0xff]  ;;  %v890_v2 = vld [vmem:[#allocation6 + $0x260] sm:$0xff] }
  0x78   : > { %946 = vmatpush.msrb.mxu0 %v906_v44  ;;  %978 = vmatpush.msrb.mxu1 %v907_v45  ;;  %v600_v44 = vrot.slane %v598_v26, 2  ;;  %v603_v45 = vrot.slane %v601_v30, 2  ;;  %v674_v47 = vld.sshfl [vmem:[#allocation1] sm:$0xff pattern:$0x73625140]  ;;  %v891_v4 = vld [vmem:[#allocation6 + $0x268] sm:$0xff] }
  0x79   : > { %829 = vmatpush.msra.mxu3 %v514_v34  ;;  %797 = vmatpush.msra.mxu2 %v513_v36  ;;  %676 = vst [vmem:[#allocation1] ss:$4 sm:$0xff] %v4419_v37  ;;  %v889_v7 = vld [vmem:[#allocation6 + $0x258] sm:$0xff]  ;;  %v884_v17 = vld [vmem:[#allocation6 + $0x230] sm:$0xff]  ;;  %v883_v34 = vld [vmem:[#allocation6 + $0x228] sm:$0xff] }
  0x7a   : > { %947 = vmatpush.msrb.mxu0 %v904_v58  ;;  %979 = vmatpush.msrb.mxu1 %v905_v61  ;;  %v4433_v58 = vsel %vm4297_vm6, %v600_v44, %v601_v30  ;;  %v4437_v61 = vsel %vm4297_vm6, %v603_v45, %v3550_v31  ;;  %677 = vst [vmem:[#allocation1 + $0x1] ss:$4 sm:$0xff] %v4423_v42  ;;  %v1054_v14 = vld [vmem:[#allocation6 + $0x3f8] sm:$0xff]  ;;  %v1052_v30 = vld [vmem:[#allocation6 + $0x3e8] sm:$0xff]  ;;  %v882_v31 = vld [vmem:[#allocation6 + $0x220] sm:$0xff] }
  0x7b   : > { %830 = vmatpush.msra.mxu3 %v512_v41  ;;  %798 = vmatpush.msra.mxu2 %v511_v48  ;;  %671 = vst [vmem:[#allocation1 + $0x21] ss:$4 sm:$0xff] %v4433_v58  ;;  %v1051_v36 = vld [vmem:[#allocation6 + $0x3e0] sm:$0xff]  ;;  %v881_v41 = vld [vmem:[#allocation6 + $0x218] sm:$0xff]  ;;  %v1049_v44 = vld [vmem:[#allocation6 + $0x3d0] sm:$0xff] }
  0x7c   : > { %948 = vmatpush.msrb.mxu0 %v902_v12  ;;  %980 = vmatpush.msrb.mxu1 %v903_v13  ;;  %672 = vst [vmem:[#allocation1 + $0x22] ss:$4 sm:$0xff] %v4437_v61  ;;  %v887_v13 = vld [vmem:[#allocation6 + $0x248] sm:$0xff] }
  0x7d   : > { %703 = vmatmul.f32.gmra.mxu0 %v665_v6  ;;  %735 = vmatmul.f32.gmra.mxu1 %v665_v6  ;;  %v888_v6 = vld [vmem:[#allocation6 + $0x250] sm:$0xff]  ;;  %v1048_v45 = vld [vmem:[#allocation6 + $0x3c8] sm:$0xff] }
  0x7e   : > { %949 = vmatpush.msrb.mxu0 %v900_v19  ;;  %981 = vmatpush.msrb.mxu1 %v901_v22  ;;  %v885_v19 = vld [vmem:[#allocation6 + $0x238] sm:$0xff]  ;;  %v1053_v22 = vld [vmem:[#allocation6 + $0x3f0] sm:$0xff] }
  0x7f   : > { %1122 = vmatpush.msrb.mxu3 %v1054_v14  ;;  %1090 = vmatpush.msrb.mxu2 %v1053_v22  ;;  %v1047_v14 = vld [vmem:[#allocation6 + $0x3c0] sm:$0xff]  ;;  %v1044_v22 = vld [vmem:[#allocation6 + $0x3a8] sm:$0xff] }
  0x80   : > { %950 = vmatpush.msrb.mxu0 %v898_v39  ;;  %982 = vmatpush.msrb.mxu1 %v899_v40  ;;  %v1050_v39 = vld [vmem:[#allocation6 + $0x3d8] sm:$0xff]  ;;  %v880_v40 = vld [vmem:[#allocation6 + $0x210] sm:$0xff] }
  0x81   : > { %v678_v5 = vld.sshfl [vmem:[#allocation1] sm:$0xff pattern:$0x73625140]  ;;  %1123 = vmatpush.msrb.mxu3 %v1052_v30  ;;  %1091 = vmatpush.msrb.mxu2 %v1051_v36  ;;  %v2165_v38 = vld [vmem:[#allocation9 + $0x1e8] sm:$0xff] }
  0x82   : > { %951 = vmatpush.msrb.mxu0 %v896_v50  ;;  %983 = vmatpush.msrb.mxu1 %v897_v51  ;;  %748 = vst [vmem:[#allocation1] ss:$4 sm:$0xff] %v4278_v25  ;;  %v1042_v36 = vld [vmem:[#allocation6 + $0x398] sm:$0xff] }
  0x83   : > { %750 = vst [vmem:[#allocation1 + $0x1] ss:$4 sm:$0xff] %v499_v28  ;;  %v675_v11 = vld.sshfl [vmem:[#allocation1 + $0x20] sm:$0xff pattern:$0x73625140]  ;;  %1124 = vmatpush.msrb.mxu3 %v1050_v39  ;;  %1092 = vmatpush.msrb.mxu2 %v1049_v44  ;;  %v1041_v39 = vld [vmem:[#allocation6 + $0x390] sm:$0xff] }
  0x84   : > { %952 = vmatpush.msrb.mxu0 %v894_v62  ;;  %984 = vmatpush.msrb.mxu1 %v895_v63  ;;  %752 = vst [vmem:[#allocation1 + $0x2] ss:$4 sm:$0xff] %v500_v29  ;;  %v886_v29 = vld [vmem:[#allocation6 + $0x240] sm:$0xff]  ;;  %v1038_v44 = vld [vmem:[#allocation6 + $0x378] sm:$0xff] }
  0x85   : > { %706 = vmatmul.f32.gmra.mxu0 %v674_v47  ;;  %738 = vmatmul.f32.gmra.mxu1 %v674_v47  ;;  %754 = vst [vmem:[#allocation1 + $0x3] ss:$4 sm:$0xff] %v4281_v27 }
  0x86   : > { %953 = vmatpush.msrb.mxu0 %v892_v0  ;;  %985 = vmatpush.msrb.mxu1 %v893_v1  ;;  %756 = vst [vmem:[#allocation1 + $0x20] ss:$4 sm:$0xff] %v4289_v32 }
  0x87   : > { %758 = vst [vmem:[#allocation1 + $0x21] ss:$4 sm:$0xff] %v4294_v35  ;;  %1125 = vmatpush.msrb.mxu3 %v1048_v45  ;;  %1093 = vmatpush.msrb.mxu2 %v1047_v14  ;;  %v1203_v14 = vld [vmem:[#allocation6 + $0x4d8] sm:$0xff] }
  0x88   : > { %954 = vmatpush.msrb.mxu0 %v890_v2  ;;  %986 = vmatpush.msrb.mxu1 %v891_v4  ;;  %760 = vst [vmem:[#allocation1 + $0x22] ss:$4 sm:$0xff] %v4311_v52 }
  0x89   : > { %762 = vst [vmem:[#allocation1 + $0x23] ss:$4 sm:$0xff] %v4319_v56 }
  0x8a   : > { %955 = vmatpush.msrb.mxu0 %v888_v6  ;;  %987 = vmatpush.msrb.mxu1 %v889_v7 }
  0x8c   : > { %v763_v12 = vld.sshfl [vmem:[#allocation1] sm:$0xff pattern:$0x73625140]  ;;  %956 = vmatpush.msrb.mxu0 %v886_v29  ;;  %988 = vmatpush.msrb.mxu1 %v887_v13  ;;  %v878_v29 = vld [vmem:[#allocation6 + $0x200] sm:$0xff]  ;;  %v879_v13 = vld [vmem:[#allocation6 + $0x208] sm:$0xff] }
  0x8d   : > { %709 = vmatmul.f32.gmra.mxu0 %v675_v11  ;;  %741 = vmatmul.f32.gmra.mxu1 %v675_v11  ;;  %765 = vst [vmem:[#allocation1] ss:$4 sm:$0xff] %v4322_v57 }
  0x8e   : > { %831 = vmatmul.f32.vlgmr.msra.gmra.mxu3 %v763_v12  ;;  %799 = vmatmul.f32.vlgmr.msra.gmra.mxu2 %v763_v12  ;;  %766 = vst [vmem:[#allocation1 + $0x1] ss:$4 sm:$0xff] %v4353_v21 }
  0x8f   : > { %767 = vst [vmem:[#allocation1 + $0x2] ss:$4 sm:$0xff] %v4357_v23  ;;  %957 = vmatpush.msrb.mxu0 %v884_v17  ;;  %989 = vmatpush.msrb.mxu1 %v885_v19  ;;  %v1046_v17 = vld [vmem:[#allocation6 + $0x3b8] sm:$0xff]  ;;  %v1045_v19 = vld [vmem:[#allocation6 + $0x3b0] sm:$0xff] }
  0x90   : > { %768 = vst [vmem:[#allocation1 + $0x3] ss:$4 sm:$0xff] %v4360_v24  ;;  %v764_v28 = vld.sshfl [vmem:[#allocation1 + $0x20] sm:$0xff pattern:$0x73625140]  ;;  %1126 = vmatpush.msrb.mxu3 %v1046_v17  ;;  %1094 = vmatpush.msrb.mxu2 %v1045_v19  ;;  %v1031_v17 = vld [vmem:[#allocation6 + $0x340] sm:$0xff] }
  0x91   : > { %769 = vst [vmem:[#allocation1 + $0x20] ss:$4 sm:$0xff] %v4399_v9  ;;  %958 = vmatpush.msrb.mxu0 %v882_v31  ;;  %990 = vmatpush.msrb.mxu1 %v883_v34  ;;  %v1043_v34 = vld [vmem:[#allocation6 + $0x3a0] sm:$0xff]  ;;  %v1030_v19 = vld [vmem:[#allocation6 + $0x338] sm:$0xff] }
  0x92   : > { %770 = vst [vmem:[#allocation1 + $0x21] ss:$4 sm:$0xff] %v4403_v15  ;;  %1127 = vmatpush.msrb.mxu3 %v1044_v22  ;;  %1095 = vmatpush.msrb.mxu2 %v1043_v34  ;;  %v1201_v22 = vld [vmem:[#allocation6 + $0x4c8] sm:$0xff]  ;;  %v1026_v34 = vld [vmem:[#allocation6 + $0x318] sm:$0xff] }
  0x93   : > { %771 = vst [vmem:[#allocation1 + $0x22] ss:$4 sm:$0xff] %v4406_v16  ;;  %959 = vmatpush.msrb.mxu0 %v880_v40  ;;  %991 = vmatpush.msrb.mxu1 %v881_v41  ;;  %v1040_v40 = vld [vmem:[#allocation6 + $0x388] sm:$0xff]  ;;  %v1039_v41 = vld [vmem:[#allocation6 + $0x380] sm:$0xff] }
  0x94   : > { %772 = vst [vmem:[#allocation1 + $0x23] ss:$4 sm:$0xff] %v4376_v49  ;;  %1128 = vmatpush.msrb.mxu3 %v1042_v36  ;;  %1096 = vmatpush.msrb.mxu2 %v1041_v39  ;;  %v1197_v36 = vld [vmem:[#allocation6 + $0x4a8] sm:$0xff]  ;;  %v1025_v39 = vld [vmem:[#allocation6 + $0x310] sm:$0xff] }
  0x95   : > { %712 = vmatmul.f32.gmra.mxu0 %v678_v5  ;;  %744 = vmatmul.f32.gmra.mxu1 %v678_v5 }
  0x96   : > { %834 = vmatmul.f32.gmra.mxu3 %v764_v28  ;;  %802 = vmatmul.f32.gmra.mxu2 %v764_v28 }
  0x97   : > { %v773_v26 = vld.sshfl [vmem:[#allocation1] sm:$0xff pattern:$0x73625140]  ;;  %960 = vmatpush.msrb.mxu0 %v878_v29  ;;  %992 = vmatpush.msrb.mxu1 %v879_v13  ;;  %v1032_v29 = vld [vmem:[#allocation6 + $0x348] sm:$0xff]  ;;  %v1202_v13 = vld [vmem:[#allocation6 + $0x4d0] sm:$0xff] }
  0x98   : > { %775 = vst [vmem:[#allocation1] ss:$4 sm:$0xff] %v4380_v53  ;;  %1129 = vmatpush.msrb.mxu3 %v1040_v40  ;;  %1097 = vmatpush.msrb.mxu2 %v1039_v41  ;;  %v1194_v40 = vld [vmem:[#allocation6 + $0x490] sm:$0xff] }
  0x99   : > { %776 = vst [vmem:[#allocation1 + $0x1] ss:$4 sm:$0xff] %v4383_v55 }
  0x9a   : > { %1130 = vmatpush.msrb.mxu3 %v1038_v44  ;;  %v1195_v44 = vld [vmem:[#allocation6 + $0x498] sm:$0xff] }
  0x9b   : > { %v774_v47 = vld.sshfl [vmem:[#allocation1 + $0x20] sm:$0xff pattern:$0x73625140] }
  0x9c   : > { %854 = vst.sshfl [vmem:[#allocation1 + $0x20] sm:$0xff pattern:$0x73625140] %v4281_v27 }
  0x9e   : > { %805 = vmatmul.f32.gmra.mxu2 %v773_v26  ;;  %837 = vmatmul.f32.gmra.mxu3 %v773_v26 }
  0xa0   : > { %v777_v48 = vld.sshfl [vmem:[#allocation1] sm:$0xff pattern:$0x73625140] }
  0xa1   : > { %847 = vst.sshfl [vmem:[#allocation1] sm:$0xff pattern:$0x73625140] %v4278_v25 }
  0xa3   : > { %v856_v50 = vld [vmem:[#allocation1 + $0x21] ss:$4 sm:$0xff]  ;;  %v858_v51 = vld [vmem:[#allocation1 + $0x22] ss:$4 sm:$0xff]  ;;  %v860_v62 = vld [vmem:[#allocation1 + $0x23] ss:$4 sm:$0xff] }
  0xa4   : > { %865 = vst.sshfl [vmem:[#allocation1 + $0x20] sm:$0xff pattern:$0x73625140] %v4353_v21 }
  0xa6   : > { %808 = vmatmul.f32.gmra.mxu2 %v774_v47  ;;  %840 = vmatmul.f32.gmra.mxu3 %v774_v47  ;;  %v1037_v47 = vld [vmem:[#allocation6 + $0x370] sm:$0xff] }
  0xa7   : > { %1098 = vmatpush.msrb.mxu2 %v1037_v47  ;;  %v1023_v47 = vld [vmem:[#allocation6 + $0x300] sm:$0xff] }
  0xa8   : > { %v849_v63 = vld [vmem:[#allocation1 + $0x1] ss:$4 sm:$0xff]  ;;  %v851_v0 = vld [vmem:[#allocation1 + $0x2] ss:$4 sm:$0xff]  ;;  %v853_v1 = vld [vmem:[#allocation1 + $0x3] ss:$4 sm:$0xff] }
  0xa9   : > { %861 = vst.sshfl [vmem:[#allocation1] sm:$0xff pattern:$0x73625140] %v4311_v52 }
  0xab   : > { %v4466_v2 = vld [vmem:[#allocation1 + $0x21] ss:$4 sm:$0xff]  ;;  %v4468_v4 = vld [vmem:[#allocation1 + $0x22] ss:$4 sm:$0xff]  ;;  %v4470_v5 = vld [vmem:[#allocation1 + $0x23] ss:$4 sm:$0xff] }
  0xac   : > { %873 = vst.sshfl [vmem:[#allocation1 + $0x20] sm:$0xff pattern:$0x73625140] %v4376_v49 }
  0xad   : > { %918 = vst [vmem:[#allocation1 + $0x20] ss:$4 sm:$0xff] %v858_v51  ;;  %v1206_v51 = vld [vmem:[#allocation6 + $0x4f0] sm:$0xff] }
  0xae   : > { %811 = vmatmul.f32.gmra.mxu2 %v777_v48  ;;  %843 = vmatmul.f32.gmra.mxu3 %v777_v48  ;;  %v1036_v48 = vld [vmem:[#allocation6 + $0x368] sm:$0xff] }
  0xaf   : > { %1243 = vmatpush.msra.mxu0 %v1206_v51  ;;  %1131 = vmatpush.msrb.mxu3 %v1036_v48  ;;  %v1192_v51 = vld [vmem:[#allocation6 + $0x480] sm:$0xff] }
  0xb0   : > { %v862_v25 = vld [vmem:[#allocation1 + $0x1] ss:$4 sm:$0xff]  ;;  %v863_v6 = vld [vmem:[#allocation1 + $0x2] ss:$4 sm:$0xff]  ;;  %v864_v7 = vld [vmem:[#allocation1 + $0x3] ss:$4 sm:$0xff] }
  0xb1   : > { %869 = vst.sshfl [vmem:[#allocation1] sm:$0xff pattern:$0x73625140] %v4399_v9 }
  0xb2   : > { %910 = vst [vmem:[#allocation1] ss:$4 sm:$0xff] %v849_v63  ;;  %v1035_v63 = vld [vmem:[#allocation6 + $0x360] sm:$0xff] }
  0xb3   : > { %v874_v11 = vld [vmem:[#allocation1 + $0x21] ss:$4 sm:$0xff]  ;;  %v4474_v12 = vld [vmem:[#allocation1 + $0x22] ss:$4 sm:$0xff]  ;;  %v4476_v28 = vld [vmem:[#allocation1 + $0x23] ss:$4 sm:$0xff]  ;;  %1099 = vmatpush.msrb.mxu2 %v1035_v63 }
  0xb4   : > { %920 = vst [vmem:[#allocation1 + $0x21] ss:$4 sm:$0xff] %v860_v62  ;;  %v1207_v62 = vld [vmem:[#allocation6 + $0x4f8] sm:$0xff] }
  0xb5   : > { %922 = vst [vmem:[#allocation1 + $0x22] ss:$4 sm:$0xff] %v862_v25  ;;  %1275 = vmatpush.msra.mxu1 %v1207_v62  ;;  %v1190_v62 = vld [vmem:[#allocation6 + $0x470] sm:$0xff]  ;;  %v1191_v63 = vld [vmem:[#allocation6 + $0x478] sm:$0xff] }
  0xb6   : > { %924 = vst [vmem:[#allocation1 + $0x23] ss:$4 sm:$0xff] %v863_v6  ;;  %v1033_v6 = vld [vmem:[#allocation6 + $0x350] sm:$0xff] }
  0xb7   : > { %1100 = vmatpush.msrb.mxu2 %v1033_v6  ;;  %v1185_v6 = vld [vmem:[#allocation6 + $0x448] sm:$0xff] }
  0xb8   : > { %v870_v26 = vld [vmem:[#allocation1 + $0x1] ss:$4 sm:$0xff]  ;;  %v871_v30 = vld [vmem:[#allocation1 + $0x2] ss:$4 sm:$0xff]  ;;  %v872_v31 = vld [vmem:[#allocation1 + $0x3] ss:$4 sm:$0xff] }
  0xb9   : > { %912 = vst [vmem:[#allocation1 + $0x1] ss:$4 sm:$0xff] %v851_v0  ;;  %v1034_v0 = vld [vmem:[#allocation6 + $0x358] sm:$0xff]  ;;  %1101 = vmatpush.msrb.mxu2 %v1031_v17 }
  0xba   : > { %914 = vst [vmem:[#allocation1 + $0x2] ss:$4 sm:$0xff] %v853_v1  ;;  %v1205_v1 = vld [vmem:[#allocation6 + $0x4e8] sm:$0xff]  ;;  %1132 = vmatpush.msrb.mxu3 %v1034_v0  ;;  %v1188_v0 = vld [vmem:[#allocation6 + $0x460] sm:$0xff] }
  0xbb   : > { %916 = vst [vmem:[#allocation1 + $0x3] ss:$4 sm:$0xff] %v856_v50  ;;  %v1204_v50 = vld [vmem:[#allocation6 + $0x4e0] sm:$0xff]  ;;  %1276 = vmatpush.msra.mxu1 %v1205_v1  ;;  %v1187_v1 = vld [vmem:[#allocation6 + $0x458] sm:$0xff] }
  0xbc   : > { %1244 = vmatpush.msra.mxu0 %v1204_v50  ;;  %1133 = vmatpush.msrb.mxu3 %v1032_v29  ;;  %v1186_v50 = vld [vmem:[#allocation6 + $0x450] sm:$0xff] }
  0xbd   : > { %v926_v45 = vld.sshfl [vmem:[#allocation1 + $0x20] sm:$0xff pattern:$0x73625140]  ;;  %1277 = vmatpush.msra.mxu1 %v1203_v14  ;;  %v1182_v29 = vld [vmem:[#allocation6 + $0x430] sm:$0xff]  ;;  %v1180_v14 = vld [vmem:[#allocation6 + $0x420] sm:$0xff] }
  0xbe   : > { %931 = vst [vmem:[#allocation1 + $0x20] ss:$4 sm:$0xff] %v870_v26  ;;  %1245 = vmatpush.msra.mxu0 %v1202_v13  ;;  %v1028_v26 = vld [vmem:[#allocation6 + $0x328] sm:$0xff]  ;;  %1134 = vmatpush.msrb.mxu3 %v1030_v19  ;;  %v1183_v13 = vld [vmem:[#allocation6 + $0x438] sm:$0xff] }
  0xbf   : > { %932 = vst [vmem:[#allocation1 + $0x21] ss:$4 sm:$0xff] %v871_v30  ;;  %v1198_v30 = vld [vmem:[#allocation6 + $0x4b0] sm:$0xff]  ;;  %1278 = vmatpush.msra.mxu1 %v1201_v22  ;;  %v1181_v19 = vld [vmem:[#allocation6 + $0x428] sm:$0xff]  ;;  %v1176_v22 = vld [vmem:[#allocation6 + $0x400] sm:$0xff] }
  0xc0   : > { %933 = vst [vmem:[#allocation1 + $0x22] ss:$4 sm:$0xff] %v872_v31  ;;  %v1027_v31 = vld [vmem:[#allocation6 + $0x320] sm:$0xff]  ;;  %1135 = vmatpush.msrb.mxu3 %v1028_v26  ;;  %v1177_v26 = vld [vmem:[#allocation6 + $0x408] sm:$0xff] }
  0xc1   : > { %934 = vst [vmem:[#allocation1 + $0x23] ss:$4 sm:$0xff] %v874_v11  ;;  %v1200_v11 = vld [vmem:[#allocation6 + $0x4c0] sm:$0xff] }
  0xc2   : > { %v925_v25 = vld.sshfl [vmem:[#allocation1] sm:$0xff pattern:$0x73625140]  ;;  %1246 = vmatpush.msra.mxu0 %v1200_v11  ;;  %1136 = vmatpush.msrb.mxu3 %v1026_v34  ;;  %v1178_v11 = vld [vmem:[#allocation6 + $0x410] sm:$0xff] }
  0xc3   : > { %927 = vst [vmem:[#allocation1] ss:$4 sm:$0xff] %v864_v7  ;;  %961 = vmatmul.f32.vlgmr.msrb.gmra.mxu0 %v925_v25  ;;  %993 = vmatmul.f32.vlgmr.msrb.gmra.mxu1 %v925_v25  ;;  %v1029_v7 = vld [vmem:[#allocation6 + $0x330] sm:$0xff] }
  0xc4   : > { %928 = vst [vmem:[#allocation1 + $0x1] ss:$4 sm:$0xff] %v4466_v2  ;;  %v1199_v2 = vld [vmem:[#allocation6 + $0x4b8] sm:$0xff]  ;;  %1102 = vmatpush.msrb.mxu2 %v1029_v7  ;;  %1247 = vmatpush.msra.mxu0 %v1198_v30 }
  0xc5   : > { %929 = vst [vmem:[#allocation1 + $0x2] ss:$4 sm:$0xff] %v4468_v4  ;;  %v1196_v4 = vld [vmem:[#allocation6 + $0x4a0] sm:$0xff]  ;;  %1279 = vmatpush.msra.mxu1 %v1199_v2 }
  0xc6   : > { %930 = vst [vmem:[#allocation1 + $0x3] ss:$4 sm:$0xff] %v4470_v5  ;;  %1103 = vmatpush.msrb.mxu2 %v1027_v31  ;;  %v1024_v5 = vld [vmem:[#allocation6 + $0x308] sm:$0xff]  ;;  %1248 = vmatpush.msra.mxu0 %v1196_v4 }
  0xc7   : > { %1280 = vmatpush.msra.mxu1 %v1197_v36  ;;  %1137 = vmatpush.msrb.mxu3 %v1024_v5  ;;  %v1379_v5 = vld [vmem:[#allocation6 + $0x5f8] sm:$0xff] }
  0xc8   : > { %v936_v41 = vld.sshfl [vmem:[#allocation1 + $0x20] sm:$0xff pattern:$0x73625140]  ;;  %1104 = vmatpush.msrb.mxu2 %v1025_v39  ;;  %1249 = vmatpush.msra.mxu0 %v1194_v40  ;;  %v1378_v39 = vld [vmem:[#allocation6 + $0x5f0] sm:$0xff] }
  0xc9   : > { %1063 = vst [vmem:[#allocation1 + $0x20] ss:$4 sm:$0xff] %v4319_v56  ;;  %1281 = vmatpush.msra.mxu1 %v1195_v44  ;;  %v1377_v44 = vld [vmem:[#allocation6 + $0x5e8] sm:$0xff]  ;;  %1447 = vmatpush.msra.mxu3 %v1379_v5  ;;  %v1360_v5 = vld [vmem:[#allocation6 + $0x560] sm:$0xff] }
  0xca   : > { %1065 = vst [vmem:[#allocation1 + $0x21] ss:$4 sm:$0xff] %v4322_v57  ;;  %1105 = vmatpush.msrb.mxu2 %v1023_v47  ;;  %1250 = vmatpush.msra.mxu0 %v1192_v51  ;;  %v1375_v51 = vld [vmem:[#allocation6 + $0x5d8] sm:$0xff] }
  0xcb   : > { %964 = vmatmul.f32.gmra.mxu0 %v926_v45  ;;  %996 = vmatmul.f32.gmra.mxu1 %v926_v45  ;;  %v1193_v45 = vld [vmem:[#allocation6 + $0x488] sm:$0xff]  ;;  %1067 = vst [vmem:[#allocation1 + $0x22] ss:$4 sm:$0xff] %v4353_v21 }
  0xcc   : > { %1282 = vmatpush.msra.mxu1 %v1193_v45  ;;  %1069 = vst [vmem:[#allocation1 + $0x23] ss:$4 sm:$0xff] %v4357_v23  ;;  %1251 = vmatpush.msra.mxu0 %v1190_v62  ;;  %v1372_v62 = vld [vmem:[#allocation6 + $0x5c0] sm:$0xff] }
  0xcd   : > { %v935_v48 = vld.sshfl [vmem:[#allocation1] sm:$0xff pattern:$0x73625140]  ;;  %1415 = vmatpush.msra.mxu2 %v1378_v39  ;;  %1448 = vmatpush.msra.mxu3 %v1377_v44  ;;  %v1358_v44 = vld [vmem:[#allocation6 + $0x550] sm:$0xff] }
  0xce   : > { %937 = vst [vmem:[#allocation1] ss:$4 sm:$0xff] %v4474_v12  ;;  %v1189_v12 = vld [vmem:[#allocation6 + $0x468] sm:$0xff]  ;;  %1283 = vmatpush.msra.mxu1 %v1191_v63  ;;  %1252 = vmatpush.msra.mxu0 %v1188_v0  ;;  %v1370_v0 = vld [vmem:[#allocation6 + $0x5b0] sm:$0xff]  ;;  %v1363_v39 = vld [vmem:[#allocation6 + $0x578] sm:$0xff] }
  0xcf   : > { %938 = vst [vmem:[#allocation1 + $0x1] ss:$4 sm:$0xff] %v4476_v28  ;;  %v1184_v28 = vld [vmem:[#allocation6 + $0x440] sm:$0xff]  ;;  %v1373_v63 = vld [vmem:[#allocation6 + $0x5c8] sm:$0xff]  ;;  %1449 = vmatpush.msra.mxu3 %v1375_v51 }
  0xd0   : > { %1284 = vmatpush.msra.mxu1 %v1189_v12  ;;  %1253 = vmatpush.msra.mxu0 %v1186_v50  ;;  %v1371_v12 = vld [vmem:[#allocation6 + $0x5b8] sm:$0xff]  ;;  %v1368_v50 = vld [vmem:[#allocation6 + $0x5a0] sm:$0xff] }
  0xd1   : > { %1450 = vmatpush.msra.mxu3 %v1373_v63  ;;  %v1354_v63 = vld [vmem:[#allocation6 + $0x530] sm:$0xff] }
  0xd2   : > { %1285 = vmatpush.msra.mxu1 %v1187_v1  ;;  %1254 = vmatpush.msra.mxu0 %v1184_v28  ;;  %v1369_v1 = vld [vmem:[#allocation6 + $0x5a8] sm:$0xff] }
  0xd3   : > { %967 = vmatmul.f32.gmra.mxu0 %v935_v48  ;;  %999 = vmatmul.f32.gmra.mxu1 %v935_v48  ;;  %v1071_v17 = vld.sshfl [vmem:[#allocation1 + $0x20] sm:$0xff pattern:$0x73625140]  ;;  %v1374_v48 = vld [vmem:[#allocation6 + $0x5d0] sm:$0xff] }
  0xd4   : > { %1286 = vmatpush.msra.mxu1 %v1185_v6  ;;  %1255 = vmatpush.msra.mxu0 %v1182_v29  ;;  %1076 = vst [vmem:[#allocation1 + $0x20] ss:$4 sm:$0xff] %v4376_v49  ;;  %v1365_v6 = vld [vmem:[#allocation6 + $0x588] sm:$0xff] }
  0xd5   : > { %1077 = vst [vmem:[#allocation1 + $0x21] ss:$4 sm:$0xff] %v4380_v53  ;;  %1451 = vmatpush.msra.mxu3 %v1371_v12  ;;  %v1523_v12 = vld [vmem:[#allocation6 + $0x6f0] sm:$0xff] }
  0xd6   : > { %v939_v25 = vld.sshfl [vmem:[#allocation1] sm:$0xff pattern:$0x73625140]  ;;  %1287 = vmatpush.msra.mxu1 %v1183_v13  ;;  %1256 = vmatpush.msra.mxu0 %v1180_v14  ;;  %1078 = vst [vmem:[#allocation1 + $0x22] ss:$4 sm:$0xff] %v4383_v55 }
  0xd7   : > { %1055 = vst [vmem:[#allocation1] ss:$4 sm:$0xff] %v4281_v27  ;;  %1452 = vmatpush.msra.mxu3 %v1369_v1  ;;  %v1352_v1 = vld [vmem:[#allocation6 + $0x520] sm:$0xff] }
  0xd8   : > { %1057 = vst [vmem:[#allocation1 + $0x1] ss:$4 sm:$0xff] %v4289_v32  ;;  %v4494_v32 = vld [vmem:[%s4251_s26 + $0x30] sm:$0xff]  ;;  %1288 = vmatpush.msra.mxu1 %v1181_v19  ;;  %1257 = vmatpush.msra.mxu0 %v1178_v11 }
  0xd9   : > { %1059 = vst [vmem:[#allocation1 + $0x2] ss:$4 sm:$0xff] %v4294_v35  ;;  %v1179_v35 = vld [vmem:[#allocation6 + $0x418] sm:$0xff]  ;;  %v4506_v2 = vrot.slane %v4494_v32, 2  ;;  %v4510_v31 = vrot.slane %v4494_v32, 4  ;;  %v3553_v40 = vrot.slane %v4494_v32, 9 }
  0xda   : > { %1061 = vst [vmem:[#allocation1 + $0x3] ss:$4 sm:$0xff] %v4311_v52  ;;  %1289 = vmatpush.msra.mxu1 %v1179_v35  ;;  %1258 = vmatpush.msra.mxu0 %v1176_v22  ;;  %v3554_v35 = vrot.slane %v4494_v32, 13 }
  0xdb   : > { %970 = vmatmul.f32.gmra.mxu0 %v936_v41  ;;  %1002 = vmatmul.f32.gmra.mxu1 %v936_v41  ;;  %1079 = vst [vmem:[#allocation1 + $0x23] ss:$4 sm:$0xff] %v4494_v32  ;;  %v1167_v36 = vrot.slane %v4506_v2, 7  ;;  %v1376_v41 = vld [vmem:[#allocation6 + $0x5e0] sm:$0xff]  ;;  %v1170_v29 = vrot.slane %v4510_v31, 7 }
  0xdc   : > { %1290 = vmatpush.msra.mxu1 %v1177_v26  ;;  %1416 = vmatpush.msra.mxu2 %v1376_v41 }
  0xdd   : > { %v4523_v47 = vsel %vm4297_vm6, %v3553_v40, %v1167_v36  ;;  %v1169_v19 = vrot.slane %v1167_v36, 2  ;;  %v1172_v11 = vrot.slane %v1170_v29, 2  ;;  %v1361_v40 = vld [vmem:[#allocation6 + $0x568] sm:$0xff]  ;;  %1560 = vmatpush.msrb.mxu0 %v1523_v12 }
  0xde   : > { %1417 = vmatpush.msra.mxu2 %v1374_v48  ;;  %v1359_v48 = vld [vmem:[#allocation6 + $0x558] sm:$0xff] }
  0xdf   : > { %v4546_v22 = vsel %vm4297_vm6, %v1169_v19, %v1170_v29 }
  0xe0   : > { %1418 = vmatpush.msra.mxu2 %v1372_v62  ;;  %v1357_v62 = vld [vmem:[#allocation6 + $0x548] sm:$0xff] }
  0xe1   : > { %v1070_v7 = vld.sshfl [vmem:[#allocation1] sm:$0xff pattern:$0x73625140] }
  0xe2   : > { %1072 = vst [vmem:[#allocation1] ss:$4 sm:$0xff] %v4360_v24  ;;  %1138 = vmatmul.f32.vlgmr.msrb.gmra.mxu3 %v1070_v7  ;;  %1106 = vmatmul.f32.vlgmr.msrb.gmra.mxu2 %v1070_v7  ;;  %v1081_v30 = vld.sshfl [vmem:[#allocation1 + $0x20] sm:$0xff pattern:$0x73625140]  ;;  %v4550_v7 = vsel %vm4297_vm6, %v1172_v11, %v3554_v35  ;;  %v1348_v11 = vld [vmem:[#allocation6 + $0x500] sm:$0xff] }
  0xe3   : > { %1073 = vst [vmem:[#allocation1 + $0x1] ss:$4 sm:$0xff] %v4399_v9  ;;  %973 = vmatmul.f32.gmra.mxu0 %v939_v25  ;;  %1005 = vmatmul.f32.gmra.mxu1 %v939_v25  ;;  %v1364_v25 = vld [vmem:[#allocation6 + $0x580] sm:$0xff]  ;;  %v1349_v35 = vld [vmem:[#allocation6 + $0x508] sm:$0xff] }
  0xe4   : > { %1074 = vst [vmem:[#allocation1 + $0x2] ss:$4 sm:$0xff] %v4403_v15  ;;  %1419 = vmatpush.msra.mxu2 %v1370_v0  ;;  %v1355_v0 = vld [vmem:[#allocation6 + $0x538] sm:$0xff] }
  0xe5   : > { %1075 = vst [vmem:[#allocation1 + $0x3] ss:$4 sm:$0xff] %v4406_v16 }
  0xe6   : > { %1216 = vst [vmem:[#allocation1 + $0x20] ss:$4 sm:$0xff] %v4349_v18  ;;  %1420 = vmatpush.msra.mxu2 %v1368_v50  ;;  %v1524_v50 = vld [vmem:[#allocation6 + $0x6f8] sm:$0xff] }
  0xe7   : > { %1218 = vst [vmem:[#allocation1 + $0x21] ss:$4 sm:$0xff] %v4365_v33  ;;  %1592 = vmatpush.msrb.mxu1 %v1524_v50 }
  0xe8   : > { %1220 = vst [vmem:[#allocation1 + $0x22] ss:$4 sm:$0xff] %v4372_v46 }
  0xe9   : > { %1222 = vst [vmem:[#allocation1 + $0x23] ss:$4 sm:$0xff] %v4387_v59 }
  0xea   : > { %1141 = vmatmul.f32.gmra.mxu3 %v1071_v17  ;;  %1109 = vmatmul.f32.gmra.mxu2 %v1071_v17 }
  0xec   : > { %v1080_v34 = vld.sshfl [vmem:[#allocation1] sm:$0xff pattern:$0x73625140] }
  0xed   : > { %1082 = vst [vmem:[#allocation1] ss:$4 sm:$0xff] %v4506_v2 }
  0xee   : > { %1083 = vst [vmem:[#allocation1 + $0x1] ss:$4 sm:$0xff] %v4510_v31 }
  0xf0   : > { %v4514_v4 = vld.sshfl [vmem:[#allocation1 + $0x20] sm:$0xff pattern:$0x73625140] }
  0xf1   : > { %1229 = vst [vmem:[#allocation1 + $0x20] ss:$4 sm:$0xff] %v4411_v20 }
  0xf2   : > { %1144 = vmatmul.f32.gmra.mxu3 %v1080_v34  ;;  %1112 = vmatmul.f32.gmra.mxu2 %v1080_v34  ;;  %1230 = vst [vmem:[#allocation1 + $0x21] ss:$4 sm:$0xff] %v4419_v37  ;;  %v4566_v29 = vpop.f32.mrf.mxu0 }
  0xf3   : > { %1231 = vst [vmem:[#allocation1 + $0x22] ss:$4 sm:$0xff] %v4423_v42 }
  0xf4   : > { %1232 = vst [vmem:[#allocation1 + $0x23] ss:$4 sm:$0xff] %v4523_v47 }
  0xf5   : > { %v1084_v45 = vld.sshfl [vmem:[#allocation1] sm:$0xff pattern:$0x73625140] }
  0xf6   : > { %1208 = vst [vmem:[#allocation1] ss:$4 sm:$0xff] %v4316_v54  ;;  %v1366_v54 = vld [vmem:[#allocation6 + $0x590] sm:$0xff] }
  0xf7   : > { %1210 = vst [vmem:[#allocation1 + $0x1] ss:$4 sm:$0xff] %v4332_v3  ;;  %v1367_v3 = vld [vmem:[#allocation6 + $0x598] sm:$0xff]  ;;  %1421 = vmatpush.msra.mxu2 %v1366_v54  ;;  %v1353_v54 = vld [vmem:[#allocation6 + $0x528] sm:$0xff] }
  0xf8   : > { %1212 = vst [vmem:[#allocation1 + $0x2] ss:$4 sm:$0xff] %v4338_v8  ;;  %1453 = vmatpush.msra.mxu3 %v1367_v3  ;;  %v1521_v3 = vld [vmem:[#allocation6 + $0x6e0] sm:$0xff] }
  0xf9   : > { %1214 = vst [vmem:[#allocation1 + $0x3] ss:$4 sm:$0xff] %v4342_v10  ;;  %1422 = vmatpush.msra.mxu2 %v1364_v25  ;;  %v1351_v25 = vld [vmem:[#allocation6 + $0x518] sm:$0xff]  ;;  %1561 = vmatpush.msrb.mxu0 %v1521_v3  ;;  %v1507_v3 = vld [vmem:[#allocation6 + $0x670] sm:$0xff] }
  0xfa   : > { %1147 = vmatmul.f32.gmra.mxu3 %v1081_v30  ;;  %1115 = vmatmul.f32.gmra.mxu2 %v1081_v30 }
  0xfb   : > { %v4530_v28 = vld.sshfl [vmem:[#allocation1 + $0x20] sm:$0xff pattern:$0x73625140]  ;;  %1454 = vmatpush.msra.mxu3 %v1365_v6  ;;  %v1519_v6 = vld [vmem:[#allocation6 + $0x6d0] sm:$0xff] }
  0xfc   : > { %1324 = vst.sshfl [vmem:[#allocation1 + $0x20] sm:$0xff pattern:$0x73625140] %v4311_v52  ;;  %1562 = vmatpush.msrb.mxu0 %v1519_v6  ;;  %v1503_v6 = vld [vmem:[#allocation6 + $0x650] sm:$0xff] }
  0xfd   : > { %1455 = vmatpush.msra.mxu3 %v1363_v39  ;;  %v1515_v39 = vld [vmem:[#allocation6 + $0x6b0] sm:$0xff] }
  0xff   : > { %1456 = vmatpush.msra.mxu3 %v1361_v40  ;;  %v1513_v40 = vld [vmem:[#allocation6 + $0x6a0] sm:$0xff] }
 0x100   : > { %v1223_v8 = vld.sshfl [vmem:[#allocation1] sm:$0xff pattern:$0x73625140] }
 0x101   : > { %1259 = vmatmul.f32.vlgmr.msra.gmra.mxu0 %v1223_v8  ;;  %1225 = vst [vmem:[#allocation1] ss:$4 sm:$0xff] %v4391_v60  ;;  %1291 = vmatmul.f32.vlgmr.msra.gmra.mxu1 %v1223_v8  ;;  %v1522_v8 = vld [vmem:[#allocation6 + $0x6e8] sm:$0xff] }
 0x102   : > { %1226 = vst [vmem:[#allocation1 + $0x1] ss:$4 sm:$0xff] %v4427_v43  ;;  %1150 = vmatmul.f32.gmra.mxu3 %v1084_v45  ;;  %1118 = vmatmul.f32.gmra.mxu2 %v1084_v45  ;;  %v1356_v45 = vld [vmem:[#allocation6 + $0x540] sm:$0xff] }
 0x103   : > { %1227 = vst [vmem:[#allocation1 + $0x2] ss:$4 sm:$0xff] %v4433_v58  ;;  %v4537_v13 = vld [vmem:[#allocation1 + $0x21] ss:$4 sm:$0xff]  ;;  %v1328_v14 = vld [vmem:[#allocation1 + $0x22] ss:$4 sm:$0xff]  ;;  %1457 = vmatpush.msra.mxu3 %v1359_v48  ;;  %1593 = vmatpush.msrb.mxu1 %v1522_v8 }
 0x104   : > { %1228 = vst [vmem:[#allocation1 + $0x3] ss:$4 sm:$0xff] %v4437_v61  ;;  %v1330_v17 = vld [vmem:[#allocation1 + $0x23] ss:$4 sm:$0xff] }
 0x105   : > { %1335 = vst.sshfl [vmem:[#allocation1 + $0x20] sm:$0xff pattern:$0x73625140] %v4399_v9  ;;  %1458 = vmatpush.msra.mxu3 %v1357_v62  ;;  %v4573_v62 = vpop.f32.mrf.mxu0  ;;  %v1508_v8 = vld [vmem:[#allocation6 + $0x678] sm:$0xff] }
 0x107   : > { %1459 = vmatpush.msra.mxu3 %v1355_v0  ;;  %v1512_v0 = vld [vmem:[#allocation6 + $0x698] sm:$0xff] }
 0x109   : > { %1262 = vmatmul.f32.gmra.mxu0 %v4514_v4  ;;  %1294 = vmatmul.f32.gmra.mxu1 %v4514_v4  ;;  %v1362_v4 = vld [vmem:[#allocation6 + $0x570] sm:$0xff] }
 0x10a   : > { %1423 = vmatpush.msra.mxu2 %v1362_v4  ;;  %1460 = vmatpush.msra.mxu3 %v1353_v54  ;;  %v1518_v4 = vld [vmem:[#allocation6 + $0x6c8] sm:$0xff] }
 0x10b   : > { %v1233_v26 = vld.sshfl [vmem:[#allocation1] sm:$0xff pattern:$0x73625140]  ;;  %v1510_v54 = vld [vmem:[#allocation6 + $0x688] sm:$0xff] }
 0x10c   : > { %1235 = vst [vmem:[#allocation1] ss:$4 sm:$0xff] %v4546_v22  ;;  %v4553_v30 = vld [vmem:[#allocation1 + $0x21] ss:$4 sm:$0xff]  ;;  %v4555_v34 = vld [vmem:[#allocation1 + $0x22] ss:$4 sm:$0xff]  ;;  %1424 = vmatpush.msra.mxu2 %v1360_v5  ;;  %1461 = vmatpush.msra.mxu3 %v1351_v25 }
 0x10d   : > { %1236 = vst [vmem:[#allocation1 + $0x1] ss:$4 sm:$0xff] %v4550_v7  ;;  %v4558_v36 = vld [vmem:[#allocation1 + $0x23] ss:$4 sm:$0xff] }
 0x10e   : > { %1343 = vst.sshfl [vmem:[#allocation1 + $0x20] sm:$0xff pattern:$0x73625140] %v4494_v32  ;;  %1425 = vmatpush.msra.mxu2 %v1358_v44  ;;  %1462 = vmatpush.msra.mxu3 %v1349_v35  ;;  %v1516_v5 = vld [vmem:[#allocation6 + $0x6b8] sm:$0xff]  ;;  %v1514_v44 = vld [vmem:[#allocation6 + $0x6a8] sm:$0xff] }
 0x10f   : > { %1388 = vst [vmem:[#allocation1 + $0x20] ss:$4 sm:$0xff] %v1328_v14  ;;  %v1520_v14 = vld [vmem:[#allocation6 + $0x6d8] sm:$0xff]  ;;  %v1506_v25 = vld [vmem:[#allocation6 + $0x668] sm:$0xff] }
 0x110   : > { %1426 = vmatpush.msra.mxu2 %v1356_v45  ;;  %1594 = vmatpush.msrb.mxu1 %v1520_v14  ;;  %v1504_v14 = vld [vmem:[#allocation6 + $0x658] sm:$0xff] }
 0x111   : > { %1265 = vmatmul.f32.gmra.mxu0 %v1233_v26  ;;  %1297 = vmatmul.f32.gmra.mxu1 %v1233_v26  ;;  %v1517_v26 = vld [vmem:[#allocation6 + $0x6c0] sm:$0xff] }
 0x112   : > { %1427 = vmatpush.msra.mxu2 %v1354_v63  ;;  %1563 = vmatpush.msrb.mxu0 %v1517_v26  ;;  %v1511_v63 = vld [vmem:[#allocation6 + $0x690] sm:$0xff] }
 0x113   : > { %1595 = vmatpush.msrb.mxu1 %v1518_v4  ;;  %v1501_v4 = vld [vmem:[#allocation6 + $0x640] sm:$0xff] }
 0x114   : > { %v1237_v41 = vld.sshfl [vmem:[#allocation1] sm:$0xff pattern:$0x73625140]  ;;  %1428 = vmatpush.msra.mxu2 %v1352_v1  ;;  %1564 = vmatpush.msrb.mxu0 %v1515_v39  ;;  %v1502_v39 = vld [vmem:[#allocation6 + $0x648] sm:$0xff] }
 0x115   : > { %v4561_v51 = vld [vmem:[#allocation1 + $0x21] ss:$4 sm:$0xff]  ;;  %1317 = vst.sshfl [vmem:[#allocation1] sm:$0xff pattern:$0x73625140] %v4281_v27  ;;  %1596 = vmatpush.msrb.mxu1 %v1516_v5 }
 0x116   : > { %1390 = vst [vmem:[#allocation1 + $0x21] ss:$4 sm:$0xff] %v1330_v17  ;;  %v1350_v27 = vld [vmem:[#allocation6 + $0x510] sm:$0xff]  ;;  %1565 = vmatpush.msrb.mxu0 %v1513_v40  ;;  %v1500_v40 = vld [vmem:[#allocation6 + $0x638] sm:$0xff] }
 0x117   : > { %1429 = vmatpush.msra.mxu2 %v1350_v27  ;;  %v4569_v48 = vld [vmem:[#allocation1 + $0x22] ss:$4 sm:$0xff]  ;;  %v4571_v45 = vld [vmem:[#allocation1 + $0x23] ss:$4 sm:$0xff]  ;;  %1597 = vmatpush.msrb.mxu1 %v1514_v44 }
 0x118   : > { %1566 = vmatpush.msrb.mxu0 %v1511_v63  ;;  %v1505_v27 = vld [vmem:[#allocation6 + $0x660] sm:$0xff]  ;;  %v1499_v5 = vld [vmem:[#allocation6 + $0x630] sm:$0xff] }
 0x119   : > { %1268 = vmatmul.f32.gmra.mxu0 %v4530_v28  ;;  %1300 = vmatmul.f32.gmra.mxu1 %v4530_v28  ;;  %v1676_v44 = vld [vmem:[#allocation6 + $0x7f0] sm:$0xff] }
 0x11a   : > { %1430 = vmatpush.msra.mxu2 %v1348_v11  ;;  %1598 = vmatpush.msrb.mxu1 %v1512_v0  ;;  %v1677_v0 = vld [vmem:[#allocation6 + $0x7f8] sm:$0xff] }
 0x11b   : > { %1745 = vmatpush.msrb.mxu3 %v1677_v0  ;;  %v1661_v0 = vld [vmem:[#allocation6 + $0x778] sm:$0xff] }
 0x11c   : > { %v1319_v28 = vld [vmem:[#allocation1 + $0x1] ss:$4 sm:$0xff]  ;;  %v1321_v17 = vld [vmem:[#allocation1 + $0x2] ss:$4 sm:$0xff]  ;;  %v1323_v19 = vld [vmem:[#allocation1 + $0x3] ss:$4 sm:$0xff]  ;;  %1599 = vmatpush.msrb.mxu1 %v1510_v54  ;;  %1713 = vmatpush.msrb.mxu2 %v1676_v44 }
 0x11d   : > { %1331 = vst.sshfl [vmem:[#allocation1] sm:$0xff pattern:$0x73625140] %v4353_v21  ;;  %v1673_v54 = vld [vmem:[#allocation6 + $0x7d8] sm:$0xff] }
 0x11e   : > { %1600 = vmatpush.msrb.mxu1 %v1508_v8  ;;  %v1670_v8 = vld [vmem:[#allocation6 + $0x7c0] sm:$0xff] }
 0x120   : > { %1601 = vmatpush.msrb.mxu1 %v1506_v25  ;;  %v1494_v25 = vld [vmem:[#allocation6 + $0x608] sm:$0xff] }
 0x121   : > { %1271 = vmatmul.f32.gmra.mxu0 %v1237_v41  ;;  %1303 = vmatmul.f32.gmra.mxu1 %v1237_v41  ;;  %v1509_v41 = vld [vmem:[#allocation6 + $0x680] sm:$0xff] }
 0x122   : > { %1567 = vmatpush.msrb.mxu0 %v1509_v41  ;;  %1602 = vmatpush.msrb.mxu1 %v1504_v14  ;;  %v1672_v41 = vld [vmem:[#allocation6 + $0x7d0] sm:$0xff] }
 0x124   : > { %v1332_v12 = vld [vmem:[#allocation1 + $0x1] ss:$4 sm:$0xff]  ;;  %v1333_v50 = vld [vmem:[#allocation1 + $0x2] ss:$4 sm:$0xff]  ;;  %v4575_v1 = vld [vmem:[#allocation1 + $0x3] ss:$4 sm:$0xff]  ;;  %1568 = vmatpush.msrb.mxu0 %v1507_v3  ;;  %1603 = vmatpush.msrb.mxu1 %v1502_v39 }
 0x125   : > { %1339 = vst.sshfl [vmem:[#allocation1] sm:$0xff pattern:$0x73625140] %v4376_v49  ;;  %v1496_v3 = vld [vmem:[#allocation6 + $0x618] sm:$0xff]  ;;  %v1667_v39 = vld [vmem:[#allocation6 + $0x7a8] sm:$0xff] }
 0x126   : > { %1380 = vst [vmem:[#allocation1] ss:$4 sm:$0xff] %v1319_v28  ;;  %1569 = vmatpush.msrb.mxu0 %v1505_v27  ;;  %v4578_v28 = vpop.f32.mrf.mxu0  ;;  %1604 = vmatpush.msrb.mxu1 %v1500_v40  ;;  %v1493_v27 = vld [vmem:[#allocation6 + $0x600] sm:$0xff]  ;;  %v1660_v40 = vld [vmem:[#allocation6 + $0x770] sm:$0xff] }
 0x127   : > { %1392 = vst [vmem:[#allocation1 + $0x22] ss:$4 sm:$0xff] %v1332_v12  ;;  %v1674_v12 = vld [vmem:[#allocation6 + $0x7e0] sm:$0xff] }
 0x128   : > { %1394 = vst [vmem:[#allocation1 + $0x23] ss:$4 sm:$0xff] %v1333_v50  ;;  %1570 = vmatpush.msrb.mxu0 %v1503_v6  ;;  %v1498_v50 = vld [vmem:[#allocation6 + $0x628] sm:$0xff]  ;;  %1714 = vmatpush.msrb.mxu2 %v1674_v12  ;;  %v1658_v12 = vld [vmem:[#allocation6 + $0x760] sm:$0xff] }
 0x129   : > { %1605 = vmatpush.msrb.mxu1 %v1498_v50  ;;  %v1657_v50 = vld [vmem:[#allocation6 + $0x758] sm:$0xff] }
 0x12a   : > { %1571 = vmatpush.msrb.mxu0 %v1501_v4  ;;  %1715 = vmatpush.msrb.mxu2 %v1672_v41  ;;  %v1652_v41 = vld [vmem:[#allocation6 + $0x730] sm:$0xff] }
 0x12b   : > { %1606 = vmatpush.msrb.mxu1 %v1496_v3  ;;  %v1653_v3 = vld [vmem:[#allocation6 + $0x738] sm:$0xff] }
 0x12c   : > { %v1340_v11 = vld [vmem:[#allocation1 + $0x1] ss:$4 sm:$0xff]  ;;  %v1341_v35 = vld [vmem:[#allocation1 + $0x2] ss:$4 sm:$0xff]  ;;  %v1342_v26 = vld [vmem:[#allocation1 + $0x3] ss:$4 sm:$0xff]  ;;  %1572 = vmatpush.msrb.mxu0 %v1499_v5  ;;  %1716 = vmatpush.msrb.mxu2 %v1670_v8  ;;  %v4596_v5 = vpop.f32.mrf.mxu2 }
 0x12d   : > { %1382 = vst [vmem:[#allocation1 + $0x1] ss:$4 sm:$0xff] %v1321_v17  ;;  %v1497_v17 = vld [vmem:[#allocation6 + $0x620] sm:$0xff]  ;;  %1607 = vmatpush.msrb.mxu1 %v1494_v25 }
 0x12e   : > { %1384 = vst [vmem:[#allocation1 + $0x2] ss:$4 sm:$0xff] %v1323_v19  ;;  %v1675_v19 = vld [vmem:[#allocation6 + $0x7e8] sm:$0xff]  ;;  %1573 = vmatpush.msrb.mxu0 %v1497_v17  ;;  %v4584_v14 = vpop.f32.mrf.mxu0  ;;  %v1656_v17 = vld [vmem:[#allocation6 + $0x750] sm:$0xff]  ;;  %v1650_v8 = vld [vmem:[#allocation6 + $0x720] sm:$0xff] }
 0x12f   : > { %1386 = vst [vmem:[#allocation1 + $0x3] ss:$4 sm:$0xff] %v4537_v13  ;;  %v4581_v63 = vld.sshfl [vmem:[#allocation1 + $0x20] sm:$0xff pattern:$0x73625140]  ;;  %1746 = vmatpush.msrb.mxu3 %v1675_v19  ;;  %v1495_v13 = vld [vmem:[#allocation6 + $0x610] sm:$0xff] }
 0x130   : > { %1401 = vst [vmem:[#allocation1 + $0x20] ss:$4 sm:$0xff] %v1340_v11  ;;  %1574 = vmatpush.msrb.mxu0 %v1495_v13  ;;  %v1671_v11 = vld [vmem:[#allocation6 + $0x7c8] sm:$0xff]  ;;  %v1654_v19 = vld [vmem:[#allocation6 + $0x740] sm:$0xff] }
 0x131   : > { %1402 = vst [vmem:[#allocation1 + $0x21] ss:$4 sm:$0xff] %v1341_v35  ;;  %1747 = vmatpush.msrb.mxu3 %v1673_v54  ;;  %v1669_v35 = vld [vmem:[#allocation6 + $0x7b8] sm:$0xff] }
 0x132   : > { %1403 = vst [vmem:[#allocation1 + $0x22] ss:$4 sm:$0xff] %v1342_v26  ;;  %1575 = vmatpush.msrb.mxu0 %v1493_v27  ;;  %v1666_v26 = vld [vmem:[#allocation6 + $0x7a0] sm:$0xff]  ;;  %v4614_v54 = vld [vmem:[%s4251_s26 + $0x38] sm:$0xff]  ;;  %s3977_s26 = scalar_lea.hbm %s5267_s10, 256 }
 0x133   : > { %1404 = vst [vmem:[#allocation1 + $0x23] ss:$4 sm:$0xff] %v4561_v51  ;;  %1748 = vmatpush.msrb.mxu3 %v1671_v11  ;;  %v1668_v51 = vld [vmem:[#allocation6 + $0x7b0] sm:$0xff]  ;;  %v1646_v11 = vld [vmem:[#allocation6 + $0x700] sm:$0xff] }
 0x134   : > { %1717 = vmatpush.msrb.mxu2 %v1668_v51  ;;  %v1647_v51 = vld [vmem:[#allocation6 + $0x708] sm:$0xff] }
 0x135   : > { %1749 = vmatpush.msrb.mxu3 %v1669_v35 }
 0x136   : > { %v1395_v6 = vld.sshfl [vmem:[#allocation1] sm:$0xff pattern:$0x73625140]  ;;  %1718 = vmatpush.msrb.mxu2 %v1666_v26 }
 0x137   : > { %1397 = vst [vmem:[#allocation1] ss:$4 sm:$0xff] %v4575_v1  ;;  %1431 = vmatmul.f32.vlgmr.msra.gmra.mxu2 %v1395_v6  ;;  %1463 = vmatmul.f32.vlgmr.msra.gmra.mxu3 %v1395_v6  ;;  %v1664_v1 = vld [vmem:[#allocation6 + $0x790] sm:$0xff]  ;;  %v1649_v6 = vld [vmem:[#allocation6 + $0x718] sm:$0xff] }
 0x138   : > { %1398 = vst [vmem:[#allocation1 + $0x1] ss:$4 sm:$0xff] %v4553_v30  ;;  %1750 = vmatpush.msrb.mxu3 %v1667_v39  ;;  %v1665_v30 = vld [vmem:[#allocation6 + $0x798] sm:$0xff]  ;;  %1719 = vmatpush.msrb.mxu2 %v1664_v1  ;;  %v3555_v39 = vrot.slane %v4614_v54, 9 }
 0x139   : > { %1399 = vst [vmem:[#allocation1 + $0x2] ss:$4 sm:$0xff] %v4555_v34  ;;  %v1662_v34 = vld [vmem:[#allocation6 + $0x780] sm:$0xff] }
 0x13a   : > { %1400 = vst [vmem:[#allocation1 + $0x3] ss:$4 sm:$0xff] %v4558_v36  ;;  %v4590_v4 = vld.sshfl [vmem:[#allocation1 + $0x20] sm:$0xff pattern:$0x73625140]  ;;  %v4598_v36 = vpop.f32.mrf.mxu1  ;;  %1751 = vmatpush.msrb.mxu3 %v1665_v30  ;;  %1720 = vmatpush.msrb.mxu2 %v1662_v34  ;;  %v1848_v30 = vld [vmem:[#allocation6 + $0x8f0] sm:$0xff] }
 0x13b   : > { %1533 = vst [vmem:[#allocation1 + $0x20] ss:$4 sm:$0xff] %v4357_v23  ;;  %v1663_v23 = vld [vmem:[#allocation6 + $0x788] sm:$0xff]  ;;  %v1849_v34 = vld [vmem:[#allocation6 + $0x8f8] sm:$0xff]  ;;  %1885 = vmatpush.msra.mxu0 %v1848_v30  ;;  %v1832_v30 = vld [vmem:[#allocation6 + $0x870] sm:$0xff] }
 0x13c   : > { %1535 = vst [vmem:[#allocation1 + $0x21] ss:$4 sm:$0xff] %v4360_v24  ;;  %v4602_v24 = vpop.f32.mrf.mxu0  ;;  %1752 = vmatpush.msrb.mxu3 %v1663_v23  ;;  %1721 = vmatpush.msrb.mxu2 %v1660_v40  ;;  %v1846_v40 = vld [vmem:[#allocation6 + $0x8e0] sm:$0xff] }
 0x13d   : > { %1537 = vst [vmem:[#allocation1 + $0x22] ss:$4 sm:$0xff] %v4399_v9  ;;  %1917 = vmatpush.msra.mxu1 %v1849_v34  ;;  %1886 = vmatpush.msra.mxu0 %v1846_v40  ;;  %v1833_v34 = vld [vmem:[#allocation6 + $0x878] sm:$0xff] }
 0x13e   : > { %1539 = vst [vmem:[#allocation1 + $0x23] ss:$4 sm:$0xff] %v4403_v15  ;;  %v1659_v15 = vld [vmem:[#allocation6 + $0x768] sm:$0xff]  ;;  %1753 = vmatpush.msrb.mxu3 %v1661_v0  ;;  %1722 = vmatpush.msrb.mxu2 %v1658_v12 }
 0x13f   : > { %1434 = vmatmul.f32.gmra.mxu2 %v4581_v63  ;;  %1466 = vmatmul.f32.gmra.mxu3 %v4581_v63 }
 0x140   : > { %1754 = vmatpush.msrb.mxu3 %v1659_v15  ;;  %1723 = vmatpush.msrb.mxu2 %v1656_v17  ;;  %v1844_v15 = vld [vmem:[#allocation6 + $0x8d0] sm:$0xff]  ;;  %v1845_v17 = vld [vmem:[#allocation6 + $0x8d8] sm:$0xff] }
 0x141   : > { %v1405_v44 = vld.sshfl [vmem:[#allocation1] sm:$0xff pattern:$0x73625140]  ;;  %1887 = vmatpush.msra.mxu0 %v1844_v15 }
 0x142   : > { %1407 = vst [vmem:[#allocation1] ss:$4 sm:$0xff] %v4569_v48  ;;  %v1655_v48 = vld [vmem:[#allocation6 + $0x748] sm:$0xff]  ;;  %1755 = vmatpush.msrb.mxu3 %v1657_v50  ;;  %1724 = vmatpush.msrb.mxu2 %v1654_v19  ;;  %v4616_v13 = vpop.f32.mrf.mxu1  ;;  %v1842_v50 = vld [vmem:[#allocation6 + $0x8c0] sm:$0xff] }
 0x143   : > { %1408 = vst [vmem:[#allocation1 + $0x1] ss:$4 sm:$0xff] %v4571_v45  ;;  %v4611_v45 = vpop.f32.mrf.mxu2  ;;  %v1843_v19 = vld [vmem:[#allocation6 + $0x8c8] sm:$0xff]  ;;  %1888 = vmatpush.msra.mxu0 %v1842_v50 }
 0x144   : > { %v4619_v25 = vpop.f32.mrf.mxu0  ;;  %1756 = vmatpush.msrb.mxu3 %v1655_v48  ;;  %1725 = vmatpush.msrb.mxu2 %v1652_v41  ;;  %v1840_v48 = vld [vmem:[#allocation6 + $0x8b0] sm:$0xff]  ;;  %v1841_v41 = vld [vmem:[#allocation6 + $0x8b8] sm:$0xff] }
 0x145   : > { %v4606_v63 = vld.sshfl [vmem:[#allocation1 + $0x20] sm:$0xff pattern:$0x73625140]  ;;  %1889 = vmatpush.msra.mxu0 %v1840_v48 }
 0x146   : > { %1546 = vst [vmem:[#allocation1 + $0x20] ss:$4 sm:$0xff] %v4494_v32  ;;  %1757 = vmatpush.msrb.mxu3 %v1653_v3  ;;  %1726 = vmatpush.msrb.mxu2 %v1650_v8  ;;  %v1839_v3 = vld [vmem:[#allocation6 + $0x8a8] sm:$0xff] }
 0x147   : > { %1437 = vmatmul.f32.gmra.mxu2 %v1405_v44  ;;  %1469 = vmatmul.f32.gmra.mxu3 %v1405_v44  ;;  %1547 = vst [vmem:[#allocation1 + $0x21] ss:$4 sm:$0xff] %v4506_v2  ;;  %v1651_v2 = vld [vmem:[#allocation6 + $0x728] sm:$0xff] }
 0x148   : > { %1548 = vst [vmem:[#allocation1 + $0x22] ss:$4 sm:$0xff] %v4510_v31  ;;  %v1648_v31 = vld [vmem:[#allocation6 + $0x710] sm:$0xff]  ;;  %1758 = vmatpush.msrb.mxu3 %v1651_v2  ;;  %v1837_v2 = vld [vmem:[#allocation6 + $0x898] sm:$0xff] }
 0x149   : > { %1549 = vst [vmem:[#allocation1 + $0x23] ss:$4 sm:$0xff] %v4614_v54  ;;  %1727 = vmatpush.msrb.mxu2 %v1648_v31 }
 0x14a   : > { %v1409_v27 = vld.sshfl [vmem:[#allocation1] sm:$0xff pattern:$0x73625140]  ;;  %1759 = vmatpush.msrb.mxu3 %v1649_v6 }
 0x14b   : > { %1525 = vst [vmem:[#allocation1] ss:$4 sm:$0xff] %v4311_v52  ;;  %1728 = vmatpush.msrb.mxu2 %v1646_v11 }
 0x14c   : > { %1527 = vst [vmem:[#allocation1 + $0x1] ss:$4 sm:$0xff] %v4319_v56  ;;  %v4630_v56 = vpop.f32.mrf.mxu2  ;;  %1760 = vmatpush.msrb.mxu3 %v1647_v51  ;;  %v4636_v26 = vpop.f32.mrf.mxu0  ;;  %v1834_v51 = vld [vmem:[#allocation6 + $0x880] sm:$0xff] }
 0x14d   : > { %1529 = vst [vmem:[#allocation1 + $0x2] ss:$4 sm:$0xff] %v4322_v57  ;;  %v4633_v57 = vpop.f32.mrf.mxu1 }
 0x14e   : > { %1531 = vst [vmem:[#allocation1 + $0x3] ss:$4 sm:$0xff] %v4353_v21 }
 0x14f   : > { %1440 = vmatmul.f32.gmra.mxu2 %v4590_v4  ;;  %1472 = vmatmul.f32.gmra.mxu3 %v4590_v4 }
 0x150   : > { %v4627_v35 = vld.sshfl [vmem:[#allocation1 + $0x20] sm:$0xff pattern:$0x73625140] }
 0x151   : > { %1686 = vst [vmem:[#allocation1 + $0x20] ss:$4 sm:$0xff] %v4387_v59  ;;  %v1490_v59 = vrot.slane %v4614_v54, 2 }
 0x152   : > { %1688 = vst [vmem:[#allocation1 + $0x21] ss:$4 sm:$0xff] %v4391_v60 }
 0x153   : > { %1690 = vst [vmem:[#allocation1 + $0x22] ss:$4 sm:$0xff] %v4427_v43  ;;  %v4654_v1 = vrot.slane %v1490_v59, 7 }
 0x154   : > { %1692 = vst [vmem:[#allocation1 + $0x23] ss:$4 sm:$0xff] %v4433_v58  ;;  %v4646_v43 = vpop.f32.mrf.mxu2 }
 0x155   : > { %v1540_v4 = vld.sshfl [vmem:[#allocation1] sm:$0xff pattern:$0x73625140]  ;;  %v4649_v58 = vpop.f32.mrf.mxu1 }
 0x156   : > { %1576 = vmatmul.f32.vlgmr.msrb.gmra.mxu0 %v1540_v4  ;;  %1542 = vst [vmem:[#allocation1] ss:$4 sm:$0xff] %v4406_v16  ;;  %1608 = vmatmul.f32.vlgmr.msrb.gmra.mxu1 %v1540_v4  ;;  %v1491_v16 = vrot.slane %v4614_v54, 4 }
 0x157   : > { %1543 = vst [vmem:[#allocation1 + $0x1] ss:$4 sm:$0xff] %v4376_v49  ;;  %1443 = vmatmul.f32.gmra.mxu2 %v1409_v27  ;;  %1475 = vmatmul.f32.gmra.mxu3 %v1409_v27 }
 0x158   : > { %1544 = vst [vmem:[#allocation1 + $0x2] ss:$4 sm:$0xff] %v4380_v53  ;;  %v4658_v53 = vpop.f32.mrf.mxu0 }
 0x159   : > { %1545 = vst [vmem:[#allocation1 + $0x3] ss:$4 sm:$0xff] %v4383_v55  ;;  %v1638_v55 = vsel %vm4297_vm6, %v3555_v39, %v4654_v1 }
 0x15b   : > { %v4644_v60 = vld.sshfl [vmem:[#allocation1 + $0x20] sm:$0xff pattern:$0x73625140] }
 0x15c   : > { %1699 = vst [vmem:[#allocation1 + $0x20] ss:$4 sm:$0xff] %v4523_v47  ;;  %v4668_v23 = vpop.f32.mrf.mxu2 }
 0x15d   : > { %1700 = vst [vmem:[#allocation1 + $0x21] ss:$4 sm:$0xff] %v4546_v22  ;;  %v4666_v22 = vpop.f32.mrf.mxu3  ;;  %v4670_v44 = vpop.f32.mrf.mxu1 }
 0x15e   : > { %1579 = vmatmul.f32.gmra.mxu0 %v4606_v63  ;;  %1611 = vmatmul.f32.gmra.mxu1 %v4606_v63  ;;  %1701 = vst [vmem:[#allocation1 + $0x22] ss:$4 sm:$0xff] %v4550_v7  ;;  %v1847_v7 = vld [vmem:[#allocation6 + $0x8e8] sm:$0xff] }
 0x15f   : > { %1702 = vst [vmem:[#allocation1 + $0x23] ss:$4 sm:$0xff] %v1638_v55  ;;  %1918 = vmatpush.msra.mxu1 %v1847_v7 }
 0x160   : > { %v1550_v47 = vld.sshfl [vmem:[#allocation1] sm:$0xff pattern:$0x73625140]  ;;  %v4674_v12 = vpop.f32.mrf.mxu0 }
 0x161   : > { %1553 = vst [vmem:[#allocation1 + $0x1] ss:$4 sm:$0xff] %v1491_v16  ;;  %1919 = vmatpush.msra.mxu1 %v1845_v17  ;;  %v1828_v17 = vld [vmem:[#allocation6 + $0x850] sm:$0xff] }
 0x162   : > { %1552 = vst [vmem:[#allocation1] ss:$4 sm:$0xff] %v1490_v59 }
 0x163   : > { %1920 = vmatpush.msra.mxu1 %v1843_v19  ;;  %v1827_v19 = vld [vmem:[#allocation6 + $0x848] sm:$0xff] }
 0x165   : > { %1921 = vmatpush.msra.mxu1 %v1841_v41  ;;  %v4690_v31 = vpop.f32.mrf.mxu1  ;;  %v1824_v41 = vld [vmem:[#allocation6 + $0x830] sm:$0xff] }
 0x166   : > { %1582 = vmatmul.f32.gmra.mxu0 %v1550_v47  ;;  %1614 = vmatmul.f32.gmra.mxu1 %v1550_v47  ;;  %v4672_v0 = vld.sshfl [vmem:[#allocation1 + $0x20] sm:$0xff pattern:$0x73625140] }
 0x167   : > { %1794 = vst.sshfl [vmem:[#allocation1 + $0x20] sm:$0xff pattern:$0x73625140] %v4353_v21  ;;  %v4681_v21 = vpop.f32.mrf.mxu3  ;;  %1922 = vmatpush.msra.mxu1 %v1839_v3 }
 0x168   : > { %v4692_v6 = vpop.f32.mrf.mxu0 }
 0x169   : > { %v1554_v63 = vld.sshfl [vmem:[#allocation1] sm:$0xff pattern:$0x73625140]  ;;  %1923 = vmatpush.msra.mxu1 %v1837_v2  ;;  %v1822_v2 = vld [vmem:[#allocation6 + $0x820] sm:$0xff] }
 0x16a   : > { %1678 = vst [vmem:[#allocation1] ss:$4 sm:$0xff] %v4342_v10  ;;  %v1838_v10 = vld [vmem:[#allocation6 + $0x8a0] sm:$0xff] }
 0x16b   : > { %1680 = vst [vmem:[#allocation1 + $0x1] ss:$4 sm:$0xff] %v4349_v18  ;;  %1890 = vmatpush.msra.mxu0 %v1838_v10  ;;  %v1825_v10 = vld [vmem:[#allocation6 + $0x838] sm:$0xff] }
 0x16c   : > { %1682 = vst [vmem:[#allocation1 + $0x2] ss:$4 sm:$0xff] %v4365_v33  ;;  %v4687_v33 = vpop.f32.mrf.mxu2 }
 0x16d   : > { %1684 = vst [vmem:[#allocation1 + $0x3] ss:$4 sm:$0xff] %v4372_v46  ;;  %v1836_v46 = vld [vmem:[#allocation6 + $0x890] sm:$0xff]  ;;  %v4713_v47 = vpop.f32.mrf.mxu1 }
 0x16e   : > { %1585 = vmatmul.f32.gmra.mxu0 %v4627_v35  ;;  %1617 = vmatmul.f32.gmra.mxu1 %v4627_v35  ;;  %v4685_v8 = vld [vmem:[#allocation1 + $0x21] ss:$4 sm:$0xff]  ;;  %v1798_v18 = vld [vmem:[#allocation1 + $0x22] ss:$4 sm:$0xff]  ;;  %v1800_v27 = vld [vmem:[#allocation1 + $0x23] ss:$4 sm:$0xff] }
 0x16f   : > { %1805 = vst.sshfl [vmem:[#allocation1 + $0x20] sm:$0xff pattern:$0x73625140] %v4376_v49  ;;  %1891 = vmatpush.msra.mxu0 %v1836_v46  ;;  %v1835_v35 = vld [vmem:[#allocation6 + $0x888] sm:$0xff]  ;;  %v1640_v49 = vrot.slane %v1491_v16, 7  ;;  %v4703_v39 = vpop.f32.mrf.mxu3  ;;  %v3556_v16 = vrot.slane %v4614_v54, 13 }
 0x170   : > { %1924 = vmatpush.msra.mxu1 %v1835_v35 }
 0x171   : > { %1892 = vmatpush.msra.mxu0 %v1834_v51  ;;  %v1642_v55 = vrot.slane %v1640_v49, 2  ;;  %v1820_v51 = vld [vmem:[#allocation6 + $0x810] sm:$0xff] }
 0x172   : > { %1925 = vmatpush.msra.mxu1 %v1833_v34 }
 0x173   : > { %1893 = vmatpush.msra.mxu0 %v1832_v30  ;;  %v1644_v7 = vsel %vm4297_vm6, %v1642_v55, %v3556_v16 }
 0x174   : > { %v1693_v11 = vld.sshfl [vmem:[#allocation1] sm:$0xff pattern:$0x73625140] }
 0x175   : > { %1729 = vmatmul.f32.vlgmr.msrb.gmra.mxu2 %v1693_v11  ;;  %1695 = vst [vmem:[#allocation1] ss:$4 sm:$0xff] %v4437_v61  ;;  %1761 = vmatmul.f32.vlgmr.msrb.gmra.mxu3 %v1693_v11  ;;  %v4731_v46 = vpop.f32.mrf.mxu1  ;;  %v1823_v11 = vld [vmem:[#allocation6 + $0x828] sm:$0xff] }
 0x176   : > { %1696 = vst [vmem:[#allocation1 + $0x1] ss:$4 sm:$0xff] %v4411_v20  ;;  %1588 = vmatmul.f32.gmra.mxu0 %v1554_v63  ;;  %1620 = vmatmul.f32.gmra.mxu1 %v1554_v63  ;;  %v4699_v4 = vld [vmem:[#allocation1 + $0x21] ss:$4 sm:$0xff]  ;;  %v4701_v59 = vld [vmem:[#allocation1 + $0x22] ss:$4 sm:$0xff] }
 0x177   : > { %1697 = vst [vmem:[#allocation1 + $0x2] ss:$4 sm:$0xff] %v4419_v37  ;;  %v4706_v61 = vld [vmem:[#allocation1 + $0x23] ss:$4 sm:$0xff]  ;;  %v1639_v20 = vrot.slane %v4654_v1, 2  ;;  %v4711_v37 = vpop.f32.mrf.mxu2  ;;  %v4725_v48 = vpop.f32.mrf.mxu3 }
 0x178   : > { %1698 = vst [vmem:[#allocation1 + $0x3] ss:$4 sm:$0xff] %v4423_v42  ;;  %v1830_v1 = vld [vmem:[#allocation6 + $0x860] sm:$0xff]  ;;  %v1829_v63 = vld [vmem:[#allocation6 + $0x858] sm:$0xff] }
 0x179   : > { %1813 = vst.sshfl [vmem:[#allocation1 + $0x20] sm:$0xff pattern:$0x73625140] %v4614_v54  ;;  %v1641_v42 = vsel %vm4297_vm6, %v1639_v20, %v1640_v49  ;;  %v1831_v54 = vld [vmem:[#allocation6 + $0x868] sm:$0xff]  ;;  %1894 = vmatpush.msra.mxu0 %v1830_v1  ;;  %v1818_v49 = vld [vmem:[#allocation6 + $0x800] sm:$0xff] }
 0x17a   : > { %1858 = vst [vmem:[#allocation1 + $0x20] ss:$4 sm:$0xff] %v1798_v18  ;;  %1926 = vmatpush.msra.mxu1 %v1831_v54  ;;  %v1819_v20 = vld [vmem:[#allocation6 + $0x808] sm:$0xff] }
 0x17b   : > { %1895 = vmatpush.msra.mxu0 %v1828_v17 }
 0x17c   : > { %1927 = vmatpush.msra.mxu1 %v1829_v63 }
 0x17d   : > { %1732 = vmatmul.f32.gmra.mxu2 %v4644_v60  ;;  %1764 = vmatmul.f32.gmra.mxu3 %v4644_v60  ;;  %v1826_v60 = vld [vmem:[#allocation6 + $0x840] sm:$0xff]  ;;  %v4742_v34 = vpop.f32.mrf.mxu1 }
 0x17e   : > { %v4715_v40 = vpop.f32.mrf.mxu0  ;;  %1896 = vmatpush.msra.mxu0 %v1826_v60  ;;  %1928 = vmatpush.msra.mxu1 %v1827_v19 }
 0x17f   : > { %v1703_v15 = vld.sshfl [vmem:[#allocation1] sm:$0xff pattern:$0x73625140]  ;;  %v4727_v3 = vpop.f32.mrf.mxu2  ;;  %v4734_v55 = vpop.f32.mrf.mxu3 }
 0x180   : > { %1705 = vst [vmem:[#allocation1] ss:$4 sm:$0xff] %v1641_v42  ;;  %v4723_v50 = vld [vmem:[#allocation1 + $0x21] ss:$4 sm:$0xff]  ;;  %1897 = vmatpush.msra.mxu0 %v1824_v41  ;;  %1929 = vmatpush.msra.mxu1 %v1825_v10  ;;  %v1815_v63 = vld [vmem:[#allocation1 + $0x22] ss:$4 sm:$0xff] }
 0x181   : > { %1706 = vst [vmem:[#allocation1 + $0x1] ss:$4 sm:$0xff] %v1644_v7  ;;  %v4056_v7 = vmov 0   ;;  %v1816_v10 = vld [vmem:[#allocation1 + $0x23] ss:$4 sm:$0xff] }
 0x182   : > { %1860 = vst [vmem:[#allocation1 + $0x21] ss:$4 sm:$0xff] %v1800_v27  ;;  %1898 = vmatpush.msra.mxu0 %v1822_v2  ;;  %1930 = vmatpush.msra.mxu1 %v1823_v11  ;;  %v1821_v27 = vld [vmem:[#allocation6 + $0x818] sm:$0xff]  ;;  %v1986_v11 = vld [vmem:[%s5264_s7 + $0x8] sm:$0xff] }
 0x183   : > { %3726 = vset.pattern.permute.xlu0 %v4056_v7  ;;  %3727 = vset.pattern.permute.xlu1 %v4056_v7 }
 0x184   : > { %1899 = vmatpush.msra.mxu0 %v1820_v51  ;;  %1931 = vmatpush.msra.mxu1 %v1821_v27 }
 0x185   : > { %1735 = vmatmul.f32.gmra.mxu2 %v1703_v15  ;;  %1767 = vmatmul.f32.gmra.mxu3 %v1703_v15  ;;  %v1985_v15 = vld [vmem:[%s5264_s7] sm:$0xff]  ;;  %v4755_v41 = vpop.f32.mrf.mxu1 }
 0x186   : > { %v4729_v18 = vpop.f32.mrf.mxu0  ;;  %1900 = vmatpush.msra.mxu0 %v1818_v49  ;;  %1932 = vmatpush.msra.mxu1 %v1819_v20 }
 0x187   : > { %v4740_v30 = vpop.f32.mrf.mxu2  ;;  %1992 = vperm.xlu0 %3726, %v1985_v15   ;;  %3728 = vset.pattern.permute.xlu2 %v4056_v7  ;;  %v4752_v17 = vpop.f32.mrf.mxu3 }
 0x188   : > { %v1707_v35 = vld.sshfl [vmem:[#allocation1] sm:$0xff pattern:$0x73625140] }
 0x189   : > { %1787 = vst.sshfl [vmem:[#allocation1] sm:$0xff pattern:$0x73625140] %v4311_v52  ;;  %v813_v52 = vadd.f32 %v4668_v23, %v4602_v24 }
 0x18d   : > { %1738 = vmatmul.f32.gmra.mxu2 %v4672_v0  ;;  %1770 = vmatmul.f32.gmra.mxu3 %v4672_v0 }
 0x18e   : > { %v4736_v16 = vpop.f32.mrf.mxu0 }
 0x18f   : > { %v1119_v19 = vpop.f32.mrf.mxu2  ;;  %1997 = vperm.xlu0 %3726, %v1986_v11   ;;  %v4763_v27 = vpop.f32.mrf.mxu3 }
 0x190   : > { %v1789_v42 = vld [vmem:[#allocation1 + $0x1] ss:$4 sm:$0xff]  ;;  %v1791_v1 = vld [vmem:[#allocation1 + $0x2] ss:$4 sm:$0xff]  ;;  %v1793_v54 = vld [vmem:[#allocation1 + $0x3] ss:$4 sm:$0xff] }
 0x191   : > { %1801 = vst.sshfl [vmem:[#allocation1] sm:$0xff pattern:$0x73625140] %v4399_v9  ;;  %v1017_v9 = vadd.f32 %v4692_v6, %v813_v52 }
 0x193   : > { %v1162_v2 = vadd.f32 %v1119_v19, %v1017_v9  ;;  %v810_v19 = vadd.f32 %v4646_v43, %v4584_v14 }
 0x195   : > { %1741 = vmatmul.f32.gmra.mxu2 %v1707_v35  ;;  %1773 = vmatmul.f32.gmra.mxu3 %v1707_v35  ;;  %v1015_v11 = vadd.f32 %v4674_v12, %v810_v19  ;;  %v2150_v19 = vld [vmem:[#allocation9 + $0x170] sm:$0xff] }
 0x196   : > { %v4750_v0 = vpop.f32.mrf.mxu0 }
 0x197   : > { %v4769_v7 = vpop.f32.mrf.mxu3 }
 0x198   : > { %v1802_v60 = vld [vmem:[#allocation1 + $0x1] ss:$4 sm:$0xff]  ;;  %v1803_v24 = vld [vmem:[#allocation1 + $0x2] ss:$4 sm:$0xff]  ;;  %v1804_v23 = vld [vmem:[#allocation1 + $0x3] ss:$4 sm:$0xff] }
 0x199   : > { %1809 = vst.sshfl [vmem:[#allocation1] sm:$0xff pattern:$0x73625140] %v4494_v32  ;;  %v4765_v32 = vpop.f32.mrf.mxu1 }
 0x19a   : > { %1850 = vst [vmem:[#allocation1] ss:$4 sm:$0xff] %v1789_v42 }
 0x19b   : > { %1862 = vst [vmem:[#allocation1 + $0x22] ss:$4 sm:$0xff] %v1802_v60 }
 0x19c   : > { %1864 = vst [vmem:[#allocation1 + $0x23] ss:$4 sm:$0xff] %v1803_v24 }
 0x19e   : > { %v1272_v51 = vpop.f32.mrf.mxu0 }
 0x19f   : > { %v4761_v6 = vadd.f32 %v1272_v51, %v1162_v2 }
 0x1a0   : > { %v1810_v35 = vld [vmem:[#allocation1 + $0x1] ss:$4 sm:$0xff]  ;;  %v1811_v49 = vld [vmem:[#allocation1 + $0x2] ss:$4 sm:$0xff]  ;;  %v1812_v20 = vld [vmem:[#allocation1 + $0x3] ss:$4 sm:$0xff] }
 0x1a1   : > { %1852 = vst [vmem:[#allocation1 + $0x1] ss:$4 sm:$0xff] %v1791_v1  ;;  %v1987_v1 = vld [vmem:[%s5264_s7 + $0x10] sm:$0xff] }
 0x1a2   : > { %1854 = vst [vmem:[#allocation1 + $0x2] ss:$4 sm:$0xff] %v1793_v54  ;;  %2002 = vperm.xlu1 %3727, %v1987_v1   ;;  %v1148_v54 = vpop.f32.mrf.mxu3 }
 0x1a3   : > { %1856 = vst [vmem:[#allocation1 + $0x3] ss:$4 sm:$0xff] %v4685_v8  ;;  %v1866_v42 = vld.sshfl [vmem:[#allocation1 + $0x20] sm:$0xff pattern:$0x73625140]  ;;  %v4776_v8 = vpop.f32.mrf.mxu1 }
 0x1a4   : > { %1871 = vst [vmem:[#allocation1 + $0x20] ss:$4 sm:$0xff] %v1810_v35  ;;  %v1160_v35 = vadd.f32 %v4740_v30, %v1015_v11  ;;  %v842_v30 = vadd.f32 %v4725_v48, %v4649_v58  ;;  %v2166_v11 = vld [vmem:[#allocation9 + $0x1f0] sm:$0xff]  ;;  %v2149_v48 = vld [vmem:[#allocation9 + $0x168] sm:$0xff] }
 0x1a5   : > { %1872 = vst [vmem:[#allocation1 + $0x21] ss:$4 sm:$0xff] %v1811_v49 }
 0x1a6   : > { %1873 = vst [vmem:[#allocation1 + $0x22] ss:$4 sm:$0xff] %v1812_v20  ;;  %v1313_v20 = vadd.f32 %v4750_v0, %v1160_v35  ;;  %v2167_v0 = vld [vmem:[#allocation9 + $0x1f8] sm:$0xff] }
 0x1a7   : > { %1874 = vst [vmem:[#allocation1 + $0x23] ss:$4 sm:$0xff] %v4723_v50  ;;  %v1988_v50 = vld [vmem:[%s5264_s7 + $0x18] sm:$0xff]  ;;  %2214 = vmatpush.msra.mxu3 %v2167_v0 }
 0x1a9   : > { %2215 = vmatpush.msra.mxu3 %v2166_v11 }
 0x1aa   : > { %v1865_v52 = vld.sshfl [vmem:[#allocation1] sm:$0xff pattern:$0x73625140]  ;;  %2007 = vperm.xlu1 %3727, %v1988_v50  }
 0x1ab   : > { %1867 = vst [vmem:[#allocation1] ss:$4 sm:$0xff] %v1804_v23  ;;  %1901 = vmatmul.f32.vlgmr.msra.gmra.mxu0 %v1865_v52  ;;  %1933 = vmatmul.f32.vlgmr.msra.gmra.mxu1 %v1865_v52  ;;  %v4782_v9 = vpop.f32.mrf.mxu1  ;;  %v1989_v23 = vld [vmem:[%s5264_s7 + $0x20] sm:$0xf] }
 0x1ac   : > { %1868 = vst [vmem:[#allocation1 + $0x1] ss:$4 sm:$0xff] %v4699_v4  ;;  %2012 = vperm.xlu2 %3728, %v1989_v23   ;;  %v2151_v23 = vld [vmem:[#allocation9 + $0x178] sm:$0xff]  ;;  %2216 = vmatpush.msra.mxu3 %v2165_v38  ;;  %v2145_v38 = vld [vmem:[#allocation9 + $0x148] sm:$0xff] }
 0x1ad   : > { %1869 = vst [vmem:[#allocation1 + $0x2] ss:$4 sm:$0xff] %v4701_v59  ;;  %v1151_v59 = vpop.f32.mrf.mxu3  ;;  %2191 = vmatpush.msra.mxu2 %v2151_v23  ;;  %v2164_v23 = vld [vmem:[#allocation9 + $0x1e0] sm:$0xff] }
 0x1ae   : > { %1870 = vst [vmem:[#allocation1 + $0x3] ss:$4 sm:$0xff] %v4706_v61  ;;  %v1876_v60 = vld.sshfl [vmem:[#allocation1 + $0x20] sm:$0xff pattern:$0x73625140]  ;;  %2217 = vmatpush.msra.mxu3 %v2164_v23  ;;  %v2141_v23 = vld [vmem:[#allocation9 + $0x128] sm:$0xff] }
 0x1af   : > { %2192 = vmatpush.msra.mxu2 %v2150_v19  ;;  %v2163_v19 = vld [vmem:[#allocation9 + $0x1d8] sm:$0xff] }
 0x1b0   : > { %2218 = vmatpush.msra.mxu3 %v2163_v19  ;;  %v2320_v19 = vld [vmem:[#allocation9 + $0x268] sm:$0xff] }
 0x1b1   : > { %2193 = vmatpush.msra.mxu2 %v2149_v48  ;;  %v2322_v48 = vld [vmem:[#allocation9 + $0x278] sm:$0xff] }
 0x1b2   : > { %2362 = vmatpush.msrb.mxu0 %v2322_v48  ;;  %v2090_v48 = vld [vmem:[#allocation9 + $0x78] sm:$0xff] }
 0x1b3   : > { %1904 = vmatmul.f32.gmra.mxu0 %v1866_v42  ;;  %1936 = vmatmul.f32.gmra.mxu1 %v1866_v42  ;;  %v1301_v61 = vpop.f32.mrf.mxu1 }
 0x1b5   : > { %v1875_v15 = vld.sshfl [vmem:[#allocation1] sm:$0xff pattern:$0x73625140] }
 0x1b6   : > { %1877 = vst [vmem:[#allocation1] ss:$4 sm:$0xff] %v1815_v63 }
 0x1b7   : > { %1878 = vst [vmem:[#allocation1 + $0x1] ss:$4 sm:$0xff] %v1816_v10 }
 0x1ba   : > { %v4784_v4 = vpop.f32.mrf.mxu2  ;;  %v4791_v63 = vpop.f32.mrf.mxu3 }
 0x1bb   : > { %1907 = vmatmul.f32.gmra.mxu0 %v1875_v15  ;;  %1939 = vmatmul.f32.gmra.mxu1 %v1875_v15  ;;  %v1304_v51 = vpop.f32.mrf.mxu1 }
 0x1be   : > { %v1879_v10 = vld.sshfl [vmem:[#allocation1] sm:$0xff pattern:$0x73625140] }
 0x1c2   : > { %v4786_v24 = vpop.f32.mrf.mxu2  ;;  %v4799_v49 = vpop.f32.mrf.mxu3 }
 0x1c3   : > { %1910 = vmatmul.f32.gmra.mxu0 %v1876_v60  ;;  %1942 = vmatmul.f32.gmra.mxu1 %v1876_v60 }
 0x1ca   : > { %v4795_v2 = vpop.f32.mrf.mxu2  ;;  %v4806_v43 = vpop.f32.mrf.mxu3 }
 0x1cb   : > { %5291 = vst [vmem:[#allocation25_spill] sm:$0xff] %v4795_v2  ;;  %1913 = vmatmul.f32.gmra.mxu0 %v1879_v10  ;;  %1945 = vmatmul.f32.gmra.mxu1 %v1879_v10  ;;  %v1016_v10 = vadd.f32 %v4742_v34, %v842_v30 }
 0x1cc   : > { %5292 = vst [vmem:[#allocation26_spill] sm:$0xff] %v4806_v43  ;;  %v2148_v43 = vld [vmem:[#allocation9 + $0x160] sm:$0xff] }
 0x1cd   : > { %2194 = vmatpush.msra.mxu2 %v2148_v43  ;;  %v2143_v43 = vld [vmem:[#allocation9 + $0x138] sm:$0xff] }
 0x1d2   : > { %v1441_v42 = vpop.f32.mrf.mxu2 }
 0x1d3   : > { %v4802_v52 = vpop.f32.mrf.mxu0  ;;  %v4804_v1 = vpop.f32.mrf.mxu1  ;;  %v1485_v14 = vadd.f32 %v1441_v42, %v1313_v20 }
 0x1d4   : > { %v1473_v42 = vpop.f32.mrf.mxu3 }
 0x1da   : > { %v1444_v50 = vpop.f32.mrf.mxu2 }
 0x1db   : > { %v4808_v15 = vpop.f32.mrf.mxu0  ;;  %v4810_v12 = vpop.f32.mrf.mxu1  ;;  %v1487_v60 = vadd.f32 %v1444_v50, %v4761_v6  ;;  %v845_v6 = vadd.f32 %v4734_v55, %v4670_v44  ;;  %v1161_v50 = vadd.f32 %v1148_v54, %v1016_v10  ;;  %v2146_v44 = vld [vmem:[#allocation9 + $0x150] sm:$0xff]  ;;  %v2161_v10 = vld [vmem:[#allocation9 + $0x1c8] sm:$0xff] }
 0x1dc   : > { %v2162_v55 = vld [vmem:[#allocation9 + $0x1d0] sm:$0xff] }
 0x1dd   : > { %v1314_v58 = vadd.f32 %v1301_v61, %v1161_v50  ;;  %v1018_v34 = vadd.f32 %v4755_v41, %v845_v6  ;;  %v1476_v41 = vpop.f32.mrf.mxu3  ;;  %2219 = vmatpush.msra.mxu3 %v2162_v55  ;;  %v2319_v55 = vld [vmem:[#allocation9 + $0x260] sm:$0xff] }
 0x1df   : > { %v1486_v30 = vadd.f32 %v1473_v42, %v1314_v58  ;;  %v1163_v54 = vadd.f32 %v1151_v59, %v1018_v34  ;;  %v2144_v42 = vld [vmem:[#allocation9 + $0x140] sm:$0xff]  ;;  %2220 = vmatpush.msra.mxu3 %v2161_v10  ;;  %v2159_v58 = vld [vmem:[#allocation9 + $0x1b8] sm:$0xff]  ;;  %v2158_v34 = vld [vmem:[#allocation9 + $0x1b0] sm:$0xff] }
 0x1e0   : > { %v2154_v10 = vld [vmem:[#allocation9 + $0x190] sm:$0xff] }
 0x1e1   : > { %v1316_v61 = vadd.f32 %v1304_v51, %v1163_v54  ;;  %v2321_v51 = vld [vmem:[#allocation9 + $0x270] sm:$0xff]  ;;  %v2139_v54 = vld [vmem:[#allocation9 + $0x118] sm:$0xff] }
 0x1e2   : > { %2363 = vmatpush.msrb.mxu0 %v2321_v51  ;;  %v2106_v51 = vld [vmem:[#allocation9 + $0xf8] sm:$0xff] }
 0x1e3   : > { %v4816_v35 = vpop.f32.mrf.mxu0  ;;  %v4818_v20 = vpop.f32.mrf.mxu1  ;;  %v1488_v6 = vadd.f32 %v1476_v41, %v1316_v61  ;;  %v2155_v41 = vld [vmem:[#allocation9 + $0x198] sm:$0xff] }
 0x1e4   : > { %5293 = vst [vmem:[#allocation27_spill] sm:$0xff] %v4816_v35  ;;  %2364 = vmatpush.msrb.mxu0 %v2320_v19  ;;  %v2318_v61 = vld [vmem:[#allocation9 + $0x258] sm:$0xff]  ;;  %v2088_v19 = vld [vmem:[#allocation9 + $0x68] sm:$0xff] }
 0x1e5   : > { %5294 = vst [vmem:[#allocation28_spill] sm:$0xff] %v4818_v20  ;;  %v2147_v20 = vld [vmem:[#allocation9 + $0x158] sm:$0xff] }
 0x1e6   : > { %2195 = vmatpush.msra.mxu2 %v2147_v20  ;;  %v2142_v20 = vld [vmem:[#allocation9 + $0x130] sm:$0xff]  ;;  %2365 = vmatpush.msrb.mxu0 %v2319_v55  ;;  %v2312_v55 = vld [vmem:[#allocation9 + $0x228] sm:$0xff] }
 0x1e8   : > { %2196 = vmatpush.msra.mxu2 %v2146_v44  ;;  %v2156_v44 = vld [vmem:[#allocation9 + $0x1a0] sm:$0xff]  ;;  %2366 = vmatpush.msrb.mxu0 %v2318_v61 }
 0x1ea   : > { %2197 = vmatpush.msra.mxu2 %v2145_v38  ;;  %v2138_v38 = vld [vmem:[#allocation9 + $0x110] sm:$0xff] }
 0x1eb   : > { %v1586_v0 = vpop.f32.mrf.mxu0  ;;  %v1618_v35 = vpop.f32.mrf.mxu1 }
 0x1ec   : > { %v4823_v11 = vadd.f32 %v1586_v0, %v1485_v14  ;;  %v4825_v2 = vadd.f32 %v1618_v35, %v1486_v30  ;;  %v2160_v14 = vld [vmem:[#allocation9 + $0x1c0] sm:$0xff]  ;;  %2198 = vmatpush.msra.mxu2 %v2144_v42  ;;  %v2157_v0 = vld [vmem:[#allocation9 + $0x1a8] sm:$0xff]  ;;  %v2317_v42 = vld [vmem:[#allocation9 + $0x250] sm:$0xff] }
 0x1ed   : > { %2221 = vmatpush.msra.mxu3 %v2160_v14  ;;  %v2153_v14 = vld [vmem:[#allocation9 + $0x188] sm:$0xff]  ;;  %2367 = vmatpush.msrb.mxu0 %v2317_v42 }
 0x1ee   : > { %2199 = vmatpush.msra.mxu2 %v2143_v43  ;;  %v2152_v43 = vld [vmem:[#allocation9 + $0x180] sm:$0xff] }
 0x1ef   : > { %2222 = vmatpush.msra.mxu3 %v2159_v58  ;;  %v2315_v58 = vld [vmem:[#allocation9 + $0x240] sm:$0xff] }
 0x1f0   : > { %2200 = vmatpush.msra.mxu2 %v2142_v20  ;;  %v2314_v20 = vld [vmem:[#allocation9 + $0x238] sm:$0xff] }
 0x1f1   : > { %2223 = vmatpush.msra.mxu3 %v2158_v34  ;;  %v2089_v34 = vld [vmem:[#allocation9 + $0x70] sm:$0xff] }
 0x1f2   : > { %2201 = vmatpush.msra.mxu2 %v2141_v23  ;;  %v2105_v23 = vld [vmem:[#allocation9 + $0xf0] sm:$0xff] }
 0x1f3   : > { %v1589_v35 = vpop.f32.mrf.mxu0  ;;  %v1621_v50 = vpop.f32.mrf.mxu1  ;;  %2224 = vmatpush.msra.mxu3 %v2157_v0  ;;  %v2313_v0 = vld [vmem:[#allocation9 + $0x230] sm:$0xff] }
 0x1f4   : > { %v4827_v30 = vadd.f32 %v1589_v35, %v1487_v60  ;;  %v4829_v59 = vadd.f32 %v1621_v50, %v1488_v6  ;;  %v2140_v60 = vld [vmem:[#allocation9 + $0x120] sm:$0xff]  ;;  %v2137_v6 = vld [vmem:[#allocation9 + $0x108] sm:$0xff] }
 0x1f5   : > { %2202 = vmatpush.msra.mxu2 %v2140_v60  ;;  %2225 = vmatpush.msra.mxu3 %v2156_v44  ;;  %v2316_v35 = vld [vmem:[#allocation9 + $0x248] sm:$0xff]  ;;  %v2136_v50 = vld [vmem:[#allocation9 + $0x100] sm:$0xff]  ;;  %v2553_v44 = vld [vmem:[#allocation9 + $0x4f8] sm:$0xff] }
 0x1f6   : > { %2368 = vmatpush.msrb.mxu0 %v2316_v35  ;;  %v2104_v60 = vld [vmem:[#allocation9 + $0xe8] sm:$0xff]  ;;  %2600 = vmatpush.msrb.mxu1 %v2553_v44  ;;  %v2552_v35 = vld [vmem:[#allocation9 + $0x4f0] sm:$0xff] }
 0x1f7   : > { %2203 = vmatpush.msra.mxu2 %v2139_v54  ;;  %2226 = vmatpush.msra.mxu3 %v2155_v41  ;;  %v833_v54 = vadd.f32 %v4666_v22, %v4598_v36  ;;  %v801_v41 = vadd.f32 %v4596_v5, %v4566_v29  ;;  %v2086_v36 = vld [vmem:[#allocation9 + $0x58] sm:$0xff]  ;;  %v836_v29 = vadd.f32 %v4681_v21, %v4616_v13  ;;  %v2548_v44 = vld [vmem:[#allocation9 + $0x4d0] sm:$0xff] }
 0x1f8   : > { %2369 = vmatpush.msrb.mxu0 %v2315_v58  ;;  %v4839_v42 = vpop.f32.mrf.mxu3  ;;  %2601 = vmatpush.msrb.mxu1 %v2552_v35  ;;  %v2102_v22 = vld [vmem:[#allocation9 + $0xd8] sm:$0xff]  ;;  %v804_v5 = vadd.f32 %v4611_v45, %v4573_v62  ;;  %v2084_v62 = vld [vmem:[#allocation9 + $0x48] sm:$0xff] }
 0x1f9   : > { %2204 = vmatpush.msra.mxu2 %v2138_v38  ;;  %2227 = vmatpush.msra.mxu3 %v2154_v10  ;;  %v1009_v61 = vadd.f32 %v4619_v25, %v801_v41  ;;  %v1010_v38 = vadd.f32 %v4690_v31, %v833_v54  ;;  %v4837_v10 = vpop.f32.mrf.mxu2  ;;  %v2310_v25 = vld [vmem:[#allocation9 + $0x218] sm:$0xff]  ;;  %v2100_v45 = vld [vmem:[#allocation9 + $0xc8] sm:$0xff] }
 0x1fa   : > { %2370 = vmatpush.msrb.mxu0 %v2314_v20  ;;  %v2550_v20 = vld [vmem:[#allocation9 + $0x4e0] sm:$0xff]  ;;  %v1959_v54 = vld [vmem:[#allocation8] sm:$0x3]  ;;  %v2547_v35 = vld [vmem:[#allocation9 + $0x4c8] sm:$0xff] }
 0x1fb   : > { %2205 = vmatpush.msra.mxu2 %v2137_v6  ;;  %2228 = vmatpush.msra.mxu3 %v2153_v14  ;;  %v2087_v6 = vld [vmem:[#allocation9 + $0x60] sm:$0xff]  ;;  %v1155_v31 = vadd.f32 %v4752_v17, %v1010_v38  ;;  %v1154_v58 = vadd.f32 %v4687_v33, %v1009_v61  ;;  %v1011_v17 = vadd.f32 %v4636_v26, %v804_v5  ;;  %v2098_v38 = vld [vmem:[#allocation9 + $0xb8] sm:$0xff] }
 0x1fc   : > { %2371 = vmatpush.msrb.mxu0 %v2313_v0  ;;  %v2103_v14 = vld [vmem:[#allocation9 + $0xe0] sm:$0xff]  ;;  %v1012_v33 = vadd.f32 %v4713_v47, %v836_v29  ;;  %v2308_v0 = vld [vmem:[#allocation9 + $0x208] sm:$0xff] }
 0x1fd   : > { %2206 = vmatpush.msra.mxu2 %v2136_v50  ;;  %2229 = vmatpush.msra.mxu3 %v2152_v43  ;;  %v2311_v50 = vld [vmem:[#allocation9 + $0x220] sm:$0xff]  ;;  %v2551_v43 = vld [vmem:[#allocation9 + $0x4e8] sm:$0xff]  ;;  %v1307_v13 = vadd.f32 %v4715_v40, %v1154_v58  ;;  %v1308_v21 = vadd.f32 %v4765_v32, %v1155_v31 }
 0x1fe   : > { %2372 = vmatpush.msrb.mxu0 %v2312_v55  ;;  %2602 = vmatpush.msrb.mxu1 %v2551_v43  ;;  %v2083_v40 = vld [vmem:[#allocation9 + $0x40] sm:$0xff]  ;;  %v807_v55 = vadd.f32 %v4630_v56, %v4578_v28  ;;  %v1157_v28 = vadd.f32 %v4763_v27, %v1012_v33  ;;  %v1156_v56 = vadd.f32 %v4711_v37, %v1011_v17  ;;  %v2097_v43 = vld [vmem:[#allocation9 + $0xb0] sm:$0xff] }
 0x1ff   : > { %2260 = vmatpush.msrb.mxu2 %v2090_v48  ;;  %2283 = vmatpush.msrb.mxu3 %v2106_v51  ;;  %v2085_v48 = vld [vmem:[#allocation9 + $0x50] sm:$0xff]  ;;  %v2099_v32 = vld [vmem:[#allocation9 + $0xc0] sm:$0xff] }
 0x200   : > { %2373 = vmatpush.msrb.mxu0 %v2311_v50  ;;  %v2101_v51 = vld [vmem:[#allocation9 + $0xd0] sm:$0xff]  ;;  %2603 = vmatpush.msrb.mxu1 %v2550_v20  ;;  %v2307_v26 = vld [vmem:[#allocation9 + $0x200] sm:$0xff]  ;;  %v4863_v50 = vperm.slane %v1959_v54, 0  ;;  %v1309_v37 = vadd.f32 %v4729_v18, %v1156_v56  ;;  %v2080_v20 = vld [vmem:[#allocation9 + $0x28] sm:$0xff] }
 0x201   : > { %2261 = vmatpush.msrb.mxu2 %v2089_v34  ;;  %2284 = vmatpush.msrb.mxu3 %v2105_v23  ;;  %v2309_v34 = vld [vmem:[#allocation9 + $0x210] sm:$0xff]  ;;  %v2549_v23 = vld [vmem:[#allocation9 + $0x4d8] sm:$0xff]  ;;  %v1733_v61 = vpop.f32.mrf.mxu2  ;;  %v2095_v17 = vld [vmem:[#allocation9 + $0xa0] sm:$0xff] }
 0x202   : > { %2374 = vmatpush.msrb.mxu0 %v2310_v25  ;;  %2604 = vmatpush.msrb.mxu1 %v2549_v23  ;;  %v1481_v58 = vadd.f32 %v4786_v24, %v1309_v37  ;;  %v2545_v24 = vld [vmem:[#allocation9 + $0x4b8] sm:$0xff]  ;;  %v2534_v33 = vld [vmem:[#allocation9 + $0x460] sm:$0xff] }
 0x203   : > { %2262 = vmatpush.msrb.mxu2 %v2088_v19  ;;  %2285 = vmatpush.msrb.mxu3 %v2104_v60  ;;  %v1479_v19 = vadd.f32 %v4784_v4, %v1307_v13  ;;  %v1480_v60 = vadd.f32 %v4791_v63, %v1308_v21  ;;  %v1765_v4 = vpop.f32.mrf.mxu3  ;;  %v2082_v63 = vld [vmem:[#allocation9 + $0x38] sm:$0xff]  ;;  %v2535_v13 = vld [vmem:[#allocation9 + $0x468] sm:$0xff] }
 0x204   : > { %2375 = vmatpush.msrb.mxu0 %v2309_v34  ;;  %2605 = vmatpush.msrb.mxu1 %v2548_v44  ;;  %v2096_v34 = vld [vmem:[#allocation9 + $0xa8] sm:$0xff]  ;;  %v2078_v44 = vld [vmem:[#allocation9 + $0x18] sm:$0xff] }
 0x205   : > { %2263 = vmatpush.msrb.mxu2 %v2087_v6  ;;  %2286 = vmatpush.msrb.mxu3 %v2103_v14  ;;  %v1624_v47 = vadd.f32 %v4802_v52, %v1479_v19  ;;  %v1625_v41 = vadd.f32 %v4804_v1, %v1480_v60  ;;  %v2537_v6 = vld [vmem:[#allocation9 + $0x478] sm:$0xff]  ;;  %v839_v14 = vadd.f32 %v4703_v39, %v4633_v57  ;;  %v2536_v57 = vld [vmem:[#allocation9 + $0x470] sm:$0xff] }
 0x206   : > { %2376 = vmatpush.msrb.mxu0 %v2308_v0  ;;  %2606 = vmatpush.msrb.mxu1 %v2547_v35  ;;  %v1013_v39 = vadd.f32 %v4658_v53, %v807_v55  ;;  %v2094_v55 = vld [vmem:[#allocation9 + $0x98] sm:$0xff] }
 0x207   : > { %2264 = vmatpush.msrb.mxu2 %v2086_v36  ;;  %2287 = vmatpush.msrb.mxu3 %v2102_v22  ;;  %v1777_v52 = vadd.f32 %v4837_v10, %v1624_v47  ;;  %v1778_v1 = vadd.f32 %v4839_v42, %v1625_v41  ;;  %v4865_v36 = vperm.slane %v1959_v54, 1  ;;  %v2081_v22 = vld [vmem:[#allocation9 + $0x30] sm:$0xff]  ;;  %v2546_v10 = vld [vmem:[#allocation9 + $0x4c0] sm:$0xff]  ;;  %v1310_v42 = vadd.f32 %v4776_v8, %v1157_v28  ;;  %v2533_v54 = vld [vmem:[#allocation9 + $0x458] sm:$0xff] }
 0x208   : > { %2377 = vmatpush.msrb.mxu0 %v2307_v26  ;;  %2607 = vmatpush.msrb.mxu1 %v2546_v10  ;;  %v1014_v31 = vadd.f32 %v4731_v46, %v839_v14  ;;  %v1626_v8 = vadd.f32 %v4808_v15, %v1481_v58  ;;  %v2532_v14 = vld [vmem:[#allocation9 + $0x450] sm:$0xff]  ;;  %v5296_v28 = vld [vmem:[#allocation26_spill] sm:$0xff]  ;;  %v2076_v58 = vld [vmem:[#allocation9 + $0x8] sm:$0xff] }
 0x209   : > { %2265 = vmatpush.msrb.mxu2 %v2085_v48  ;;  %2288 = vmatpush.msrb.mxu3 %v2101_v51  ;;  %v1482_v48 = vadd.f32 %v4799_v49, %v1310_v42  ;;  %v1158_v51 = vadd.f32 %v4727_v3, %v1013_v39  ;;  %v2079_v3 = vld [vmem:[#allocation9 + $0x20] sm:$0xff]  ;;  %v1736_v15 = vpop.f32.mrf.mxu2 }
 0x20a   : > { %2577 = vmatpush.msra.mxu0 %v2537_v6  ;;  %v1159_v49 = vadd.f32 %v4769_v7, %v1014_v31  ;;  %2608 = vmatpush.msrb.mxu1 %v2545_v24  ;;  %v1779_v0 = vadd.f32 %v1733_v61, %v1626_v8  ;;  %v2093_v6 = vld [vmem:[#allocation9 + $0x90] sm:$0xff]  ;;  %v2541_v8 = vld [vmem:[#allocation9 + $0x498] sm:$0xff] }
 0x20b   : > { %2266 = vmatpush.msrb.mxu2 %v2084_v62  ;;  %2289 = vmatpush.msrb.mxu3 %v2100_v45  ;;  %v1627_v21 = vadd.f32 %v4810_v12, %v1482_v48  ;;  %v1993_v62 = vpop.permute.xlu0 %1992  ;;  %v1311_v23 = vadd.f32 %v4736_v16, %v1158_v51  ;;  %v1768_v60 = vpop.f32.mrf.mxu3  ;;  %v2092_v48 = vld [vmem:[#allocation9 + $0x88] sm:$0xff] }
 0x20c   : > { %2578 = vmatpush.msra.mxu0 %v2536_v57 }
 0x20d   : > { %2267 = vmatpush.msrb.mxu2 %v2083_v40  ;;  %2290 = vmatpush.msrb.mxu3 %v2099_v32  ;;  %v1780_v19 = vadd.f32 %v1765_v4, %v1627_v21  ;;  %v2544_v40 = vld [vmem:[#allocation9 + $0x4b0] sm:$0xff]  ;;  %v1312_v32 = vadd.f32 %v4782_v9, %v1159_v49  ;;  %v2543_v4 = vld [vmem:[#allocation9 + $0x4a8] sm:$0xff] }
 0x20e   : > { %2579 = vmatpush.msra.mxu0 %v2535_v13  ;;  %2609 = vmatpush.msrb.mxu1 %v2544_v40  ;;  %v2077_v9 = vld [vmem:[#allocation9 + $0x10] sm:$0xff] }
 0x20f   : > { %2268 = vmatpush.msrb.mxu2 %v2082_v63  ;;  %2291 = vmatpush.msrb.mxu3 %v2098_v38  ;;  %v5295_v63 = vld [vmem:[#allocation25_spill] sm:$0xff]  ;;  %v1484_v56 = vadd.f32 %v5296_v28, %v1312_v32 }
 0x210   : > { %2580 = vmatpush.msra.mxu0 %v2534_v33  ;;  %v1483_v38 = vadd.f32 %v5295_v63, %v1311_v23  ;;  %2610 = vmatpush.msrb.mxu1 %v2543_v4  ;;  %v2530_v33 = vld [vmem:[#allocation9 + $0x440] sm:$0xff] }
 0x211   : > { %2269 = vmatpush.msrb.mxu2 %v2081_v22  ;;  %2292 = vmatpush.msrb.mxu3 %v2097_v43  ;;  %v2542_v22 = vld [vmem:[#allocation9 + $0x4a0] sm:$0xff] }
 0x212   : > { %2581 = vmatpush.msra.mxu0 %v2533_v54  ;;  %v5297_v43 = vld [vmem:[#allocation27_spill] sm:$0xff]  ;;  %2611 = vmatpush.msrb.mxu1 %v2542_v22  ;;  %v2761_v22 = vld [vmem:[#allocation9 + $0x6f8] sm:$0xff] }
 0x213   : > { %2270 = vmatpush.msrb.mxu2 %v2080_v20  ;;  %2293 = vmatpush.msrb.mxu3 %v2096_v34  ;;  %v1628_v57 = vadd.f32 %v5297_v43, %v1483_v38  ;;  %v1998_v20 = vpop.permute.xlu0 %1997  ;;  %v1771_v40 = vpop.f32.mrf.mxu3 }
 0x214   : > { %2582 = vmatpush.msra.mxu0 %v2532_v14  ;;  %2612 = vmatpush.msrb.mxu1 %v2541_v8 }
 0x215   : > { %2271 = vmatpush.msrb.mxu2 %v2079_v3  ;;  %2294 = vmatpush.msrb.mxu3 %v2095_v17  ;;  %v2075_v3 = vld [vmem:[#allocation9] sm:$0xff] }
 0x216   : > { %v2091_v17 = vld [vmem:[#allocation9 + $0x80] sm:$0xff] }
 0x217   : > { %2272 = vmatpush.msrb.mxu2 %v2078_v44  ;;  %2295 = vmatpush.msrb.mxu3 %v2094_v55 }
 0x219   : > { %2273 = vmatpush.msrb.mxu2 %v2077_v9  ;;  %2296 = vmatpush.msrb.mxu3 %v2093_v6  ;;  %v2538_v6 = vld [vmem:[#allocation9 + $0x480] sm:$0xff] }
 0x21b   : > { %2274 = vmatpush.msrb.mxu2 %v2076_v58  ;;  %2297 = vmatpush.msrb.mxu3 %v2092_v48 }
 0x21d   : > { %2275 = vmatpush.msrb.mxu2 %v2075_v3  ;;  %2298 = vmatpush.msrb.mxu3 %v2091_v17  ;;  %v1774_v3 = vpop.f32.mrf.mxu3 }
 0x228   : > { %v1902_v27 = vpop.f32.mrf.mxu0  ;;  %v1934_v29 = vpop.f32.mrf.mxu1 }
 0x229   : > { %v1949_v5 = vadd.f32 %v1902_v27, %v1777_v52  ;;  %v1950_v25 = vadd.f32 %v1934_v29, %v1778_v1  ;;  %v5298_v27 = vld [vmem:[#allocation28_spill] sm:$0xff] }
 0x22a   : > { %v1629_v29 = vadd.f32 %v5298_v27, %v1484_v56 }
 0x22b   : > { %v1965_v53 = vadd.f32 %v4863_v50, %v1949_v5  ;;  %v1966_v18 = vadd.f32 %v4865_v36, %v1950_v25 }
 0x22c   : > { %v1782_v51 = vadd.f32 %v1768_v60, %v1629_v29  ;;  %v2540_v60 = vld [vmem:[#allocation9 + $0x490] sm:$0xff] }
 0x22d   : > { %v1975_v45 = vmax.f32 %v1965_v53, 0.0  ;;  %v1976_v46 = vmax.f32 %v1966_v18, 0.0  ;;  %v2531_v53 = vld [vmem:[#allocation9 + $0x448] sm:$0xff]  ;;  %v1781_v18 = vadd.f32 %v1736_v15, %v1628_v57  ;;  %2613 = vmatpush.msrb.mxu1 %v2540_v60  ;;  %v1784_v57 = vadd.f32 %v1771_v40, %v4825_v2  ;;  %v2524_v40 = vld [vmem:[#allocation9 + $0x410] sm:$0xff] }
 0x22e   : > { %2583 = vmatpush.msra.mxu0 %v2531_v53  ;;  %v2760_v53 = vld [vmem:[#allocation9 + $0x6f0] sm:$0xff] }
 0x22f   : > { %v2016_v12 = vmul.f32 %v1993_v62, %v1976_v46  ;;  %v2015_v26 = vmul.f32 %v1993_v62, %v1975_v45  ;;  %v2864_v62 = vld [vmem:[#allocation9 + $0x7b8] sm:$0xff] }
 0x230   : > { %v1905_v7 = vpop.f32.mrf.mxu0  ;;  %v1937_v16 = vpop.f32.mrf.mxu1  ;;  %2584 = vmatpush.msra.mxu0 %v2530_v33 }
 0x231   : > { %v2035_v47 = vrot.slane %v2016_v12, 6  ;;  %v1951_v41 = vadd.f32 %v1905_v7, %v1779_v0  ;;  %v1952_v61 = vadd.f32 %v1937_v16, %v1780_v19  ;;  %v1739_v12 = vpop.f32.mrf.mxu2  ;;  %v2529_v16 = vld [vmem:[#allocation9 + $0x438] sm:$0xff] }
 0x232   : > { %2585 = vmatpush.msra.mxu0 %v2529_v16  ;;  %v1783_v43 = vadd.f32 %v1739_v12, %v4823_v11 }
 0x233   : > { %v4884_v35 = vsel %vm2040_vm7, %v2015_v26, %v2035_v47  ;;  %v2043_v52 = vsel %vm2042_vm8, %v2015_v26, %v2035_v47  ;;  %v4888_v1 = vsel %vm2045_vm9, %v2015_v26, %v2035_v47  ;;  %v2049_v10 = vsel %vm2048_vm10, %v2035_v47, %v2015_v26  ;;  %v2539_v26 = vld [vmem:[#allocation9 + $0x488] sm:$0xff] }
 0x234   : > { %v4891_v39 = vrot.slane %v2043_v52, 2  ;;  %v2047_v37 = vrot.slane %v4888_v1, 4  ;;  %v1967_v42 = vadd.f32 %v4863_v50, %v1951_v41  ;;  %v1968_v5 = vadd.f32 %v4865_v36, %v1952_v61  ;;  %v2003_v41 = vpop.permute.xlu1 %2002  ;;  %v2528_v61 = vld [vmem:[#allocation9 + $0x430] sm:$0xff]  ;;  %2614 = vmatpush.msrb.mxu1 %v2539_v26 }
 0x235   : > { %v3557_v25 = vrot.slane %v4884_v35, 9  ;;  %v4900_v21 = vrot.slane %v2049_v10, 6  ;;  %2586 = vmatpush.msra.mxu0 %v2528_v61  ;;  %v2527_v10 = vld [vmem:[#allocation9 + $0x428] sm:$0xff]  ;;  %v1786_v26 = vadd.f32 %v1774_v3, %v4829_v59  ;;  %v2757_v61 = vld [vmem:[#allocation9 + $0x6d8] sm:$0xff]  ;;  %v2013_v3 = vpop.permute.xlu2 %2012 }
 0x236   : > { %v2109_v31 = vrot.slane %v4891_v39, 7  ;;  %v1977_v34 = vmax.f32 %v1967_v42, 0.0  ;;  %v1978_v13 = vmax.f32 %v1968_v5, 0.0  ;;  %v2112_v24 = vrot.slane %v2047_v37, 7  ;;  %2615 = vmatpush.msrb.mxu1 %v2538_v6 }
 0x237   : > { %v3558_v47 = vrot.slane %v4900_v21, 9  ;;  %2587 = vmatpush.msra.mxu0 %v2527_v10 }
 0x238   : > { %v2110_v45 = vsel %vm4297_vm6, %v3557_v25, %v2109_v31  ;;  %v2111_v46 = vrot.slane %v2109_v31, 2  ;;  %v1908_v49 = vpop.f32.mrf.mxu0  ;;  %v1940_v23 = vpop.f32.mrf.mxu1  ;;  %v2018_v0 = vmul.f32 %v1998_v20, %v1978_v13  ;;  %v2017_v7 = vmul.f32 %v1998_v20, %v1977_v34  ;;  %2808 = vmatpush.msra.mxu1 %v2761_v22  ;;  %v2759_v13 = vld [vmem:[#allocation9 + $0x6e8] sm:$0xff] }
 0x239   : > { %2168 = vst [vmem:[#allocation1] ss:$4 sm:$0xff] %v2110_v45  ;;  %v1953_v19 = vadd.f32 %v1908_v49, %v1781_v18  ;;  %v1954_v15 = vadd.f32 %v1940_v23, %v1782_v51  ;;  %v2526_v51 = vld [vmem:[#allocation9 + $0x420] sm:$0xff]  ;;  %v2525_v49 = vld [vmem:[#allocation9 + $0x418] sm:$0xff]  ;;  %v1742_v23 = vpop.f32.mrf.mxu2 }
 0x23a   : > { %v2113_v32 = vsel %vm4297_vm6, %v2111_v46, %v2112_v24  ;;  %v2036_v44 = vrot.slane %v2018_v0, 6  ;;  %2809 = vmatpush.msra.mxu1 %v2760_v53  ;;  %2588 = vmatpush.msra.mxu0 %v2526_v51  ;;  %v2758_v0 = vld [vmem:[#allocation9 + $0x6e0] sm:$0xff]  ;;  %v2756_v51 = vld [vmem:[#allocation9 + $0x6d0] sm:$0xff] }
 0x23b   : > { %2170 = vst [vmem:[#allocation1 + $0x1] ss:$4 sm:$0xff] %v2113_v32  ;;  %v1969_v55 = vadd.f32 %v4863_v50, %v1953_v19  ;;  %v1970_v54 = vadd.f32 %v4865_v36, %v1954_v15 }
 0x23c   : > { %v4912_v4 = vsel %vm2040_vm7, %v2017_v7, %v2036_v44  ;;  %v2052_v63 = vsel %vm2042_vm8, %v2017_v7, %v2036_v44  ;;  %v2054_v38 = vsel %vm2045_vm9, %v2017_v7, %v2036_v44  ;;  %v2056_v9 = vsel %vm2048_vm10, %v2036_v44, %v2017_v7  ;;  %2810 = vmatpush.msra.mxu1 %v2759_v13 }
 0x23d   : > { %v4917_v14 = vrot.slane %v2052_v63, 2  ;;  %v4919_v28 = vrot.slane %v2054_v38, 4  ;;  %v4921_v56 = vrot.slane %v2056_v9, 6  ;;  %v2116_v52 = vrot.slane %v4912_v4, 7  ;;  %2589 = vmatpush.msra.mxu0 %v2525_v49  ;;  %v2523_v63 = vld [vmem:[#allocation9 + $0x408] sm:$0xff] }
 0x23e   : > { %v1979_v27 = vmax.f32 %v1969_v55, 0.0  ;;  %v1980_v29 = vmax.f32 %v1970_v54, 0.0  ;;  %v2008_v55 = vpop.permute.xlu1 %2007  ;;  %v1785_v54 = vadd.f32 %v1742_v23, %v4827_v30  ;;  %2811 = vmatpush.msra.mxu1 %v2758_v0 }
 0x23f   : > { %v4928_v42 = vsel %vm4297_vm6, %v3558_v47, %v2116_v52  ;;  %v2118_v5 = vrot.slane %v2116_v52, 2  ;;  %v2119_v25 = vrot.slane %v4917_v14, 7  ;;  %v3559_v31 = vrot.slane %v4919_v28, 9  ;;  %2590 = vmatpush.msra.mxu0 %v2524_v40 }
 0x240   : > { %v1911_v58 = vpop.f32.mrf.mxu0  ;;  %v1943_v48 = vpop.f32.mrf.mxu1  ;;  %2172 = vst [vmem:[#allocation1 + $0x2] ss:$4 sm:$0xff] %v4928_v42  ;;  %v2020_v2 = vmul.f32 %v2003_v41, %v1980_v29  ;;  %v2123_v11 = vrot.slane %v4921_v56, 7  ;;  %v2019_v8 = vmul.f32 %v2003_v41, %v1979_v27  ;;  %v2338_v27 = vld [vmem:[#allocation9 + $0x2f8] sm:$0xff]  ;;  %2812 = vmatpush.msra.mxu1 %v2757_v61 }
 0x241   : > { %v1955_v18 = vadd.f32 %v1911_v58, %v1783_v43  ;;  %v4936_v20 = vsel %vm4297_vm6, %v2118_v5, %v2119_v25  ;;  %v1956_v34 = vadd.f32 %v1943_v48, %v1784_v57  ;;  %v2442_v29 = vld [vmem:[#allocation9 + $0x3f8] sm:$0xff]  ;;  %2591 = vmatpush.msra.mxu0 %v2523_v63 }
 0x242   : > { %2174 = vst [vmem:[#allocation1 + $0x3] ss:$4 sm:$0xff] %v4936_v20  ;;  %v2037_v45 = vrot.slane %v2020_v2, 6  ;;  %v4941_v46 = vsel %vm4297_vm6, %v3559_v31, %v2123_v11  ;;  %v2125_v17 = vrot.slane %v2123_v11, 2  ;;  %v2337_v2 = vld [vmem:[#allocation9 + $0x2f0] sm:$0xff]  ;;  %2813 = vmatpush.msra.mxu1 %v2756_v51  ;;  %v2751_v51 = vld [vmem:[#allocation9 + $0x6a8] sm:$0xff] }
 0x243   : > { %v1971_v24 = vadd.f32 %v4863_v50, %v1955_v18  ;;  %2176 = vst [vmem:[#allocation1 + $0x20] ss:$4 sm:$0xff] %v4941_v46  ;;  %v1972_v33 = vadd.f32 %v4865_v36, %v1956_v34  ;;  %v2441_v11 = vld [vmem:[#allocation9 + $0x3f0] sm:$0xff] }
 0x244   : > { %v4947_v19 = vsel %vm2040_vm7, %v2019_v8, %v2037_v45  ;;  %v2059_v15 = vsel %vm2042_vm8, %v2019_v8, %v2037_v45  ;;  %v2061_v60 = vsel %vm2045_vm9, %v2019_v8, %v2037_v45  ;;  %v2063_v12 = vsel %vm2048_vm10, %v2037_v45, %v2019_v8  ;;  %v2336_v8 = vld [vmem:[#allocation9 + $0x2e8] sm:$0xff] }
 0x245   : > { %v4952_v32 = vrot.slane %v2059_v15, 2  ;;  %v4954_v7 = vrot.slane %v2061_v60, 4  ;;  %v4956_v16 = vrot.slane %v2063_v12, 6  ;;  %v2126_v44 = vrot.slane %v4947_v19, 7  ;;  %v2440_v45 = vld [vmem:[#allocation9 + $0x3e8] sm:$0xff]  ;;  %v2335_v15 = vld [vmem:[#allocation9 + $0x2e0] sm:$0xff] }
 0x246   : > { %v1981_v47 = vmax.f32 %v1971_v24, 0.0  ;;  %v1982_v41 = vmax.f32 %v1972_v33, 0.0  ;;  %v2439_v60 = vld [vmem:[#allocation9 + $0x3e0] sm:$0xff] }
 0x247   : > { %v4963_v38 = vsel %vm4297_vm6, %v2125_v17, %v2126_v44  ;;  %v3560_v9 = vrot.slane %v4952_v32, 9  ;;  %v2130_v6 = vrot.slane %v4954_v7, 7  ;;  %v2133_v30 = vrot.slane %v4956_v16, 7  ;;  %v2755_v17 = vld [vmem:[#allocation9 + $0x6c8] sm:$0xff]  ;;  %v2754_v44 = vld [vmem:[#allocation9 + $0x6c0] sm:$0xff] }
 0x248   : > { %v1914_v52 = vpop.f32.mrf.mxu0  ;;  %v1946_v22 = vpop.f32.mrf.mxu1  ;;  %2178 = vst [vmem:[#allocation1 + $0x21] ss:$4 sm:$0xff] %v4963_v38  ;;  %v2022_v59 = vmul.f32 %v2008_v55, %v1982_v41  ;;  %v2021_v25 = vmul.f32 %v2008_v55, %v1981_v47  ;;  %2814 = vmatpush.msra.mxu1 %v2755_v17  ;;  %v2749_v17 = vld [vmem:[#allocation9 + $0x698] sm:$0xff] }
 0x249   : > { %v1957_v43 = vadd.f32 %v1914_v52, %v1785_v54  ;;  %v1958_v57 = vadd.f32 %v1946_v22, %v1786_v26  ;;  %v2183_v10 = vld.sshfl [vmem:[#allocation1] sm:$0xff pattern:$0x73625140]  ;;  %v2184_v5 = vld.sshfl [vmem:[#allocation1 + $0x8] sm:$0xff pattern:$0x73625140]  ;;  %v4975_v18 = vsel %vm4297_vm6, %v3560_v9, %v2130_v6 }
 0x24a   : > { %2237 = vst [vmem:[#allocation1] ss:$4 sm:$0xff] %v4884_v35  ;;  %v2132_v31 = vrot.slane %v2130_v6, 2  ;;  %v2038_v58 = vrot.slane %v2022_v59, 6  ;;  %2207 = vmatmul.f32.vlgmr.msra.gmra.mxu2 %v2183_v10  ;;  %2230 = vmatmul.f32.vlgmr.msra.gmra.mxu3 %v2184_v5  ;;  %v2522_v35 = vld [vmem:[#allocation9 + $0x400] sm:$0xff]  ;;  %v2334_v54 = vld [vmem:[#allocation9 + $0x2d8] sm:$0xff] }
 0x24b   : > { %v1973_v48 = vadd.f32 %v4863_v50, %v1957_v43  ;;  %v1974_v53 = vadd.f32 %v4865_v36, %v1958_v57  ;;  %2239 = vst [vmem:[#allocation1 + $0x1] ss:$4 sm:$0xff] %v4891_v39  ;;  %2385 = vmatpush.msra.mxu2 %v2338_v27  ;;  %2489 = vmatpush.msra.mxu3 %v2442_v29  ;;  %v2438_v26 = vld [vmem:[#allocation9 + $0x3d8] sm:$0xff]  ;;  %v2333_v22 = vld [vmem:[#allocation9 + $0x2d0] sm:$0xff]  ;;  %v2332_v43 = vld [vmem:[#allocation9 + $0x2c8] sm:$0xff] }
 0x24c   : > { %2241 = vst [vmem:[#allocation1 + $0x2] ss:$4 sm:$0xff] %v4900_v21  ;;  %v4980_v50 = vsel %vm4297_vm6, %v2132_v31, %v2133_v30  ;;  %v4983_v36 = vsel %vm2040_vm7, %v2021_v25, %v2038_v58  ;;  %v2066_v34 = vsel %vm2042_vm8, %v2021_v25, %v2038_v58  ;;  %v2068_v13 = vsel %vm2045_vm9, %v2021_v25, %v2038_v58  ;;  %v2753_v9 = vld [vmem:[#allocation9 + $0x6b8] sm:$0xff]  ;;  %v2437_v30 = vld [vmem:[#allocation9 + $0x3d0] sm:$0xff]  ;;  %v2436_v57 = vld [vmem:[#allocation9 + $0x3c8] sm:$0xff] }
 0x24d   : > { %2243 = vst [vmem:[#allocation1 + $0x3] ss:$4 sm:$0xff] %v4912_v4  ;;  %v4988_v24 = vrot.slane %v2066_v34, 2  ;;  %v4990_v49 = vrot.slane %v2068_v13, 4  ;;  %v4993_v23 = vsel %vm2048_vm10, %v2038_v58, %v2021_v25  ;;  %2386 = vmatpush.msra.mxu2 %v2337_v2  ;;  %2490 = vmatpush.msra.mxu3 %v2441_v11  ;;  %v1983_v33 = vmax.f32 %v1973_v48, 0.0  ;;  %v2752_v27 = vld [vmem:[#allocation9 + $0x6b0] sm:$0xff] }
 0x24e   : > { %2180 = vst [vmem:[#allocation1 + $0x22] ss:$4 sm:$0xff] %v4975_v18  ;;  %v1984_v0 = vmax.f32 %v1974_v53, 0.0  ;;  %2592 = vmatpush.msra.mxu0 %v2522_v35  ;;  %v3561_v12 = vrot.slane %v4983_v36, 9  ;;  %v2071_v47 = vrot.slane %v4993_v23, 6  ;;  %2815 = vmatpush.msra.mxu1 %v2754_v44  ;;  %v2331_v53 = vld [vmem:[#allocation9 + $0x2c0] sm:$0xff] }
 0x24f   : > { %2182 = vst [vmem:[#allocation1 + $0x23] ss:$4 sm:$0xff] %v4980_v50  ;;  %v2516_v40 = vrot.slane %v4988_v24, 7  ;;  %2387 = vmatpush.msra.mxu2 %v2336_v8  ;;  %2491 = vmatpush.msra.mxu3 %v2440_v45  ;;  %v2519_v63 = vrot.slane %v4990_v49, 7  ;;  %v2023_v6 = vmul.f32 %v2013_v3, %v1983_v33  ;;  %v2435_v2 = vld [vmem:[#allocation9 + $0x3c0] sm:$0xff]  ;;  %v2330_v8 = vld [vmem:[#allocation9 + $0x2b8] sm:$0xff] }
 0x250   : > { %v2024_v55 = vmul.f32 %v2013_v3, %v1984_v0  ;;  %2816 = vmatpush.msra.mxu1 %v2753_v9  ;;  %v3562_v31 = vrot.slane %v2071_v47, 9  ;;  %v2750_v13 = vld [vmem:[#allocation9 + $0x6a0] sm:$0xff]  ;;  %v2433_v3 = vld [vmem:[#allocation9 + $0x3b0] sm:$0xff]  ;;  %v2432_v0 = vld [vmem:[#allocation9 + $0x3a8] sm:$0xff] }
 0x251   : > { %v5002_v41 = vsel %vm4297_vm6, %v3561_v12, %v2516_v40  ;;  %v2518_v61 = vrot.slane %v2516_v40, 2  ;;  %2388 = vmatpush.msra.mxu2 %v2335_v15  ;;  %2492 = vmatpush.msra.mxu3 %v2439_v60  ;;  %v2329_v33 = vld [vmem:[#allocation9 + $0x2b0] sm:$0xff]  ;;  %v2745_v15 = vld [vmem:[#allocation9 + $0x678] sm:$0xff]  ;;  %v2328_v60 = vld [vmem:[#allocation9 + $0x2a8] sm:$0xff] }
 0x252   : > { %v2039_v52 = vrot.slane %v2024_v55, 6  ;;  %2817 = vmatpush.msra.mxu1 %v2752_v27  ;;  %v2431_v12 = vld [vmem:[#allocation9 + $0x3a0] sm:$0xff]  ;;  %v2748_v40 = vld [vmem:[#allocation9 + $0x690] sm:$0xff]  ;;  %v2743_v9 = vld [vmem:[#allocation9 + $0x668] sm:$0xff] }
 0x253   : > { %v5007_v59 = vsel %vm4297_vm6, %v2518_v61, %v2519_v63  ;;  %2389 = vmatpush.msra.mxu2 %v2334_v54  ;;  %2493 = vmatpush.msra.mxu3 %v2438_v26  ;;  %v2744_v54 = vld [vmem:[#allocation9 + $0x670] sm:$0xff]  ;;  %v2327_v26 = vld [vmem:[#allocation9 + $0x2a0] sm:$0xff]  ;;  %v2430_v61 = vld [vmem:[#allocation9 + $0x398] sm:$0xff] }
 0x254   : > { %v2252_v29 = vld.sshfl [vmem:[#allocation1] sm:$0xff pattern:$0x73625140]  ;;  %v2253_v10 = vld.sshfl [vmem:[#allocation1 + $0x8] sm:$0xff pattern:$0x73625140]  ;;  %v5010_v5 = vsel %vm2040_vm7, %v2023_v6, %v2039_v52  ;;  %v5013_v25 = vsel %vm2042_vm8, %v2023_v6, %v2039_v52  ;;  %2818 = vmatpush.msra.mxu1 %v2751_v51 }
 0x255   : > { %2339 = vst [vmem:[#allocation1] ss:$4 sm:$0xff] %v4891_v39  ;;  %v2074_v58 = vrot.slane %v5013_v25, 2  ;;  %v2835_v48 = vrot.slane %v5010_v5, 7  ;;  %2390 = vmatpush.msra.mxu2 %v2333_v22  ;;  %2494 = vmatpush.msra.mxu3 %v2437_v30  ;;  %v2747_v63 = vld [vmem:[#allocation9 + $0x688] sm:$0xff]  ;;  %v2326_v6 = vld [vmem:[#allocation9 + $0x298] sm:$0xff] }
 0x256   : > { %2341 = vst [vmem:[#allocation1 + $0x1] ss:$4 sm:$0xff] %v2047_v37  ;;  %v2185_v11 = vld.sshfl [vmem:[#allocation1 + $0x20] sm:$0xff pattern:$0x73625140]  ;;  %2819 = vmatpush.msra.mxu1 %v2750_v13  ;;  %v2746_v22 = vld [vmem:[#allocation9 + $0x680] sm:$0xff] }
 0x257   : > { %2343 = vst [vmem:[#allocation1 + $0x2] ss:$4 sm:$0xff] %v4912_v4  ;;  %v2186_v39 = vld.sshfl [vmem:[#allocation1 + $0x28] sm:$0xff pattern:$0x73625140]  ;;  %v5025_v35 = vsel %vm4297_vm6, %v3562_v31, %v2835_v48  ;;  %v5027_v34 = vrot.slane %v2835_v48, 2  ;;  %2210 = vmatmul.f32.gmra.mxu2 %v2185_v11  ;;  %2495 = vmatpush.msra.mxu3 %v2436_v57 }
 0x258   : > { %2345 = vst [vmem:[#allocation1 + $0x3] ss:$4 sm:$0xff] %v4917_v14  ;;  %v5032_v1 = vrot.slane %v2074_v58, 7  ;;  %2233 = vmatmul.f32.gmra.mxu3 %v2186_v39  ;;  %2391 = vmatpush.msra.mxu2 %v2332_v43  ;;  %v2434_v37 = vld [vmem:[#allocation9 + $0x3b8] sm:$0xff]  ;;  %v2429_v52 = vld [vmem:[#allocation9 + $0x390] sm:$0xff]  ;;  %v2742_v43 = vld [vmem:[#allocation9 + $0x660] sm:$0xff] }
 0x259   : > { %2245 = vst [vmem:[#allocation1 + $0x20] ss:$4 sm:$0xff] %v4919_v28  ;;  %2496 = vmatpush.msra.mxu3 %v2435_v2  ;;  %2820 = vmatpush.msra.mxu1 %v2749_v17  ;;  %v2325_v57 = vld [vmem:[#allocation9 + $0x290] sm:$0xff]  ;;  %v2741_v27 = vld [vmem:[#allocation9 + $0x658] sm:$0xff]  ;;  %v2739_v48 = vld [vmem:[#allocation9 + $0x648] sm:$0xff] }
 0x25a   : > { %2247 = vst [vmem:[#allocation1 + $0x21] ss:$4 sm:$0xff] %v4921_v56  ;;  %v2839_v45 = vsel %vm4297_vm6, %v5027_v34, %v5032_v1  ;;  %2392 = vmatpush.msra.mxu2 %v2331_v53  ;;  %v2740_v31 = vld [vmem:[#allocation9 + $0x650] sm:$0xff]  ;;  %v2427_v53 = vld [vmem:[#allocation9 + $0x380] sm:$0xff]  ;;  %v2426_v11 = vld [vmem:[#allocation9 + $0x378] sm:$0xff] }
 0x25b   : > { %2249 = vst [vmem:[#allocation1 + $0x22] ss:$4 sm:$0xff] %v4952_v32  ;;  %2497 = vmatpush.msra.mxu3 %v2434_v37  ;;  %2821 = vmatpush.msra.mxu1 %v2748_v40  ;;  %v2323_v2 = vld [vmem:[#allocation9 + $0x280] sm:$0xff]  ;;  %v2657_v51 = vld [vmem:[#allocation9 + $0x5f8] sm:$0xff]  ;;  %v2656_v13 = vld [vmem:[#allocation9 + $0x5f0] sm:$0xff] }
 0x25c   : > { %2251 = vst [vmem:[#allocation1 + $0x23] ss:$4 sm:$0xff] %v4954_v7  ;;  %2393 = vmatpush.msra.mxu2 %v2330_v8  ;;  %v2738_v8 = vld [vmem:[#allocation9 + $0x640] sm:$0xff]  ;;  %v2737_v17 = vld [vmem:[#allocation9 + $0x638] sm:$0xff]  ;;  %v2735_v40 = vld [vmem:[#allocation9 + $0x628] sm:$0xff] }
 0x25d   : > { %2498 = vmatpush.msra.mxu3 %v2433_v3  ;;  %2822 = vmatpush.msra.mxu1 %v2747_v63  ;;  %v2425_v3 = vld [vmem:[#allocation9 + $0x370] sm:$0xff]  ;;  %v2626_v25 = vld [vmem:[#allocation9 + $0x500] sm:$0xff] }
 0x25e   : > { %2394 = vmatpush.msra.mxu2 %v2329_v33  ;;  %v2424_v33 = vld [vmem:[#allocation9 + $0x368] sm:$0xff]  ;;  %v2632_v1 = vld [vmem:[#allocation9 + $0x530] sm:$0xff] }
 0x25f   : > { %v2354_v44 = vld.sshfl [vmem:[#allocation1] sm:$0xff pattern:$0x73625140]  ;;  %v5042_v55 = vld.sshfl [vmem:[#allocation1 + $0x8] sm:$0xff pattern:$0x73625140]  ;;  %2276 = vmatmul.f32.vlgmr.msrb.gmra.mxu2 %v2252_v29  ;;  %2499 = vmatpush.msra.mxu3 %v2432_v0 }
 0x260   : > { %2443 = vst [vmem:[#allocation1] ss:$4 sm:$0xff] %v4900_v21  ;;  %2378 = vmatmul.f32.vlgmr.msrb.gmra.mxu0 %v2354_v44  ;;  %2299 = vmatmul.f32.vlgmr.msrb.gmra.mxu3 %v2253_v10  ;;  %v2428_v29 = vld [vmem:[#allocation9 + $0x388] sm:$0xff]  ;;  %v2422_v44 = vld [vmem:[#allocation9 + $0x358] sm:$0xff] }
 0x261   : > { %2445 = vst [vmem:[#allocation1 + $0x1] ss:$4 sm:$0xff] %v4912_v4  ;;  %2785 = vmatpush.msrb.mxu0 %v2745_v15  ;;  %2395 = vmatpush.msra.mxu2 %v2328_v60  ;;  %v2324_v10 = vld [vmem:[#allocation9 + $0x288] sm:$0xff]  ;;  %v2423_v60 = vld [vmem:[#allocation9 + $0x360] sm:$0xff] }
 0x262   : > { %2447 = vst [vmem:[#allocation1 + $0x2] ss:$4 sm:$0xff] %v4919_v28  ;;  %2500 = vmatpush.msra.mxu3 %v2431_v12  ;;  %2823 = vmatpush.msra.mxu1 %v2746_v22  ;;  %v2655_v0 = vld [vmem:[#allocation9 + $0x5e8] sm:$0xff]  ;;  %v2654_v12 = vld [vmem:[#allocation9 + $0x5e0] sm:$0xff] }
 0x263   : > { %2449 = vst [vmem:[#allocation1 + $0x3] ss:$4 sm:$0xff] %v4921_v56  ;;  %v2254_v21 = vld.sshfl [vmem:[#allocation1 + $0x20] sm:$0xff pattern:$0x73625140]  ;;  %2786 = vmatpush.msrb.mxu0 %v2744_v54  ;;  %2396 = vmatpush.msra.mxu2 %v2327_v26  ;;  %v2974_v22 = vld [vmem:[#allocation9 + $0x8e8] sm:$0xff] }
 0x264   : > { %v2255_v30 = vld.sshfl [vmem:[#allocation1 + $0x28] sm:$0xff pattern:$0x73625140]  ;;  %2501 = vmatpush.msra.mxu3 %v2430_v61 }
 0x265   : > { %2347 = vst [vmem:[#allocation1 + $0x20] ss:$4 sm:$0xff] %v4921_v56  ;;  %2787 = vmatpush.msrb.mxu0 %v2743_v9  ;;  %2397 = vmatpush.msra.mxu2 %v2326_v6  ;;  %v2976_v54 = vld [vmem:[#allocation9 + $0x8f8] sm:$0xff]  ;;  %v2975_v9 = vld [vmem:[#allocation9 + $0x8f0] sm:$0xff] }
 0x266   : > { %2349 = vst [vmem:[#allocation1 + $0x21] ss:$4 sm:$0xff] %v4947_v19  ;;  %2502 = vmatpush.msra.mxu3 %v2429_v52  ;;  %v2653_v26 = vld [vmem:[#allocation9 + $0x5d8] sm:$0xff]  ;;  %v2421_v52 = vld [vmem:[#allocation9 + $0x350] sm:$0xff] }
 0x267   : > { %2351 = vst [vmem:[#allocation1 + $0x22] ss:$4 sm:$0xff] %v4954_v7  ;;  %2788 = vmatpush.msrb.mxu0 %v2742_v43  ;;  %2279 = vmatmul.f32.gmra.mxu2 %v2254_v21  ;;  %v2733_v6 = vld [vmem:[#allocation9 + $0x618] sm:$0xff]  ;;  %v2652_v21 = vld [vmem:[#allocation9 + $0x5d0] sm:$0xff]  ;;  %v2420_v43 = vld [vmem:[#allocation9 + $0x348] sm:$0xff] }
 0x268   : > { %2353 = vst [vmem:[#allocation1 + $0x23] ss:$4 sm:$0xff] %v4956_v16  ;;  %2302 = vmatmul.f32.gmra.mxu3 %v2255_v30  ;;  %2398 = vmatpush.msra.mxu2 %v2325_v57  ;;  %v2973_v30 = vld [vmem:[#allocation9 + $0x8e0] sm:$0xff] }
 0x269   : > { %2789 = vmatpush.msrb.mxu0 %v2741_v27  ;;  %2503 = vmatpush.msra.mxu3 %v2428_v29  ;;  %v2651_v27 = vld [vmem:[#allocation9 + $0x5c8] sm:$0xff] }
 0x26a   : > { %v5052_v39 = vld.sshfl [vmem:[#allocation1] sm:$0xff pattern:$0x73625140]  ;;  %v2459_v37 = vld.sshfl [vmem:[#allocation1 + $0x8] sm:$0xff pattern:$0x73625140]  ;;  %2399 = vmatpush.msra.mxu2 %v2324_v10 }
 0x26b   : > { %2554 = vst [vmem:[#allocation1] ss:$4 sm:$0xff] %v4928_v42  ;;  %2790 = vmatpush.msrb.mxu0 %v2740_v31  ;;  %2504 = vmatpush.msra.mxu3 %v2427_v53  ;;  %v2731_v29 = vld [vmem:[#allocation9 + $0x608] sm:$0xff]  ;;  %v2972_v10 = vld [vmem:[#allocation9 + $0x8d8] sm:$0xff]  ;;  %v2419_v31 = vld [vmem:[#allocation9 + $0x340] sm:$0xff] }
 0x26c   : > { %2556 = vst [vmem:[#allocation1 + $0x1] ss:$4 sm:$0xff] %v4936_v20  ;;  %2400 = vmatpush.msra.mxu2 %v2323_v2  ;;  %v2736_v20 = vld [vmem:[#allocation9 + $0x630] sm:$0xff]  ;;  %v2730_v53 = vld [vmem:[#allocation9 + $0x600] sm:$0xff] }
 0x26d   : > { %2704 = vmatpush.msrb.mxu3 %v2657_v51  ;;  %2558 = vst [vmem:[#allocation1 + $0x2] ss:$4 sm:$0xff] %v4941_v46  ;;  %2791 = vmatpush.msrb.mxu0 %v2739_v48  ;;  %v2650_v48 = vld [vmem:[#allocation9 + $0x5c0] sm:$0xff]  ;;  %v2971_v2 = vld [vmem:[#allocation9 + $0x8d0] sm:$0xff]  ;;  %v2649_v51 = vld [vmem:[#allocation9 + $0x5b8] sm:$0xff] }
 0x26e   : > { %2466 = vmatpush.msrb.mxu2 %v2426_v11  ;;  %2560 = vst [vmem:[#allocation1 + $0x3] ss:$4 sm:$0xff] %v4963_v38  ;;  %v2418_v11 = vld [vmem:[#allocation9 + $0x338] sm:$0xff] }
 0x26f   : > { %2705 = vmatpush.msrb.mxu3 %v2656_v13  ;;  %v2356_v42 = vld.sshfl [vmem:[#allocation1 + $0x20] sm:$0xff pattern:$0x73625140]  ;;  %v2357_v15 = vld.sshfl [vmem:[#allocation1 + $0x28] sm:$0xff pattern:$0x73625140]  ;;  %2792 = vmatpush.msrb.mxu0 %v2738_v8 }
 0x270   : > { %2467 = vmatpush.msrb.mxu2 %v2425_v3  ;;  %2451 = vst [vmem:[#allocation1 + $0x20] ss:$4 sm:$0xff] %v4952_v32  ;;  %2381 = vmatmul.f32.gmra.mxu0 %v2356_v42  ;;  %v2970_v13 = vld [vmem:[#allocation9 + $0x8c8] sm:$0xff]  ;;  %v2417_v8 = vld [vmem:[#allocation9 + $0x330] sm:$0xff]  ;;  %v2969_v42 = vld [vmem:[#allocation9 + $0x8c0] sm:$0xff] }
 0x271   : > { %2401 = vmatmul.f32.vlgmr.msra.gmra.mxu2 %v5042_v55  ;;  %2453 = vst [vmem:[#allocation1 + $0x21] ss:$4 sm:$0xff] %v4954_v7  ;;  %2793 = vmatpush.msrb.mxu0 %v2737_v17  ;;  %v2734_v55 = vld [vmem:[#allocation9 + $0x620] sm:$0xff] }
 0x272   : > { %2505 = vmatmul.f32.vlgmr.msra.gmra.mxu3 %v2459_v37  ;;  %2455 = vst [vmem:[#allocation1 + $0x22] ss:$4 sm:$0xff] %v4983_v36  ;;  %2468 = vmatpush.msrb.mxu2 %v2424_v33  ;;  %v2960_v37 = vld [vmem:[#allocation9 + $0x878] sm:$0xff]  ;;  %v2648_v33 = vld [vmem:[#allocation9 + $0x5b0] sm:$0xff] }
 0x273   : > { %2706 = vmatpush.msrb.mxu3 %v2655_v0  ;;  %2457 = vst [vmem:[#allocation1 + $0x23] ss:$4 sm:$0xff] %v4988_v24  ;;  %2794 = vmatpush.msrb.mxu0 %v2736_v20  ;;  %v2959_v0 = vld [vmem:[#allocation9 + $0x870] sm:$0xff]  ;;  %v2647_v20 = vld [vmem:[#allocation9 + $0x5a8] sm:$0xff] }
 0x274   : > { %2469 = vmatpush.msrb.mxu2 %v2423_v60  ;;  %v2958_v60 = vld [vmem:[#allocation9 + $0x868] sm:$0xff] }
 0x275   : > { %2707 = vmatpush.msrb.mxu3 %v2654_v12  ;;  %v2570_v61 = vld.sshfl [vmem:[#allocation1 + $0x8] sm:$0xff pattern:$0x73625140]  ;;  %v2569_v63 = vld.sshfl [vmem:[#allocation1] sm:$0xff pattern:$0x73625140]  ;;  %2795 = vmatpush.msrb.mxu0 %v2735_v40 }
 0x276   : > { %2616 = vmatmul.f32.vlgmr.msrb.gmra.mxu1 %v2570_v61  ;;  %2658 = vst [vmem:[#allocation1] ss:$4 sm:$0xff] %v4912_v4  ;;  %2470 = vmatpush.msrb.mxu2 %v2422_v44  ;;  %v2732_v4 = vld [vmem:[#allocation9 + $0x610] sm:$0xff]  ;;  %v2968_v12 = vld [vmem:[#allocation9 + $0x8b8] sm:$0xff]  ;;  %v2415_v40 = vld [vmem:[#allocation9 + $0x320] sm:$0xff] }
 0x277   : > { %2660 = vst [vmem:[#allocation1 + $0x1] ss:$4 sm:$0xff] %v4917_v14  ;;  %3023 = vmatpush.msrb.mxu1 %v2976_v54  ;;  %2796 = vmatpush.msrb.mxu0 %v2734_v55  ;;  %v2646_v54 = vld [vmem:[#allocation9 + $0x5a0] sm:$0xff]  ;;  %v2645_v61 = vld [vmem:[#allocation9 + $0x598] sm:$0xff] }
 0x278   : > { %2593 = vmatmul.f32.vlgmr.msra.gmra.mxu0 %v2569_v63  ;;  %2662 = vst [vmem:[#allocation1 + $0x2] ss:$4 sm:$0xff] %v4921_v56  ;;  %2708 = vmatpush.msrb.mxu3 %v2653_v26  ;;  %v2957_v55 = vld [vmem:[#allocation9 + $0x860] sm:$0xff]  ;;  %v2414_v26 = vld [vmem:[#allocation9 + $0x318] sm:$0xff] }
 0x279   : > { %2664 = vst [vmem:[#allocation1 + $0x3] ss:$4 sm:$0xff] %v4947_v19  ;;  %3024 = vmatpush.msrb.mxu1 %v2975_v9  ;;  %2797 = vmatpush.msrb.mxu0 %v2733_v6  ;;  %v2956_v63 = vld [vmem:[#allocation9 + $0x858] sm:$0xff]  ;;  %v2966_v9 = vld [vmem:[#allocation9 + $0x8a8] sm:$0xff]  ;;  %v2413_v6 = vld [vmem:[#allocation9 + $0x310] sm:$0xff] }
 0x27a   : > { %v5067_v57 = vld.sshfl [vmem:[#allocation1 + $0x20] sm:$0xff pattern:$0x73625140]  ;;  %2471 = vmatpush.msrb.mxu2 %v2421_v52  ;;  %2709 = vmatpush.msrb.mxu3 %v2652_v21  ;;  %v2461_v14 = vld.sshfl [vmem:[#allocation1 + $0x28] sm:$0xff pattern:$0x73625140] }
 0x27b   : > { %3025 = vmatpush.msrb.mxu1 %v2974_v22  ;;  %2404 = vmatmul.f32.gmra.mxu2 %v2357_v15  ;;  %2562 = vst [vmem:[#allocation1 + $0x20] ss:$4 sm:$0xff] %v4975_v18  ;;  %v2416_v15 = vld [vmem:[#allocation9 + $0x328] sm:$0xff]  ;;  %v2644_v52 = vld [vmem:[#allocation9 + $0x590] sm:$0xff] }
 0x27c   : > { %2508 = vmatmul.f32.gmra.mxu3 %v2461_v14  ;;  %2564 = vst [vmem:[#allocation1 + $0x21] ss:$4 sm:$0xff] %v4980_v50  ;;  %2798 = vmatpush.msrb.mxu0 %v2732_v4  ;;  %v2955_v21 = vld [vmem:[#allocation9 + $0x850] sm:$0xff]  ;;  %v2965_v4 = vld [vmem:[#allocation9 + $0x8a0] sm:$0xff]  ;;  %v2643_v14 = vld [vmem:[#allocation9 + $0x588] sm:$0xff] }
 0x27d   : > { %3026 = vmatpush.msrb.mxu1 %v2973_v30  ;;  %2566 = vst [vmem:[#allocation1 + $0x22] ss:$4 sm:$0xff] %v5002_v41  ;;  %2472 = vmatpush.msrb.mxu2 %v2420_v43  ;;  %v2412_v43 = vld [vmem:[#allocation9 + $0x308] sm:$0xff] }
 0x27e   : > { %2568 = vst [vmem:[#allocation1 + $0x23] ss:$4 sm:$0xff] %v5007_v59  ;;  %2710 = vmatpush.msrb.mxu3 %v2651_v27  ;;  %2799 = vmatpush.msrb.mxu0 %v2731_v29  ;;  %v2954_v27 = vld [vmem:[#allocation9 + $0x848] sm:$0xff]  ;;  %v2964_v29 = vld [vmem:[#allocation9 + $0x898] sm:$0xff] }
 0x27f   : > { %3027 = vmatpush.msrb.mxu1 %v2972_v10  ;;  %2473 = vmatpush.msrb.mxu2 %v2419_v31  ;;  %v2411_v10 = vld [vmem:[#allocation9 + $0x300] sm:$0xff] }
 0x280   : > { %2711 = vmatpush.msrb.mxu3 %v2650_v48  ;;  %2800 = vmatpush.msrb.mxu0 %v2730_v53  ;;  %v5073_v3 = vld.sshfl [vmem:[#allocation1] sm:$0xff pattern:$0x73625140]  ;;  %v5075_v17 = vld.sshfl [vmem:[#allocation1 + $0x8] sm:$0xff pattern:$0x73625140] }
 0x281   : > { %3028 = vmatpush.msrb.mxu1 %v2971_v2  ;;  %2474 = vmatpush.msrb.mxu2 %v2418_v11  ;;  %2762 = vst [vmem:[#allocation1] ss:$4 sm:$0xff] %v4919_v28  ;;  %v2953_v31 = vld [vmem:[#allocation9 + $0x840] sm:$0xff]  ;;  %v2963_v48 = vld [vmem:[#allocation9 + $0x890] sm:$0xff]  ;;  %v2641_v2 = vld [vmem:[#allocation9 + $0x578] sm:$0xff] }
 0x282   : > { %2712 = vmatpush.msrb.mxu3 %v2649_v51  ;;  %3000 = vmatpush.msra.mxu0 %v2960_v37  ;;  %2764 = vst [vmem:[#allocation1 + $0x1] ss:$4 sm:$0xff] %v4921_v56  ;;  %v2962_v11 = vld [vmem:[#allocation9 + $0x888] sm:$0xff]  ;;  %v2640_v51 = vld [vmem:[#allocation9 + $0x570] sm:$0xff] }
 0x283   : > { %3029 = vmatpush.msrb.mxu1 %v2970_v13  ;;  %2475 = vmatpush.msrb.mxu2 %v2417_v8  ;;  %2766 = vst [vmem:[#allocation1 + $0x2] ss:$4 sm:$0xff] %v4952_v32  ;;  %v2967_v32 = vld [vmem:[#allocation9 + $0x8b0] sm:$0xff]  ;;  %v2961_v13 = vld [vmem:[#allocation9 + $0x880] sm:$0xff]  ;;  %v2639_v8 = vld [vmem:[#allocation9 + $0x568] sm:$0xff] }
 0x284   : > { %2713 = vmatpush.msrb.mxu3 %v2648_v33  ;;  %3001 = vmatpush.msra.mxu0 %v2959_v0  ;;  %2768 = vst [vmem:[#allocation1 + $0x3] ss:$4 sm:$0xff] %v4954_v7  ;;  %v2951_v37 = vld [vmem:[#allocation9 + $0x830] sm:$0xff]  ;;  %v2870_v33 = vld [vmem:[#allocation9 + $0x7e8] sm:$0xff] }
 0x285   : > { %v2571_v44 = vld.sshfl [vmem:[#allocation1 + $0x20] sm:$0xff pattern:$0x73625140]  ;;  %v2572_v28 = vld.sshfl [vmem:[#allocation1 + $0x28] sm:$0xff pattern:$0x73625140]  ;;  %3030 = vmatpush.msrb.mxu1 %v2969_v42  ;;  %2476 = vmatpush.msrb.mxu2 %v2416_v15 }
 0x286   : > { %2596 = vmatmul.f32.gmra.mxu0 %v2571_v44  ;;  %2619 = vmatmul.f32.gmra.mxu1 %v2572_v28  ;;  %2666 = vst [vmem:[#allocation1 + $0x20] ss:$4 sm:$0xff] %v4954_v7  ;;  %v2950_v0 = vld [vmem:[#allocation9 + $0x828] sm:$0xff]  ;;  %v2949_v42 = vld [vmem:[#allocation9 + $0x820] sm:$0xff]  ;;  %v2637_v15 = vld [vmem:[#allocation9 + $0x558] sm:$0xff] }
 0x287   : > { %2668 = vst [vmem:[#allocation1 + $0x21] ss:$4 sm:$0xff] %v4956_v16  ;;  %2714 = vmatpush.msrb.mxu3 %v2647_v20  ;;  %3002 = vmatpush.msra.mxu0 %v2958_v60  ;;  %v2868_v20 = vld [vmem:[#allocation9 + $0x7d8] sm:$0xff]  ;;  %v2945_v44 = vld [vmem:[#allocation9 + $0x800] sm:$0xff] }
 0x288   : > { %2670 = vst [vmem:[#allocation1 + $0x22] ss:$4 sm:$0xff] %v4988_v24  ;;  %3031 = vmatpush.msrb.mxu1 %v2968_v12  ;;  %2477 = vmatpush.msrb.mxu2 %v2415_v40  ;;  %v2867_v12 = vld [vmem:[#allocation9 + $0x7d0] sm:$0xff]  ;;  %v2866_v40 = vld [vmem:[#allocation9 + $0x7c8] sm:$0xff] }
 0x289   : > { %2672 = vst [vmem:[#allocation1 + $0x23] ss:$4 sm:$0xff] %v4990_v49  ;;  %2715 = vmatpush.msrb.mxu3 %v2646_v54  ;;  %3003 = vmatpush.msra.mxu0 %v2957_v55  ;;  %v2633_v54 = vld [vmem:[#allocation9 + $0x538] sm:$0xff] }
 0x28a   : > { %3032 = vmatpush.msrb.mxu1 %v2967_v32  ;;  %2478 = vmatpush.msrb.mxu2 %v2414_v26  ;;  %v2631_v26 = vld [vmem:[#allocation9 + $0x528] sm:$0xff] }
 0x28b   : > { %v2777_v22 = vld.sshfl [vmem:[#allocation1] sm:$0xff pattern:$0x73625140]  ;;  %v2778_v30 = vld.sshfl [vmem:[#allocation1 + $0x8] sm:$0xff pattern:$0x73625140]  ;;  %2716 = vmatpush.msrb.mxu3 %v2645_v61  ;;  %3004 = vmatpush.msra.mxu0 %v2956_v63 }
 0x28c   : > { %2873 = vst [vmem:[#allocation1] ss:$4 sm:$0xff] %v4941_v46  ;;  %3033 = vmatpush.msrb.mxu1 %v2966_v9  ;;  %2479 = vmatpush.msrb.mxu2 %v2413_v6  ;;  %v2642_v46 = vld [vmem:[#allocation9 + $0x580] sm:$0xff]  ;;  %v2862_v61 = vld [vmem:[#allocation9 + $0x7a8] sm:$0xff]  ;;  %v2629_v6 = vld [vmem:[#allocation9 + $0x518] sm:$0xff] }
 0x28d   : > { %2875 = vst [vmem:[#allocation1 + $0x1] ss:$4 sm:$0xff] %v4963_v38  ;;  %2717 = vmatpush.msrb.mxu3 %v2644_v52  ;;  %3005 = vmatpush.msra.mxu0 %v2955_v21  ;;  %v2630_v63 = vld [vmem:[#allocation9 + $0x520] sm:$0xff]  ;;  %v2860_v52 = vld [vmem:[#allocation9 + $0x798] sm:$0xff]  ;;  %v2859_v21 = vld [vmem:[#allocation9 + $0x790] sm:$0xff] }
 0x28e   : > { %2801 = vmatmul.f32.vlgmr.msrb.gmra.mxu0 %v2777_v22  ;;  %2824 = vmatmul.f32.vlgmr.msra.gmra.mxu1 %v2778_v30  ;;  %2877 = vst [vmem:[#allocation1 + $0x2] ss:$4 sm:$0xff] %v4975_v18  ;;  %v2872_v18 = vld [vmem:[#allocation9 + $0x7f8] sm:$0xff]  ;;  %v2861_v9 = vld [vmem:[#allocation9 + $0x7a0] sm:$0xff]  ;;  %v2858_v22 = vld [vmem:[#allocation9 + $0x788] sm:$0xff] }
 0x28f   : > { %2879 = vst [vmem:[#allocation1 + $0x3] ss:$4 sm:$0xff] %v4980_v50  ;;  %3034 = vmatpush.msrb.mxu1 %v2965_v4  ;;  %2480 = vmatpush.msrb.mxu2 %v2412_v43  ;;  %v2952_v50 = vld [vmem:[#allocation9 + $0x838] sm:$0xff]  ;;  %v2855_v43 = vld [vmem:[#allocation9 + $0x770] sm:$0xff] }
 0x290   : > { %v5089_v53 = vld.sshfl [vmem:[#allocation1 + $0x20] sm:$0xff pattern:$0x73625140]  ;;  %v2676_v38 = vld.sshfl [vmem:[#allocation1 + $0x28] sm:$0xff pattern:$0x73625140]  ;;  %2718 = vmatpush.msrb.mxu3 %v2643_v14  ;;  %3006 = vmatpush.msra.mxu0 %v2954_v27 }
 0x291   : > { %2770 = vst [vmem:[#allocation1 + $0x20] ss:$4 sm:$0xff] %v4983_v36  ;;  %3035 = vmatpush.msrb.mxu1 %v2964_v29  ;;  %2481 = vmatpush.msrb.mxu2 %v2411_v10  ;;  %v2871_v36 = vld [vmem:[#allocation9 + $0x7f0] sm:$0xff]  ;;  %v2856_v4 = vld [vmem:[#allocation9 + $0x778] sm:$0xff]  ;;  %v2854_v14 = vld [vmem:[#allocation9 + $0x768] sm:$0xff] }
 0x292   : > { %2772 = vst [vmem:[#allocation1 + $0x21] ss:$4 sm:$0xff] %v4988_v24  ;;  %2719 = vmatpush.msrb.mxu3 %v2642_v46  ;;  %3007 = vmatpush.msra.mxu0 %v2953_v31  ;;  %v2853_v27 = vld [vmem:[#allocation9 + $0x760] sm:$0xff]  ;;  %v2852_v29 = vld [vmem:[#allocation9 + $0x758] sm:$0xff]  ;;  %v2851_v10 = vld [vmem:[#allocation9 + $0x750] sm:$0xff] }
 0x293   : > { %2774 = vst [vmem:[#allocation1 + $0x22] ss:$4 sm:$0xff] %v2071_v47  ;;  %3036 = vmatpush.msrb.mxu1 %v2963_v48  ;;  %2482 = vmatmul.f32.vlgmr.msrb.gmra.mxu2 %v5052_v39  ;;  %v2638_v39 = vld [vmem:[#allocation9 + $0x560] sm:$0xff]  ;;  %v2850_v46 = vld [vmem:[#allocation9 + $0x748] sm:$0xff]  ;;  %v2847_v48 = vld [vmem:[#allocation9 + $0x730] sm:$0xff] }
 0x294   : > { %2776 = vst [vmem:[#allocation1 + $0x23] ss:$4 sm:$0xff] %v5010_v5  ;;  %2681 = vmatpush.msra.mxu2 %v2641_v2  ;;  %2720 = vmatmul.f32.vlgmr.msrb.gmra.mxu3 %v5075_v17  ;;  %v2869_v17 = vld [vmem:[#allocation9 + $0x7e0] sm:$0xff] }
 0x295   : > { %2919 = vmatpush.msra.mxu3 %v2872_v18  ;;  %3008 = vmatpush.msra.mxu0 %v2952_v50  ;;  %v2849_v31 = vld [vmem:[#allocation9 + $0x740] sm:$0xff]  ;;  %v2844_v18 = vld [vmem:[#allocation9 + $0x718] sm:$0xff]  ;;  %v2843_v50 = vld [vmem:[#allocation9 + $0x710] sm:$0xff] }
 0x296   : > { %v5098_v23 = vld.sshfl [vmem:[#allocation1] sm:$0xff pattern:$0x73625140]  ;;  %v5100_v47 = vld.sshfl [vmem:[#allocation1 + $0x8] sm:$0xff pattern:$0x73625140]  ;;  %3037 = vmatpush.msrb.mxu1 %v2962_v11  ;;  %2682 = vmatpush.msra.mxu2 %v2640_v51 }
 0x297   : > { %2977 = vst [vmem:[#allocation1] ss:$4 sm:$0xff] %v4921_v56  ;;  %2920 = vmatpush.msra.mxu3 %v2871_v36  ;;  %3009 = vmatpush.msra.mxu0 %v2951_v37  ;;  %v2845_v2 = vld [vmem:[#allocation9 + $0x720] sm:$0xff] }
 0x298   : > { %2979 = vst [vmem:[#allocation1 + $0x1] ss:$4 sm:$0xff] %v4947_v19  ;;  %3038 = vmatpush.msrb.mxu1 %v2961_v13  ;;  %2683 = vmatpush.msra.mxu2 %v2639_v8  ;;  %v2948_v19 = vld [vmem:[#allocation9 + $0x818] sm:$0xff]  ;;  %v2841_v11 = vld [vmem:[#allocation9 + $0x700] sm:$0xff] }
 0x299   : > { %2981 = vst [vmem:[#allocation1 + $0x2] ss:$4 sm:$0xff] %v4954_v7  ;;  %2921 = vmatpush.msra.mxu3 %v2870_v33  ;;  %3010 = vmatpush.msra.mxu0 %v2950_v0  ;;  %v2636_v7 = vld [vmem:[#allocation9 + $0x550] sm:$0xff] }
 0x29a   : > { %2983 = vst [vmem:[#allocation1 + $0x3] ss:$4 sm:$0xff] %v4956_v16  ;;  %2684 = vmatpush.msra.mxu2 %v2638_v39  ;;  %v2947_v16 = vld [vmem:[#allocation9 + $0x810] sm:$0xff] }
 0x29b   : > { %v2779_v60 = vld.sshfl [vmem:[#allocation1 + $0x20] sm:$0xff pattern:$0x73625140]  ;;  %v2780_v56 = vld.sshfl [vmem:[#allocation1 + $0x28] sm:$0xff pattern:$0x73625140]  ;;  %2922 = vmatpush.msra.mxu3 %v2869_v17  ;;  %3011 = vmatpush.msra.mxu0 %v2949_v42 }
 0x29c   : > { %2804 = vmatmul.f32.gmra.mxu0 %v2779_v60  ;;  %2827 = vmatmul.f32.gmra.mxu1 %v2780_v56  ;;  %2881 = vst [vmem:[#allocation1 + $0x20] ss:$4 sm:$0xff] %v5002_v41  ;;  %v2635_v41 = vld [vmem:[#allocation9 + $0x548] sm:$0xff] }
 0x29d   : > { %2883 = vst [vmem:[#allocation1 + $0x21] ss:$4 sm:$0xff] %v5007_v59  ;;  %2485 = vmatmul.f32.gmra.mxu2 %v5067_v57  ;;  %2723 = vmatmul.f32.gmra.mxu3 %v2676_v38  ;;  %v2946_v59 = vld [vmem:[#allocation9 + $0x808] sm:$0xff]  ;;  %v2634_v57 = vld [vmem:[#allocation9 + $0x540] sm:$0xff] }
 0x29e   : > { %2885 = vst [vmem:[#allocation1 + $0x22] ss:$4 sm:$0xff] %v5025_v35  ;;  %2685 = vmatpush.msra.mxu2 %v2637_v15  ;;  %2923 = vmatpush.msra.mxu3 %v2868_v20  ;;  %v2865_v35 = vld [vmem:[#allocation9 + $0x7c0] sm:$0xff]  ;;  %v2846_v38 = vld [vmem:[#allocation9 + $0x728] sm:$0xff] }
 0x29f   : > { %2887 = vst [vmem:[#allocation1 + $0x23] ss:$4 sm:$0xff] %v2839_v45  ;;  %3012 = vmatpush.msra.mxu0 %v2948_v19  ;;  %v2863_v45 = vld [vmem:[#allocation9 + $0x7b0] sm:$0xff] }
 0x2a0   : > { %2686 = vmatpush.msra.mxu2 %v2636_v7  ;;  %2924 = vmatpush.msra.mxu3 %v2867_v12 }
 0x2a1   : > { %3013 = vmatpush.msra.mxu0 %v2947_v16  ;;  %v2993_v28 = vld.sshfl [vmem:[#allocation1 + $0x8] sm:$0xff pattern:$0x73625140]  ;;  %v2992_v34 = vld.sshfl [vmem:[#allocation1] sm:$0xff pattern:$0x73625140] }
 0x2a2   : > { %2687 = vmatpush.msra.mxu2 %v2635_v41  ;;  %2925 = vmatpush.msra.mxu3 %v2866_v40 }
 0x2a3   : > { %3014 = vmatpush.msra.mxu0 %v2946_v59 }
 0x2a4   : > { %3039 = vmatmul.f32.vlgmr.msrb.gmra.mxu1 %v2993_v28  ;;  %2688 = vmatpush.msra.mxu2 %v2634_v57 }
 0x2a5   : > { %2926 = vmatpush.msra.mxu3 %v2865_v35  ;;  %3015 = vmatpush.msra.mxu0 %v2945_v44 }
 0x2a6   : > { %v5115_v55 = vld.sshfl [vmem:[#allocation1 + $0x20] sm:$0xff pattern:$0x73625140]  ;;  %v2891_v32 = vld.sshfl [vmem:[#allocation1 + $0x28] sm:$0xff pattern:$0x73625140]  ;;  %2689 = vmatpush.msra.mxu2 %v2633_v54  ;;  %3016 = vmatmul.f32.vlgmr.msra.gmra.mxu0 %v2992_v34 }
 0x2a7   : > { %2985 = vst [vmem:[#allocation1 + $0x20] ss:$4 sm:$0xff] %v4988_v24  ;;  %2927 = vmatpush.msra.mxu3 %v2864_v62  ;;  %v2628_v24 = vld [vmem:[#allocation9 + $0x510] sm:$0xff] }
 0x2a8   : > { %2987 = vst [vmem:[#allocation1 + $0x21] ss:$4 sm:$0xff] %v4990_v49  ;;  %2690 = vmatpush.msra.mxu2 %v2632_v1  ;;  %v2627_v49 = vld [vmem:[#allocation9 + $0x508] sm:$0xff] }
 0x2a9   : > { %2989 = vst [vmem:[#allocation1 + $0x22] ss:$4 sm:$0xff] %v5010_v5  ;;  %2928 = vmatpush.msra.mxu3 %v2863_v45 }
 0x2aa   : > { %2991 = vst [vmem:[#allocation1 + $0x23] ss:$4 sm:$0xff] %v2074_v58  ;;  %2691 = vmatpush.msra.mxu2 %v2631_v26  ;;  %v2857_v58 = vld [vmem:[#allocation9 + $0x780] sm:$0xff] }
 0x2ab   : > { %2929 = vmatpush.msra.mxu3 %v2862_v61 }
 0x2ac   : > { %2692 = vmatpush.msra.mxu2 %v2630_v63 }
 0x2ad   : > { %2930 = vmatpush.msra.mxu3 %v2861_v9 }
 0x2ae   : > { %2693 = vmatpush.msra.mxu2 %v2629_v6 }
 0x2af   : > { %2931 = vmatpush.msra.mxu3 %v2860_v52 }
 0x2b0   : > { %2694 = vmatpush.msra.mxu2 %v2628_v24 }
 0x2b1   : > { %v2995_v5 = vld.sshfl [vmem:[#allocation1 + $0x28] sm:$0xff pattern:$0x73625140]  ;;  %v2994_v30 = vld.sshfl [vmem:[#allocation1 + $0x20] sm:$0xff pattern:$0x73625140]  ;;  %2932 = vmatpush.msra.mxu3 %v2859_v21 }
 0x2b2   : > { %3042 = vmatmul.f32.gmra.mxu1 %v2995_v5  ;;  %3019 = vmatmul.f32.gmra.mxu0 %v2994_v30 }
 0x2b3   : > { %2695 = vmatpush.msra.mxu2 %v2627_v49  ;;  %2933 = vmatpush.msra.mxu3 %v2858_v22 }
 0x2b5   : > { %2696 = vmatpush.msra.mxu2 %v2626_v25  ;;  %2934 = vmatpush.msra.mxu3 %v2857_v58 }
 0x2b6   : > { %2697 = vmatmul.f32.vlgmr.msra.gmra.mxu2 %v5073_v3  ;;  %2935 = vmatmul.f32.vlgmr.msra.gmra.mxu3 %v5100_v47  ;;  %v2848_v3 = vld [vmem:[#allocation9 + $0x738] sm:$0xff] }
 0x2b7   : > { %2896 = vmatpush.msrb.mxu2 %v2856_v4 }
 0x2b9   : > { %2897 = vmatpush.msrb.mxu2 %v2855_v43 }
 0x2bb   : > { %2898 = vmatpush.msrb.mxu2 %v2854_v14 }
 0x2bd   : > { %2899 = vmatpush.msrb.mxu2 %v2853_v27 }
 0x2be   : > { %2700 = vmatmul.f32.gmra.mxu2 %v5089_v53  ;;  %2938 = vmatmul.f32.gmra.mxu3 %v2891_v32  ;;  %v2842_v53 = vld [vmem:[#allocation9 + $0x708] sm:$0xff] }
 0x2bf   : > { %2900 = vmatpush.msrb.mxu2 %v2852_v29 }
 0x2c1   : > { %2901 = vmatpush.msrb.mxu2 %v2851_v10 }
 0x2c3   : > { %2902 = vmatpush.msrb.mxu2 %v2850_v46 }
 0x2c5   : > { %2903 = vmatpush.msrb.mxu2 %v2849_v31 }
 0x2c7   : > { %2904 = vmatpush.msrb.mxu2 %v2848_v3 }
 0x2c9   : > { %2905 = vmatpush.msrb.mxu2 %v2847_v48 }
 0x2cb   : > { %2906 = vmatpush.msrb.mxu2 %v2846_v38  ;;  %v3729_v38 = vld [vmem:[#allocation11] ss:$0 sm:$0xff] }
 0x2cd   : > { %2907 = vmatpush.msrb.mxu2 %v2845_v2  ;;  %v2208_v51 = vpop.f32.mrf.mxu2  ;;  %v2231_v37 = vpop.f32.mrf.mxu3 }
 0x2ce   : > { %v2232_v57 = vadd.f32 %v2231_v37, %v2208_v51  ;;  %v3730_v51 = vld [vmem:[#allocation12] ss:$0 sm:$0xff] }
 0x2cf   : > { %2908 = vmatpush.msrb.mxu2 %v2844_v18 }
 0x2d1   : > { %2909 = vmatpush.msrb.mxu2 %v2843_v50 }
 0x2d3   : > { %2910 = vmatpush.msrb.mxu2 %v2842_v53 }
 0x2d5   : > { %2911 = vmatpush.msrb.mxu2 %v2841_v11 }
 0x2d6   : > { %2912 = vmatmul.f32.vlgmr.msrb.gmra.mxu2 %v5098_v23 }
 0x2da   : > { %v2211_v36 = vpop.f32.mrf.mxu2 }
 0x2db   : > { %v2234_v8 = vpop.f32.mrf.mxu3 }
 0x2dc   : > { %v2235_v34 = vadd.f32 %v2234_v8, %v2211_v36 }
 0x2dd   : > { %v2379_v0 = vpop.f32.mrf.mxu0 }
 0x2de   : > { %2915 = vmatmul.f32.gmra.mxu2 %v5115_v55 }
 0x2e2   : > { %v2277_v13 = vpop.f32.mrf.mxu2 }
 0x2e3   : > { %v2300_v47 = vpop.f32.mrf.mxu3  ;;  %v2278_v44 = vadd.f32 %v2277_v13, %v2232_v57 }
 0x2e5   : > { %v2301_v54 = vadd.f32 %v2300_v47, %v2278_v44 }
 0x2ea   : > { %v2280_v33 = vpop.f32.mrf.mxu2 }
 0x2eb   : > { %v2303_v42 = vpop.f32.mrf.mxu3  ;;  %v2281_v26 = vadd.f32 %v2280_v33, %v2235_v34 }
 0x2ed   : > { %v2382_v17 = vpop.f32.mrf.mxu0  ;;  %v2304_v24 = vadd.f32 %v2303_v42, %v2281_v26 }
 0x2f3   : > { %v2617_v60 = vpop.f32.mrf.mxu1 }
 0x2f4   : > { %v2402_v39 = vpop.f32.mrf.mxu2 }
 0x2f5   : > { %v2594_v20 = vpop.f32.mrf.mxu0  ;;  %v2506_v56 = vpop.f32.mrf.mxu3  ;;  %v2403_v28 = vadd.f32 %v2402_v39, %v2379_v0 }
 0x2f6   : > { %v2618_v9 = vadd.f32 %v2617_v60, %v2594_v20 }
 0x2f7   : > { %v2408_v1 = vadd.f32 %v2403_v28, %v2301_v54 }
 0x2fe   : > { %v2405_v15 = vpop.f32.mrf.mxu2 }
 0x2ff   : > { %v2509_v12 = vpop.f32.mrf.mxu3  ;;  %v2406_v6 = vadd.f32 %v2405_v15, %v2382_v17 }
 0x301   : > { %v2409_v22 = vadd.f32 %v2406_v6, %v2304_v24 }
 0x303   : > { %v2597_v7 = vpop.f32.mrf.mxu0  ;;  %v2620_v23 = vpop.f32.mrf.mxu1 }
 0x304   : > { %v2621_v27 = vadd.f32 %v2620_v23, %v2597_v7  ;;  %v3731_v23 = vld [vmem:[#allocation12 + $0x1] ss:$0 sm:$0xff] }
 0x30b   : > { %v2802_v41 = vpop.f32.mrf.mxu0  ;;  %v2825_v40 = vpop.f32.mrf.mxu1 }
 0x30c   : > { %v2826_v58 = vadd.f32 %v2825_v40, %v2802_v41 }
 0x316   : > { %v2483_v19 = vpop.f32.mrf.mxu2 }
 0x317   : > { %v2721_v59 = vpop.f32.mrf.mxu3  ;;  %v2507_v62 = vadd.f32 %v2506_v56, %v2483_v19 }
 0x319   : > { %v2805_v45 = vpop.f32.mrf.mxu0  ;;  %v2828_v55 = vpop.f32.mrf.mxu1  ;;  %v2512_v61 = vadd.f32 %v2507_v62, %v2408_v1 }
 0x31a   : > { %v2829_v50 = vadd.f32 %v2828_v55, %v2805_v45  ;;  %v3087_v45 = vld [vmem:[#allocation15] sm:$0xf]  ;;  %v3092_v55 = vlaneseq }
 0x31b   : > { %v2623_v49 = vadd.f32 %v2618_v9, %v2512_v61  ;;  %3563 = vmatpush.msk.msra.mxu2 %vm3068_vm11, %v3087_v45  ;;  %v3082_v61 = vstv %s3081_s25  ;;  %s3971_s25 = sshra.s32 %s3376_s29, 4  ;;  %s3972_s25 = int_to_ptr.hbm [resolvable:$true] %s3971_s25 }
 0x31c   : > { %v3093_v9 = vand.u32 127, %v3092_v55  ;;  %p3978_p12 = scmp.lt.s32.totalorder %s3972_s25, %s5267_s10 }
 0x320   : > { %v2486_v16 = vpop.f32.mrf.mxu2  ;;  %v2724_v32 = vpop.f32.mrf.mxu3 }
 0x321   : > { %v2510_v21 = vadd.f32 %v2509_v12, %v2486_v16  ;;  %v3040_v43 = vpop.f32.mrf.mxu1 }
 0x323   : > { %v3017_v5 = vpop.f32.mrf.mxu0  ;;  %v2513_v4 = vadd.f32 %v2510_v21, %v2409_v22 }
 0x324   : > { %v3041_v31 = vadd.f32 %v3040_v43, %v3017_v5  ;;  %v3233_v43 = vstv %s3574_s3  ;;  %s3973_s3 = scalar_lea.hbm %s3972_s25, 128 }
 0x325   : > { %v2624_v3 = vadd.f32 %v2621_v27, %v2513_v4  ;;  %p3974_p1 = scmp.ne.s32.totalorder %s3972_s25, %s3973_s3  ;;  %p3979_p8 = scmp.lt.s32.totalorder %s3977_s26, %s3973_s3 }
 0x327   : > { %p3975_p3 = pnand %p3974_p1, %p4213_p13  ;;  %p3980_p7 = por %p3979_p8, %p3978_p12 }
 0x329   : > { %p3976_p5 = pneg %p3975_p3 }
 0x32b   : > { %p3981_p9 = pnand %p3980_p7, %p3976_p5 }
 0x32f   : > { %v3020_v53 = vpop.f32.mrf.mxu0  ;;  %v3043_v0 = vpop.f32.mrf.mxu1 }
 0x330   : > { %v3044_v47 = vadd.f32 %v3043_v0, %v3020_v53  ;;  %v3131_v0 = vld [vmem:[%s5265_s8 + $0x10] sm:$0xff] }
 0x339   : > { %v2698_v35 = vpop.f32.mrf.mxu2  ;;  %v2936_v25 = vpop.f32.mrf.mxu3 }
 0x33a   : > { %v2722_v52 = vadd.f32 %v2721_v59, %v2698_v35 }
 0x33c   : > { %v2727_v30 = vadd.f32 %v2722_v52, %v2623_v49 }
 0x33e   : > { %v2831_v10 = vadd.f32 %v2826_v58, %v2727_v30 }
 0x341   : > { %v2701_v63 = vpop.f32.mrf.mxu2  ;;  %v2939_v36 = vpop.f32.mrf.mxu3 }
 0x342   : > { %v2725_v29 = vadd.f32 %v2724_v32, %v2701_v63 }
 0x344   : > { %v2728_v2 = vadd.f32 %v2725_v29, %v2624_v3 }
 0x346   : > { %v2832_v13 = vadd.f32 %v2829_v50, %v2728_v2 }
 0x359   : > { %v2913_v14 = vpop.f32.mrf.mxu2 }
 0x35a   : > { %v2937_v46 = vadd.f32 %v2936_v25, %v2913_v14 }
 0x35c   : > { %v2942_v48 = vadd.f32 %v2937_v46, %v2831_v10 }
 0x35e   : > { %v3046_v18 = vadd.f32 %v3041_v31, %v2942_v48 }
 0x360   : > { %v3052_v11 = vadd.f32 %v3729_v38, %v3046_v18 }
 0x361   : > { %v2916_v37 = vpop.f32.mrf.mxu2 }
 0x362   : > { %v2940_v8 = vadd.f32 %v2939_v36, %v2916_v37  ;;  %v3054_v33 = vmax.f32 %v3052_v11, 0.0  ;;  %v3129_v37 = vld [vmem:[%s5265_s8] sm:$0xff] }
 0x364   : > { %v2943_v39 = vadd.f32 %v2940_v8, %v2832_v13  ;;  %v3064_v17 = vmul.f32 %v3730_v51, %v3054_v33  ;;  %v3058_v42 = vrot.slane %v3054_v33, 4  ;;  %v3216_v28 = vmul.f32 %v3731_v23, %v3054_v33  ;;  %v3238_v8 = vld [vmem:[#allocation15] sm:$0xf] }
 0x365   : > { %v3130_v33 = vld [vmem:[%s5265_s8 + $0x8] sm:$0xff] }
 0x366   : > { %v3047_v15 = vadd.f32 %v3044_v47, %v2943_v39  ;;  %v3069_v20 = vsel %vm3068_vm11, %v3064_v17, 0.0  ;;  %v3065_v60 = vmul.f32 %v3730_v51, %v3058_v42  ;;  %v3217_v16 = vmul.f32 %v3731_v23, %v3058_v42  ;;  %v3132_v17 = vld [vmem:[%s5265_s8 + $0x18] sm:$0xff] }
 0x367   : > { %3070 = vadd.xlane.f32.xlu2 %v3069_v20  ;;  %v3220_v62 = vsel %vm3068_vm11, %v3216_v28, 0.0 }
 0x368   : > { %v3053_v56 = vadd.f32 %v3729_v38, %v3047_v15  ;;  %v3072_v19 = vsel %vm3068_vm11, %v3065_v60, 0.0  ;;  %v3223_v57 = vsel %vm3068_vm11, %v3217_v16, 0.0  ;;  %v3133_v15 = vld [vmem:[%s5265_s8 + $0x20] sm:$0xff]  ;;  %v3134_v60 = vld [vmem:[%s5265_s8 + $0x28] sm:$0xff] }
 0x369   : > { %3073 = vadd.xlane.f32.xlu0 %v3072_v19  ;;  %v3136_v19 = vld [vmem:[%s5265_s8 + $0x38] sm:$0xff] }
 0x36a   : > { %v3055_v7 = vmax.f32 %v3053_v56, 0.0  ;;  %v3135_v56 = vld [vmem:[%s5265_s8 + $0x30] sm:$0xff] }
 0x36c   : > { %v3066_v12 = vmul.f32 %v3730_v51, %v3055_v7  ;;  %v3059_v41 = vrot.slane %v3055_v7, 4  ;;  %v3218_v44 = vmul.f32 %v3731_v23, %v3055_v7 }
 0x36e   : > { %v3075_v40 = vsel %vm3068_vm11, %v3066_v12, 0.0  ;;  %v3067_v59 = vmul.f32 %v3730_v51, %v3059_v41  ;;  %v3226_v54 = vsel %vm3068_vm11, %v3218_v44, 0.0  ;;  %v3219_v34 = vmul.f32 %v3731_v23, %v3059_v41 }
 0x36f   : > { %3076 = vadd.xlane.f32.xlu1 %v3075_v40 }
 0x370   : > { %v3078_v35 = vsel %vm3068_vm11, %v3067_v59, 0.0  ;;  %v3229_v1 = vsel %vm3068_vm11, %v3219_v34, 0.0 }
 0x371   : > { %3224 = vadd.xlane.f32.xlu0 %v3223_v57  ;;  %3079 = vadd.xlane.f32.xlu2 %v3078_v35 }
 0x377   : > { %3227 = vadd.xlane.f32.xlu1 %v3226_v54 }
 0x379   : > { %3221 = vadd.xlane.f32.xlu2 %v3220_v62 }
 0x381   : > { %3230 = vadd.xlane.f32.xlu2 %v3229_v1 }
 0x3da   : > { %v3071_v32 = vpop.xlane.xlu2 %3070 }
 0x3db   : > { %v3083_v6 = vadd.f32 %v3082_v61, %v3071_v32 }
 0x3dc   : > { %v3074_v26 = vpop.xlane.xlu0 %3073 }
 0x3dd   : > { %v3084_v63 = vadd.f32 %v3082_v61, %v3074_v26  ;;  %v3094_v49 = vperm.slane %v3083_v6, %v3093_v9 }
 0x3df   : > { %v3095_v52 = vperm.slane %v3084_v63, %v3093_v9 }
 0x3e1   : > { %v3099_v25 = vsel %vm3098_vm12, %v3095_v52, %v3094_v49 }
 0x3e2   : > { %v3077_v24 = vpop.xlane.xlu1 %3076 }
 0x3e3   : > { %v3085_v21 = vadd.f32 %v3082_v61, %v3077_v24 }
 0x3e4   : > { %v3080_v22 = vpop.xlane.xlu2 %3079  ;;  %v3225_v14 = vpop.xlane.xlu0 %3224 }
 0x3e5   : > { %v3096_v5 = vperm.slane %v3085_v21, %v3093_v9  ;;  %v3086_v30 = vadd.f32 %v3082_v61, %v3080_v22  ;;  %v3235_v10 = vadd.f32 %v3233_v43, %v3225_v14 }
 0x3e7   : > { %v3100_v58 = vsel %vm550_vm1, %v3096_v5, %v3099_v25  ;;  %v3097_v4 = vperm.slane %v3086_v30, %v3093_v9  ;;  %v3244_v48 = vperm.slane %v3235_v10, %v3093_v9 }
 0x3e9   : > { %v3102_v27 = vsel %vm3101_vm13, %v3097_v4, %v3100_v58 }
 0x3ea   : > { %v3228_v29 = vpop.xlane.xlu1 %3227  ;;  %3564 = vmatmul.msk.f32.vlgmr.msra.gmra.mxu2 %vm3103_vm14, %v3102_v27 }
 0x3eb   : > { %v3236_v46 = vadd.f32 %v3233_v43, %v3228_v29 }
 0x3ec   : > { %v3222_v31 = vpop.xlane.xlu2 %3221 }
 0x3ed   : > { %v3234_v3 = vadd.f32 %v3233_v43, %v3222_v31  ;;  %v3245_v2 = vperm.slane %v3236_v46, %v3093_v9 }
 0x3ef   : > { %v3243_v38 = vperm.slane %v3234_v3, %v3093_v9 }
 0x3f1   : > { %v3247_v18 = vsel %vm3098_vm12, %v3244_v48, %v3243_v38 }
 0x3f2   : > { %v3248_v50 = vsel %vm550_vm1, %v3245_v2, %v3247_v18 }
 0x3f4   : > { %v3231_v53 = vpop.xlane.xlu2 %3230 }
 0x3f5   : > { %v3237_v11 = vadd.f32 %v3233_v43, %v3231_v53 }
 0x3f7   : > { %v3246_v51 = vperm.slane %v3237_v11, %v3093_v9 }
 0x3f9   : > { %v3249_v36 = vsel %vm3101_vm13, %v3246_v51, %v3248_v50 }
 0x46d   : > { %v3126_v13 = vpop.f32.mrf.mxu2 }
 0x46e   : > { %3565 = vmatpush.msk.msrb.mxu0 %vm3068_vm11, %v3126_v13  ;;  %3601 = vmatpush.msk.msrb.mxu3 %vm3068_vm11, %v3126_v13 }
 0x46f   : > { %3566 = vmatmul.msk.f32.vlgmr.msrb.gmra.mxu0 %vm3103_vm14, %v3129_v37  ;;  %3569 = vmatmul.msk.f32.vlgmr.msrb.gmra.mxu3 %vm3103_vm14, %v3132_v17 }
 0x470   : > { %3575 = vmatpush.msk.msra.mxu0 %vm3068_vm11, %v3238_v8 }
 0x477   : > { %3567 = vmatmul.msk.f32.gmra.mxu0 %vm3103_vm14, %v3130_v33  ;;  %3570 = vmatmul.msk.f32.gmra.mxu3 %vm3103_vm14, %v3133_v15 }
 0x47f   : > { %3568 = vmatmul.msk.f32.gmra.mxu0 %vm3103_vm14, %v3131_v0  ;;  %3571 = vmatmul.msk.f32.gmra.mxu3 %vm3103_vm14, %v3134_v60 }
 0x487   : > { %3576 = vmatmul.msk.f32.vlgmr.msra.gmra.mxu0 %vm3103_vm14, %v3249_v36  ;;  %3572 = vmatmul.msk.f32.gmra.mxu3 %vm3103_vm14, %v3135_v56 }
 0x48f   : > { %3573 = vmatmul.msk.f32.gmra.mxu3 %vm3103_vm14, %v3136_v19 }
 0x4ec   : > { %v3181_v47 = vpop.f32.mrf.mxu0 }
 0x4ed   : > { %3206 = vst.msk [vmem:[%s5160_s18] sm:$0xff] %vm3205_vm15, %v3181_v47 }
 0x4f2   : > { %v3190_v7 = vpop.f32.mrf.mxu3 }
 0x4f3   : > { %3209 = vst.msk [vmem:[%s5160_s18 + $0x18] sm:$0xff] %vm3205_vm15, %v3190_v7 }
 0x4f4   : > { %v3184_v39 = vpop.f32.mrf.mxu0 }
 0x4f5   : > { %3207 = vst.msk [vmem:[%s5160_s18 + $0x8] sm:$0xff] %vm3205_vm15, %v3184_v39 }
 0x4fa   : > { %v3193_v23 = vpop.f32.mrf.mxu3 }
 0x4fb   : > { %3210 = vst.msk [vmem:[%s5160_s18 + $0x20] sm:$0xff] %vm3205_vm15, %v3193_v23 }
 0x4fc   : > { %v3187_v42 = vpop.f32.mrf.mxu0 }
 0x4fd   : > { %3208 = vst.msk [vmem:[%s5160_s18 + $0x10] sm:$0xff] %vm3205_vm15, %v3187_v42 }
 0x502   : > { %v3196_v16 = vpop.f32.mrf.mxu3 }
 0x503   : > { %3211 = vst.msk [vmem:[%s5160_s18 + $0x28] sm:$0xff] %vm3205_vm15, %v3196_v16 }
 0x504   : > { %v3272_v20 = vpop.f32.mrf.mxu0 }
 0x505   : > { %3577 = vmatpush.msk.msra.mxu1 %vm3068_vm11, %v3272_v20 }
 0x506   : > { %3578 = vmatmul.msk.f32.vlgmr.msra.gmra.mxu1 %vm3103_vm14, %v3129_v37 }
 0x50a   : > { %v3199_v40 = vpop.f32.mrf.mxu3 }
 0x50b   : > { %3212 = vst.msk [vmem:[%s5160_s18 + $0x30] sm:$0xff] %vm3205_vm15, %v3199_v40 }
 0x50e   : > { %3579 = vmatmul.msk.f32.gmra.mxu1 %vm3103_vm14, %v3130_v33 }
 0x512   : > { %v3202_v57 = vpop.f32.mrf.mxu3 }
 0x513   : > { %3213 = vst.msk [vmem:[%s5160_s18 + $0x38] sm:$0xff] %vm3205_vm15, %v3202_v57 }
 0x516   : > { %3580 = vmatmul.msk.f32.gmra.mxu1 %vm3103_vm14, %v3131_v0 }
 0x51e   : > { %3581 = vmatmul.msk.f32.gmra.mxu1 %vm3103_vm14, %v3132_v17 }
 0x526   : > { %3582 = vmatmul.msk.f32.gmra.mxu1 %vm3103_vm14, %v3133_v15 }
 0x52e   : > { %3583 = vmatmul.msk.f32.gmra.mxu1 %vm3103_vm14, %v3134_v60 }
 0x536   : > { %3584 = vmatmul.msk.f32.gmra.mxu1 %vm3103_vm14, %v3135_v56 }
 0x53e   : > { %3585 = vmatmul.msk.f32.gmra.mxu1 %vm3103_vm14, %v3136_v19 }
 0x583   : > { %v3327_v12 = vpop.f32.mrf.mxu1 }
 0x584   : > { %3586 = vst.msk [vmem:[%s5160_s18 + $0x40] sm:$0xff] %vm3205_vm15, %v3327_v12 }
 0x58b   : > { %v3330_v41 = vpop.f32.mrf.mxu1 }
 0x58c   : > { %3587 = vst.msk [vmem:[%s5160_s18 + $0x48] sm:$0xff] %vm3205_vm15, %v3330_v41 }
 0x593   : > { %v3333_v59 = vpop.f32.mrf.mxu1 }
 0x594   : > { %3588 = vst.msk [vmem:[%s5160_s18 + $0x50] sm:$0xff] %vm3205_vm15, %v3333_v59 }
 0x59b   : > { %v3336_v35 = vpop.f32.mrf.mxu1 }
 0x59c   : > { %3589 = vst.msk [vmem:[%s5160_s18 + $0x58] sm:$0xff] %vm3205_vm15, %v3336_v35 }
 0x5a3   : > { %v3339_v44 = vpop.f32.mrf.mxu1 }
 0x5a4   : > { %3590 = vst.msk [vmem:[%s5160_s18 + $0x60] sm:$0xff] %vm3205_vm15, %v3339_v44 }
 0x5ab   : > { %v3342_v28 = vpop.f32.mrf.mxu1 }
 0x5ac   : > { %3591 = vst.msk [vmem:[%s5160_s18 + $0x68] sm:$0xff] %vm3205_vm15, %v3342_v28 }
 0x5b3   : > { %v3345_v54 = vpop.f32.mrf.mxu1 }
 0x5b4   : > { %3592 = vst.msk [vmem:[%s5160_s18 + $0x70] sm:$0xff] %vm3205_vm15, %v3345_v54 }
 0x5bb   : > { %v3348_v62 = vpop.f32.mrf.mxu1 }
 0x5bc   : > { %3593 = vst.msk [vmem:[%s5160_s18 + $0x78] sm:$0xff] %vm3205_vm15, %v3348_v62 }
 0x5bd   : > { %3984 = shalt.err (!%p3981_p9)
}
 0x5be   : > { %s4057_s11 = smov 128   ;;  %s4058_s18 = smov 8  }
 0x5bf   : > { %3632 = dma.vmem_to_hbm [thread:$0]  (%p4213_p13), %s3374_s30, 2048, %s3376_s29, %s3361_s19, %s4057_s11, %s4057_s11, %s4058_s18  }
 0x5c0 PF: > { %s3390_s17 = sand.u32 1, %s4031_s13   ;;  %p5300_p10 = scmp.ge.s32.totalorder %s4043_s16, 2 }
 0x5c1   : > { %s3391_s27 = scalar_lea.sflag [#allocation4], %s3390_s17 }
 0x5c2   : > { %p3661_p11 = pnand %p5300_p10, %p4218_p4 }
 0x5c4   : > { %p3662_p0 = pneg %p3661_p11 }
 0x5c6   : > { %4026 = dma.done.wait (%p3662_p0), %s3391_s27, 2048  }
 0x5c7   : > { %4028 = vsyncadd (%p3662_p0), %s3391_s27, 4294965248  ;;  %p27_p2 = scmp.ge.s32.totalorder %s4193_s22, 4   ;;  %s5301_s13 = smov %s4035_s14 }
 0x5c8   : > { %s5302_s14 = smov %s4039_s15  ;;  %s5303_s15 = smov %s4205_s24 }
 0x5c9   : > { %s5304_s16 = smov %s4193_s22  ;;  %29 = sbr.rel (!%p27_p2) target bundleno = 14 (0xe), region = 295 }
 0x5ce   :  { %3397 = vsyncpa [#allocation3], 1 }
 0x5cf   :  { %3399 = vsyncpa [#allocation3 + $0x1], 1 }
 0x5d0   :  { %3400 = vsyncpa [#allocation7], 1 }
 0x5d1   :  { %3401 = vsyncpa [#allocation10], 1 }
 0x5d2   :  { %3402 = vsyncpa [#allocation13], 1 }
 0x5d3   :  { %3403 = vsyncpa [#allocation4], 1 }
 0x5d4   :  { %3405 = vsyncpa [#allocation4 + $0x1], 1 }
 0x5d5   :  { %3406 = vsyncpa [#allocation5], 1 }
 0x5d6   :  { %3408 = vsyncpa [#allocation5 + $0x1], 1 }

</bundles_post_ra>
